<compile_context>
chip_gen: v6e
topology: v6e:2x2x1
jax: 0.10.0
libtpu: 0.0.40
codegen_flags: <defaults>
</compile_context>

<pallas_src>
import functools

import jax
import jax.numpy as jnp
from jax.experimental import pallas as pl
from jax.experimental.pallas import tpu as pltpu


# ----------------------------------------------------------------------------
# helpers
# ----------------------------------------------------------------------------
def _full_spec(shape):
    zeros = (0,) * len(shape)
    return pl.BlockSpec(shape, lambda i, _z=zeros: _z)


# ----------------------------------------------------------------------------
# fused forward kernel
# ----------------------------------------------------------------------------
def _fused_forward_kernel(*refs, num_layers, num_heads):
    it = iter(refs)
    x_ref = next(it)       # (N, 128)     bf16 zero-padded raw node features
    txt_ref = next(it)     # (N, 4*td)    bf16 [bio | expertise | needs | goals]
    wtxt_ref = next(it)    # (4*td, 4*td) bf16 block-diagonal packed projections
    btxt_ref = next(it)    # (1, 4*td)    f32
    adjn_ref = next(it)    # (N, N)       bf16 sym-normalized adjacency (+ self loops)

    layers = []
    for i in range(num_layers):
        if i == 0:
            gcn_w = (next(it), next(it))   # (128, hd0), (4*td, hd0)  bf16
        else:
            gcn_w = next(it)               # (hd_{i-1}, hd_i)         bf16
        gat_w = next(it)                   # (hd_i, hd_i)             bf16
        asrc_ref = next(it)                # (heads, hd_i)  bf16 block-diag rows
        adst_ref = next(it)                # (hd_i, heads)  bf16 block-diag cols
        bias_ref = next(it)                # (4, hd_i) f32 [gcn_b; gat_b; ln_g; ln_b]
        layers.append((gcn_w, gat_w, asrc_ref, adst_ref, bias_ref))

    dom_ref = next(it)      # (N, hd_last)   f32 gathered domain embeddings
    domw_ref = next(it)     # (hd_last, hd_last) bf16
    domb_ref = next(it)     # (1, hd_last)   f32
    skills_ref = next(it)   # (B, 2*skill_dim) bf16
    cw1_ref = next(it)      # bf16
    cb1_ref = next(it)      # f32
    cw2_ref = next(it)      # bf16
    cb2_ref = next(it)      # f32
    srctxt_ref = next(it)   # (E, 4*td) bf16 gathered raw text of edge sources
    dsttxt_ref = next(it)   # (E, 4*td) bf16 gathered raw text of edge targets

    domout_ref = next(it)   # (N, hd_last)  f32
    compat_ref = next(it)   # (B, 1)        f32
    sims_ref = next(it)     # (E, 128)      f32 lane-dense packed cosine sims

    f32 = jnp.float32
    bf16 = jnp.bfloat16

    adj_n = adjn_ref[...]                       # (N, N) bf16
    # adj_norm > 0 exactly where an edge (or self loop) exists.
    neigh_mask = adj_n > 0                      # (N, N) bool

    # ---- text projections: single block-diagonal 128-wide MXU matmul -------
    txt_proj = (jnp.dot(txt_ref[...], wtxt_ref[...], preferred_element_type=f32)
                + btxt_ref[...])                # (N, 4*td) f32

    # ---- MultiScaleGNN: GCN -> GAT -> LayerNorm -> ReLU per layer ----------
    h = None
    for i, (gcn_w, gat_w, asrc_ref, adst_ref, bias_ref) in enumerate(layers):
        # GCNConv: adj_norm @ (h @ W) + b   (layer 0 input split raw-x / text)
        if i == 0:
            xw = (jnp.dot(x_ref[...], gcn_w[0][...], preferred_element_type=f32)
                  + jnp.dot(txt_proj.astype(bf16), gcn_w[1][...],
                            preferred_element_type=f32))
        else:
            xw = jnp.dot(h.astype(bf16), gcn_w[...], preferred_element_type=f32)
        x_gcn = (jnp.dot(adj_n, xw.astype(bf16), preferred_element_type=f32)
                 + bias_ref[0:1, :])            # (N, hd) f32

        # GATConv (concat=True): all-head logits via two MXU matmuls.
        hd = x_gcn.shape[1]
        head_dim = hd // num_heads
        hf = jnp.dot(x_gcn.astype(bf16), gat_w[...],
                     preferred_element_type=f32).astype(bf16)     # (N, hd)
        alpha_dst = jnp.dot(hf, adst_ref[...],
                            preferred_element_type=f32)           # (N, heads)
        alpha_src_t = jnp.einsum('hd,nd->hn', asrc_ref[...], hf,
                                 preferred_element_type=f32)      # (heads, N)
        head_outs = []
        for hh in range(num_heads):
            e = alpha_dst[:, hh:hh + 1] + alpha_src_t[hh:hh + 1, :]   # (N, N)
            e = jnp.where(e > 0, e, 0.2 * e)                          # LeakyReLU(0.2)
            e = jnp.where(neigh_mask, e, jnp.float32(-1e30))
            e = e - jnp.max(e, axis=-1, keepdims=True)
            p = jnp.exp(e)               # masked entries underflow to exactly 0
            inv = pl.reciprocal(jnp.sum(p, axis=-1, keepdims=True), approx=False)
            head_outs.append(
                jnp.dot((p * inv).astype(bf16),
                        hf[:, hh * head_dim:(hh + 1) * head_dim],
                        preferred_element_type=f32))
        x_att = jnp.concatenate(head_outs, axis=-1) + bias_ref[1:2, :]

        # LayerNorm(x_att + x_gcn) -> ReLU  (dropout = identity at inference)
        y = x_att + x_gcn
        mu = jnp.mean(y, axis=-1, keepdims=True)
        yc = y - mu
        var = jnp.mean(yc * yc, axis=-1, keepdims=True)
        yn = yc * jax.lax.rsqrt(var + 1e-5)
        h = jnp.maximum(yn * bias_ref[2:3, :] + bias_ref[3:4, :], 0.0)

    node_embeddings = h                                             # (N, hd_last)

    # ---- ProfessionalDomainEmbedding ----------------------------------------
    domout_ref[...] = (jnp.dot(node_embeddings.astype(bf16), domw_ref[...],
                               preferred_element_type=f32)
                       + domb_ref[...] + dom_ref[...])

    # ---- SkillCompatibilityScoring ------------------------------------------
    hsk = jnp.maximum(
        jnp.dot(skills_ref[...], cw1_ref[...], preferred_element_type=f32)
        + cb1_ref[...], 0.0)
    z = (jnp.dot(hsk.astype(bf16), cw2_ref[...], preferred_element_type=f32)
         + cb2_ref[...])
    compat_ref[...] = jax.nn.sigmoid(z)

    # ---- edge cosine similarities: project gathered edge rows, pack lanes ---
    td = txt_ref.shape[1] // 4
    src_feat = (jnp.dot(srctxt_ref[...], wtxt_ref[...], preferred_element_type=f32)
                + btxt_ref[...])
    dst_feat = (jnp.dot(dsttxt_ref[...], wtxt_ref[...], preferred_element_type=f32)
                + btxt_ref[...])

    def _cos(a, b):
        dot = jnp.sum(a * b, axis=-1, keepdims=True)
        na = jnp.sqrt(jnp.sum(a * a, axis=-1, keepdims=True))
        nb = jnp.sqrt(jnp.sum(b * b, axis=-1, keepdims=True))
        denom = jnp.maximum(na, 1e-8) * jnp.maximum(nb, 1e-8)
        return dot * pl.reciprocal(denom, approx=False)             # (E, 1)

    bs = [src_feat[:, k * td:(k + 1) * td] for k in range(4)]
    bd = [dst_feat[:, k * td:(k + 1) * td] for k in range(4)]
    sims4 = jnp.concatenate(
        [_cos(bs[0], bd[0]),      # bio            vs bio
         _cos(bs[1], bd[2]),      # expertise(src) vs needs(dst)
         _cos(bs[2], bd[1]),      # needs(src)     vs expertise(dst)
         _cos(bs[3], bd[3])],     # goals          vs goals
        axis=-1)                                                    # (E, 4)
    n_edges = sims4.shape[0]
    pad_w = sims_ref.shape[1] - sims4.shape[1]
    sims_ref[...] = jnp.concatenate(
        [sims4, jnp.zeros((n_edges, pad_w), f32)], axis=-1)         # lane-dense store


# ----------------------------------------------------------------------------
# parameters (deterministic synthetic init, same structure as before)
# ----------------------------------------------------------------------------
def init_params(key, cfg):
    text_dim = cfg["text_dim"]
    hidden = cfg["hidden_dims"]
    heads = cfg["num_heads"]
    combined_dim = cfg["input_dim"] + 4 * text_dim
    ks = iter(jax.random.split(key, 64))

    def w(shape, scale=0.1):
        return (scale * jax.random.normal(next(ks), shape)).astype(jnp.float32)

    p = {}
    for name in ("bio", "exp", "needs", "goals"):
        p[f"{name}_w"] = w((text_dim, text_dim))
        p[f"{name}_b"] = w((text_dim,))

    in_dim = combined_dim
    for i, hd in enumerate(hidden):
        c = hd // heads
        p[f"gcn{i}_w"] = w((in_dim, hd))
        p[f"gcn{i}_b"] = w((hd,))
        p[f"gat{i}_w"] = w((hd, heads * c))
        p[f"gat{i}_asrc"] = w((heads, c))
        p[f"gat{i}_adst"] = w((heads, c))
        p[f"gat{i}_b"] = w((heads * c,))
        p[f"ln{i}_g"] = jnp.ones((hd,), jnp.float32)
        p[f"ln{i}_b"] = jnp.zeros((hd,), jnp.float32)
        in_dim = hd

    hl = hidden[-1]
    p["domain_emb"] = w((cfg["num_domains"], hl))
    p["dom_w"] = w((hl, hl))
    p["dom_b"] = w((hl,))
    p["skill_emb"] = w((cfg["num_skills"], cfg["skill_dim"]))
    p["comp_w1"] = w((2 * cfg["skill_dim"], hl))
    p["comp_b1"] = w((hl,))
    p["comp_w2"] = w((hl, 1))
    p["comp_b2"] = w((1,))
    return p


# ----------------------------------------------------------------------------
# full forward pass: prep (scatter/gather, weight packing) in XLA,
# everything dense in ONE fused Pallas kernel.
# ----------------------------------------------------------------------------
def networkli_gnn_forward(params, cfg, x, edge_index, domain_ids, skill_ids_1,
                          skill_ids_2, bio_emb, expertise_emb, needs_emb,
                          goals_emb):
    f32 = jnp.float32
    bf16 = jnp.bfloat16
    bf = lambda a: a.astype(bf16)          # matmul operands only; accum stays f32
    num_nodes = x.shape[0]
    hidden = cfg["hidden_dims"]
    num_heads = cfg["num_heads"]
    num_layers = len(hidden)
    input_dim = x.shape[1]
    td = cfg["text_dim"]
    pad_to = 128
    lane_pad = 128                          # lane-dense width for the sims output

    # --- graph prep: dense adjacency with self-loops; adj[i, j]=1 iff j -> i
    src = edge_index[0]
    dst = edge_index[1]
    adj = jnp.zeros((num_nodes, num_nodes), f32).at[dst, src].set(1.0)
    adj = adj.at[jnp.arange(num_nodes), jnp.arange(num_nodes)].set(1.0)
    deg = jnp.sum(adj, axis=1)
    dinv = jnp.where(deg > 0, 1.0 / jnp.sqrt(deg), 0.0)
    adj_norm = adj * dinv[:, None] * dinv[None, :]

    # --- text features: packed node text + per-edge row gathers (no one-hots)
    txt = jnp.concatenate([bio_emb, expertise_emb, needs_emb, goals_emb], axis=1)
    src_txt = txt[src]                      # (E, 4*td)
    dst_txt = txt[dst]                      # (E, 4*td)

    # --- parameter packing (pure layout transforms; semantics unchanged) ----
    w_txt = jnp.zeros((4 * td, 4 * td), f32)
    for k, name in enumerate(("bio_w", "exp_w", "needs_w", "goals_w")):
        w_txt = w_txt.at[k * td:(k + 1) * td, k * td:(k + 1) * td].set(params[name])
    b_txt = jnp.concatenate([params["bio_b"], params["exp_b"],
                             params["needs_b"], params["goals_b"]]).reshape(1, -1)

    x_pad = jnp.zeros((num_nodes, pad_to), f32).at[:, :input_dim].set(x)
    gcn0_w = params["gcn0_w"]                      # (input_dim + 4*td, hd0)
    w0x = jnp.zeros((pad_to, hidden[0]), f32).at[:input_dim, :].set(
        gcn0_w[:input_dim])
    w0t = gcn0_w[input_dim:]

    layer_args = []
    for i in range(num_layers):
        hd = hidden[i]
        head_dim = hd // num_heads
        a_src = params[f"gat{i}_asrc"]             # (heads, head_dim)
        a_dst = params[f"gat{i}_adst"]
        a_src_rows = jnp.zeros((num_heads, hd), f32)   # block-diag rows
        a_dst_cols = jnp.zeros((hd, num_heads), f32)   # block-diag cols
        for hh in range(num_heads):
            sl = slice(hh * head_dim, (hh + 1) * head_dim)
            a_src_rows = a_src_rows.at[hh, sl].set(a_src[hh])
            a_dst_cols = a_dst_cols.at[sl, hh].set(a_dst[hh])
        bias_stack = jnp.stack([params[f"gcn{i}_b"], params[f"gat{i}_b"],
                                params[f"ln{i}_g"], params[f"ln{i}_b"]])
        if i == 0:
            layer_args += [bf(w0x), bf(w0t)]
        else:
            layer_args += [bf(params[f"gcn{i}_w"])]
        layer_args += [bf(params[f"gat{i}_w"]), bf(a_src_rows), bf(a_dst_cols),
                       bias_stack]

    dom = params["domain_emb"][domain_ids]
    skills = jnp.concatenate(
        [jnp.mean(params["skill_emb"][skill_ids_1], axis=1),
         jnp.mean(params["skill_emb"][skill_ids_2], axis=1)], axis=1)

    inputs = [bf(x_pad), bf(txt), bf(w_txt), b_txt, bf(adj_norm)] + layer_args + [
        dom, bf(params["dom_w"]), params["dom_b"].reshape(1, -1),
        bf(skills), bf(params["comp_w1"]), params["comp_b1"].reshape(1, -1),
        bf(params["comp_w2"]), params["comp_b2"].reshape(1, -1),
        bf(src_txt), bf(dst_txt)]

    num_edges = src.shape[0]
    batch = skills.shape[0]
    hd_last = hidden[-1]
    out_shapes = (jax.ShapeDtypeStruct((num_nodes, hd_last), f32),
                  jax.ShapeDtypeStruct((batch, 1), f32),
                  jax.ShapeDtypeStruct((num_edges, lane_pad), f32))

    kern = functools.partial(_fused_forward_kernel,
                             num_layers=num_layers, num_heads=num_heads)

    # TODO(synk): at realistic graph sizes, tile node rows with a "parallel"
    # grid axis (uses v7x's 2nd TensorCore), tile the (N, N) adjacency and edge
    # arrays with BlockSpec instead of keeping them fully VMEM-resident (v7x has
    # only 64 MiB VMEM), and size weight/output tiles to 256 lanes for the
    # v6e/v7x MXU.  At N=16 the whole problem fits one VMEM-resident grid step.
    dom_out, compat, sims_pad = pl.pallas_call(
        kern,
        out_shape=out_shapes,
        grid=(1,),
        in_specs=[_full_spec(a.shape) for a in inputs],
        out_specs=tuple(_full_spec(s.shape) for s in out_shapes),
        compiler_params=pltpu.CompilerParams(
            dimension_semantics=("arbitrary",)),
    )(*inputs)

    sims = sims_pad[:, :4]
    similarity_scores = {
        "bio_similarity": sims[:, 0],
        "expertise_needs_match": sims[:, 1],
        "needs_expertise_match": sims[:, 2],
        "goals_alignment": sims[:, 3],
    }
    # TODO(synk): self.profile_attention (nn.MultiheadAttention) is unused in
    # the reference forward pass, so it is not implemented here.
    return dom_out, compat, similarity_scores


# ----------------------------------------------------------------------------
if __name__ == "__main__":
    cfg = dict(input_dim=8, hidden_dims=[32, 32], skill_dim=16, num_skills=10,
               num_domains=5, text_dim=32, num_heads=4)
    N, B = 16, 4

    key = jax.random.PRNGKey(0)
    keys = jax.random.split(key, 12)
    params = init_params(keys[0], cfg)

    x = jax.random.normal(keys[1], (N, cfg["input_dim"]), jnp.float32)
    # deterministic bidirectional ring graph (no duplicate edges, no self-loops)
    idx = jnp.arange(N)
    fwd_e = jnp.stack([idx, (idx + 1) % N])
    bwd_e = jnp.stack([(idx + 1) % N, idx])
    edge_index = jnp.concatenate([fwd_e, bwd_e], axis=1).astype(jnp.int32)  # [2, 32]

    domain_ids = jax.random.randint(keys[2], (N,), 0, cfg["num_domains"])
    skill_ids_1 = jax.random.randint(keys[3], (B, 3), 0, cfg["num_skills"])
    skill_ids_2 = jax.random.randint(keys[4], (B, 3), 0, cfg["num_skills"])
    bio = jax.random.normal(keys[5], (N, cfg["text_dim"]), jnp.float32)
    expertise = jax.random.normal(keys[6], (N, cfg["text_dim"]), jnp.float32)
    needs = jax.random.normal(keys[7], (N, cfg["text_dim"]), jnp.float32)
    goals = jax.random.normal(keys[8], (N, cfg["text_dim"]), jnp.float32)

    @jax.jit
    def forward(params, x, edge_index, domain_ids, skill_ids_1, skill_ids_2,
                bio, expertise, needs, goals):
        return networkli_gnn_forward(params, cfg, x, edge_index, domain_ids,
                                     skill_ids_1, skill_ids_2, bio, expertise,
                                     needs, goals)

    dom_emb, compat, sims = forward(params, x, edge_index, domain_ids,
                                    skill_ids_1, skill_ids_2, bio, expertise,
                                    needs, goals)
    jax.block_until_ready((dom_emb, compat, sims))

    assert dom_emb.shape == (N, cfg["hidden_dims"][-1])
    assert compat.shape == (B, 1)
    assert sims["bio_similarity"].shape == (edge_index.shape[1],)
    print("KERNEL_OK")
</pallas_src>

<mosaic_0001>
module attributes {stable_mosaic.version = 11 : i64} {
  func.func @_fused_forward_kernel(%arg0: i32, %arg1: memref<16x128xbf16, #tpu.memory_space<vmem>>, %arg2: memref<16x128xbf16, #tpu.memory_space<vmem>>, %arg3: memref<128x128xbf16, #tpu.memory_space<vmem>>, %arg4: memref<1x128xf32, #tpu.memory_space<vmem>>, %arg5: memref<16x16xbf16, #tpu.memory_space<vmem>>, %arg6: memref<128x32xbf16, #tpu.memory_space<vmem>>, %arg7: memref<128x32xbf16, #tpu.memory_space<vmem>>, %arg8: memref<32x32xbf16, #tpu.memory_space<vmem>>, %arg9: memref<4x32xbf16, #tpu.memory_space<vmem>>, %arg10: memref<32x4xbf16, #tpu.memory_space<vmem>>, %arg11: memref<4x32xf32, #tpu.memory_space<vmem>>, %arg12: memref<32x32xbf16, #tpu.memory_space<vmem>>, %arg13: memref<32x32xbf16, #tpu.memory_space<vmem>>, %arg14: memref<4x32xbf16, #tpu.memory_space<vmem>>, %arg15: memref<32x4xbf16, #tpu.memory_space<vmem>>, %arg16: memref<4x32xf32, #tpu.memory_space<vmem>>, %arg17: memref<16x32xf32, #tpu.memory_space<vmem>>, %arg18: memref<32x32xbf16, #tpu.memory_space<vmem>>, %arg19: memref<1x32xf32, #tpu.memory_space<vmem>>, %arg20: memref<4x32xbf16, #tpu.memory_space<vmem>>, %arg21: memref<32x32xbf16, #tpu.memory_space<vmem>>, %arg22: memref<1x32xf32, #tpu.memory_space<vmem>>, %arg23: memref<32x1xbf16, #tpu.memory_space<vmem>>, %arg24: memref<1x1xf32, #tpu.memory_space<vmem>>, %arg25: memref<32x128xbf16, #tpu.memory_space<vmem>>, %arg26: memref<32x128xbf16, #tpu.memory_space<vmem>>, %arg27: memref<16x32xf32, #tpu.memory_space<vmem>>, %arg28: memref<4x1xf32, #tpu.memory_space<vmem>>, %arg29: memref<32x128xf32, #tpu.memory_space<vmem>>) attributes {dimension_semantics = [#tpu.dimension_semantics<arbitrary>], iteration_bounds = array<i64: 1>, scalar_prefetch = 0 : i64, scratch_operands = 0 : i64, tpu.core_type = #tpu.core_type<tc>, window_params = [{pipeline_mode = #tpu.pipeline_mode<synchronous>, transform_indices = @transform_0, window_bounds = array<i64: 16, 128>}, {pipeline_mode = #tpu.pipeline_mode<synchronous>, transform_indices = @transform_1, window_bounds = array<i64: 16, 128>}, {pipeline_mode = #tpu.pipeline_mode<synchronous>, transform_indices = @transform_2, window_bounds = array<i64: 128, 128>}, {pipeline_mode = #tpu.pipeline_mode<synchronous>, transform_indices = @transform_3, window_bounds = array<i64: 1, 128>}, {pipeline_mode = #tpu.pipeline_mode<synchronous>, transform_indices = @transform_4, window_bounds = array<i64: 16, 16>}, {pipeline_mode = #tpu.pipeline_mode<synchronous>, transform_indices = @transform_5, window_bounds = array<i64: 128, 32>}, {pipeline_mode = #tpu.pipeline_mode<synchronous>, transform_indices = @transform_6, window_bounds = array<i64: 128, 32>}, {pipeline_mode = #tpu.pipeline_mode<synchronous>, transform_indices = @transform_7, window_bounds = array<i64: 32, 32>}, {pipeline_mode = #tpu.pipeline_mode<synchronous>, transform_indices = @transform_8, window_bounds = array<i64: 4, 32>}, {pipeline_mode = #tpu.pipeline_mode<synchronous>, transform_indices = @transform_9, window_bounds = array<i64: 32, 4>}, {pipeline_mode = #tpu.pipeline_mode<synchronous>, transform_indices = @transform_10, window_bounds = array<i64: 4, 32>}, {pipeline_mode = #tpu.pipeline_mode<synchronous>, transform_indices = @transform_11, window_bounds = array<i64: 32, 32>}, {pipeline_mode = #tpu.pipeline_mode<synchronous>, transform_indices = @transform_12, window_bounds = array<i64: 32, 32>}, {pipeline_mode = #tpu.pipeline_mode<synchronous>, transform_indices = @transform_13, window_bounds = array<i64: 4, 32>}, {pipeline_mode = #tpu.pipeline_mode<synchronous>, transform_indices = @transform_14, window_bounds = array<i64: 32, 4>}, {pipeline_mode = #tpu.pipeline_mode<synchronous>, transform_indices = @transform_15, window_bounds = array<i64: 4, 32>}, {pipeline_mode = #tpu.pipeline_mode<synchronous>, transform_indices = @transform_16, window_bounds = array<i64: 16, 32>}, {pipeline_mode = #tpu.pipeline_mode<synchronous>, transform_indices = @transform_17, window_bounds = array<i64: 32, 32>}, {pipeline_mode = #tpu.pipeline_mode<synchronous>, transform_indices = @transform_18, window_bounds = array<i64: 1, 32>}, {pipeline_mode = #tpu.pipeline_mode<synchronous>, transform_indices = @transform_19, window_bounds = array<i64: 4, 32>}, {pipeline_mode = #tpu.pipeline_mode<synchronous>, transform_indices = @transform_20, window_bounds = array<i64: 32, 32>}, {pipeline_mode = #tpu.pipeline_mode<synchronous>, transform_indices = @transform_21, window_bounds = array<i64: 1, 32>}, {pipeline_mode = #tpu.pipeline_mode<synchronous>, transform_indices = @transform_22, window_bounds = array<i64: 32, 1>}, {pipeline_mode = #tpu.pipeline_mode<synchronous>, transform_indices = @transform_23, window_bounds = array<i64: 1, 1>}, {pipeline_mode = #tpu.pipeline_mode<synchronous>, transform_indices = @transform_24, window_bounds = array<i64: 32, 128>}, {pipeline_mode = #tpu.pipeline_mode<synchronous>, transform_indices = @transform_25, window_bounds = array<i64: 32, 128>}, {pipeline_mode = #tpu.pipeline_mode<synchronous>, transform_indices = @transform_26, window_bounds = array<i64: 16, 32>}, {pipeline_mode = #tpu.pipeline_mode<synchronous>, transform_indices = @transform_27, window_bounds = array<i64: 4, 1>}, {pipeline_mode = #tpu.pipeline_mode<synchronous>, transform_indices = @transform_28, window_bounds = array<i64: 32, 128>}]} {
    %c0 = arith.constant 0 : index
    %c0_0 = arith.constant 0 : index
    %0 = vector.load %arg5[%c0, %c0_0] : memref<16x16xbf16, #tpu.memory_space<vmem>>, vector<16x16xbf16>
    %cst = arith.constant 0.000000e+00 : bf16
    %1 = vector.broadcast %cst : bf16 to vector<16x16xbf16>
    %2 = arith.cmpf ogt, %0, %1 : vector<16x16xbf16>
    %c0_1 = arith.constant 0 : index
    %c0_2 = arith.constant 0 : index
    %3 = vector.load %arg2[%c0_1, %c0_2] : memref<16x128xbf16, #tpu.memory_space<vmem>>, vector<16x128xbf16>
    %c0_3 = arith.constant 0 : index
    %c0_4 = arith.constant 0 : index
    %4 = vector.load %arg3[%c0_3, %c0_4] : memref<128x128xbf16, #tpu.memory_space<vmem>>, vector<128x128xbf16>
    %cst_5 = arith.constant dense<0.000000e+00> : vector<16x128xf32>
    %5 = tpu.matmul %3, %4, %cst_5 {dimension_numbers = #tpu.dot_dimension_numbers<[1], [0], [0], [1], [0, 0, 1, 1], [], []>} : vector<16x128xbf16>, vector<128x128xbf16>, vector<16x128xf32> -> vector<16x128xf32>
    %c0_6 = arith.constant 0 : index
    %c0_7 = arith.constant 0 : index
    %6 = vector.load %arg4[%c0_6, %c0_7] : memref<1x128xf32, #tpu.memory_space<vmem>>, vector<1x128xf32>
    %7 = vector.broadcast %6 : vector<1x128xf32> to vector<16x128xf32>
    %8 = arith.addf %5, %7 : vector<16x128xf32>
    %c0_8 = arith.constant 0 : index
    %c0_9 = arith.constant 0 : index
    %9 = vector.load %arg1[%c0_8, %c0_9] : memref<16x128xbf16, #tpu.memory_space<vmem>>, vector<16x128xbf16>
    %c0_10 = arith.constant 0 : index
    %c0_11 = arith.constant 0 : index
    %10 = vector.load %arg6[%c0_10, %c0_11] : memref<128x32xbf16, #tpu.memory_space<vmem>>, vector<128x32xbf16>
    %cst_12 = arith.constant dense<0.000000e+00> : vector<16x32xf32>
    %11 = tpu.matmul %9, %10, %cst_12 {dimension_numbers = #tpu.dot_dimension_numbers<[1], [0], [0], [1], [0, 0, 1, 1], [], []>} : vector<16x128xbf16>, vector<128x32xbf16>, vector<16x32xf32> -> vector<16x32xf32>
    %12 = arith.truncf %8 : vector<16x128xf32> to vector<16x128xbf16>
    %c0_13 = arith.constant 0 : index
    %c0_14 = arith.constant 0 : index
    %13 = vector.load %arg7[%c0_13, %c0_14] : memref<128x32xbf16, #tpu.memory_space<vmem>>, vector<128x32xbf16>
    %cst_15 = arith.constant dense<0.000000e+00> : vector<16x32xf32>
    %14 = tpu.matmul %12, %13, %cst_15 {dimension_numbers = #tpu.dot_dimension_numbers<[1], [0], [0], [1], [0, 0, 1, 1], [], []>} : vector<16x128xbf16>, vector<128x32xbf16>, vector<16x32xf32> -> vector<16x32xf32>
    %15 = arith.addf %11, %14 : vector<16x32xf32>
    %16 = arith.truncf %15 : vector<16x32xf32> to vector<16x32xbf16>
    %cst_16 = arith.constant dense<0.000000e+00> : vector<16x32xf32>
    %17 = tpu.matmul %0, %16, %cst_16 {dimension_numbers = #tpu.dot_dimension_numbers<[1], [0], [0], [1], [0, 0, 1, 1], [], []>} : vector<16x16xbf16>, vector<16x32xbf16>, vector<16x32xf32> -> vector<16x32xf32>
    %c0_17 = arith.constant 0 : index
    %c0_18 = arith.constant 0 : index
    %18 = vector.load %arg11[%c0_17, %c0_18] : memref<4x32xf32, #tpu.memory_space<vmem>>, vector<1x32xf32>
    %19 = vector.broadcast %18 : vector<1x32xf32> to vector<16x32xf32>
    %20 = arith.addf %17, %19 : vector<16x32xf32>
    %21 = arith.truncf %20 : vector<16x32xf32> to vector<16x32xbf16>
    %c0_19 = arith.constant 0 : index
    %c0_20 = arith.constant 0 : index
    %22 = vector.load %arg8[%c0_19, %c0_20] : memref<32x32xbf16, #tpu.memory_space<vmem>>, vector<32x32xbf16>
    %cst_21 = arith.constant dense<0.000000e+00> : vector<16x32xf32>
    %23 = tpu.matmul %21, %22, %cst_21 {dimension_numbers = #tpu.dot_dimension_numbers<[1], [0], [0], [1], [0, 0, 1, 1], [], []>} : vector<16x32xbf16>, vector<32x32xbf16>, vector<16x32xf32> -> vector<16x32xf32>
    %24 = arith.truncf %23 : vector<16x32xf32> to vector<16x32xbf16>
    %c0_22 = arith.constant 0 : index
    %c0_23 = arith.constant 0 : index
    %25 = vector.load %arg10[%c0_22, %c0_23] : memref<32x4xbf16, #tpu.memory_space<vmem>>, vector<32x4xbf16>
    %cst_24 = arith.constant dense<0.000000e+00> : vector<16x4xf32>
    %26 = tpu.matmul %24, %25, %cst_24 {dimension_numbers = #tpu.dot_dimension_numbers<[1], [0], [0], [1], [0, 0, 1, 1], [], []>} : vector<16x32xbf16>, vector<32x4xbf16>, vector<16x4xf32> -> vector<16x4xf32>
    %c0_25 = arith.constant 0 : index
    %c0_26 = arith.constant 0 : index
    %27 = vector.load %arg9[%c0_25, %c0_26] : memref<4x32xbf16, #tpu.memory_space<vmem>>, vector<4x32xbf16>
    "tpu.trace_start"() <{level = 10 : i32, message = "hd,nd->hn"}> : () -> ()
    %cst_27 = arith.constant dense<0.000000e+00> : vector<4x16xf32>
    %28 = tpu.matmul %27, %24, %cst_27 {dimension_numbers = #tpu.dot_dimension_numbers<[1], [1], [0], [0], [0, 0, 1, 0], [], []>} : vector<4x32xbf16>, vector<16x32xbf16>, vector<4x16xf32> -> vector<4x16xf32>
    "tpu.trace_stop"() : () -> ()
    %29 = vector.extract_strided_slice %26 {offsets = [0, 0], sizes = [16, 1], strides = [1, 1]} : vector<16x4xf32> to vector<16x1xf32>
    %30 = vector.extract_strided_slice %28 {offsets = [0, 0], sizes = [1, 16], strides = [1, 1]} : vector<4x16xf32> to vector<1x16xf32>
    %31 = vector.broadcast %29 : vector<16x1xf32> to vector<16x16xf32>
    %32 = vector.broadcast %30 : vector<1x16xf32> to vector<16x16xf32>
    %33 = arith.addf %31, %32 : vector<16x16xf32>
    %cst_28 = arith.constant 0.000000e+00 : f32
    %34 = vector.broadcast %cst_28 : f32 to vector<16x16xf32>
    %35 = arith.cmpf ogt, %33, %34 : vector<16x16xf32>
    %cst_29 = arith.constant 2.000000e-01 : f32
    %36 = vector.broadcast %cst_29 : f32 to vector<16x16xf32>
    %37 = arith.mulf %36, %33 : vector<16x16xf32>
    %38 = arith.select %35, %33, %37 : vector<16x16xi1>, vector<16x16xf32>
    %cst_30 = arith.constant -1.000000e+30 : f32
    %39 = vector.broadcast %cst_30 : f32 to vector<16x16xf32>
    %40 = arith.select %2, %38, %39 : vector<16x16xi1>, vector<16x16xf32>
    %cst_31 = arith.constant dense<0xFF800000> : vector<16xf32>
    %41 = vector.multi_reduction <maximumf>, %40, %cst_31 [1] : vector<16x16xf32> to vector<16xf32>
    %42 = vector.shape_cast %41 : vector<16xf32> to vector<16x1xf32>
    %43 = vector.broadcast %42 : vector<16x1xf32> to vector<16x16xf32>
    %44 = arith.subf %40, %43 : vector<16x16xf32>
    %45 = math.exp %44 : vector<16x16xf32>
    %cst_32 = arith.constant dense<0.000000e+00> : vector<16xf32>
    %46 = vector.multi_reduction <add>, %45, %cst_32 [1] : vector<16x16xf32> to vector<16xf32>
    %47 = vector.shape_cast %46 : vector<16xf32> to vector<16x1xf32>
    %48 = tpu.reciprocal %47 : vector<16x1xf32> -> vector<16x1xf32>
    %49 = vector.broadcast %48 : vector<16x1xf32> to vector<16x16xf32>
    %50 = arith.mulf %45, %49 : vector<16x16xf32>
    %51 = arith.truncf %50 : vector<16x16xf32> to vector<16x16xbf16>
    %52 = vector.extract_strided_slice %24 {offsets = [0, 0], sizes = [16, 8], strides = [1, 1]} : vector<16x32xbf16> to vector<16x8xbf16>
    %cst_33 = arith.constant dense<0.000000e+00> : vector<16x8xf32>
    %53 = tpu.matmul %51, %52, %cst_33 {dimension_numbers = #tpu.dot_dimension_numbers<[1], [0], [0], [1], [0, 0, 1, 1], [], []>} : vector<16x16xbf16>, vector<16x8xbf16>, vector<16x8xf32> -> vector<16x8xf32>
    %54 = vector.extract_strided_slice %26 {offsets = [0, 1], sizes = [16, 1], strides = [1, 1]} : vector<16x4xf32> to vector<16x1xf32>
    %55 = vector.extract_strided_slice %28 {offsets = [1, 0], sizes = [1, 16], strides = [1, 1]} : vector<4x16xf32> to vector<1x16xf32>
    %56 = vector.broadcast %54 : vector<16x1xf32> to vector<16x16xf32>
    %57 = vector.broadcast %55 : vector<1x16xf32> to vector<16x16xf32>
    %58 = arith.addf %56, %57 : vector<16x16xf32>
    %cst_34 = arith.constant 0.000000e+00 : f32
    %59 = vector.broadcast %cst_34 : f32 to vector<16x16xf32>
    %60 = arith.cmpf ogt, %58, %59 : vector<16x16xf32>
    %cst_35 = arith.constant 2.000000e-01 : f32
    %61 = vector.broadcast %cst_35 : f32 to vector<16x16xf32>
    %62 = arith.mulf %61, %58 : vector<16x16xf32>
    %63 = arith.select %60, %58, %62 : vector<16x16xi1>, vector<16x16xf32>
    %cst_36 = arith.constant -1.000000e+30 : f32
    %64 = vector.broadcast %cst_36 : f32 to vector<16x16xf32>
    %65 = arith.select %2, %63, %64 : vector<16x16xi1>, vector<16x16xf32>
    %cst_37 = arith.constant dense<0xFF800000> : vector<16xf32>
    %66 = vector.multi_reduction <maximumf>, %65, %cst_37 [1] : vector<16x16xf32> to vector<16xf32>
    %67 = vector.shape_cast %66 : vector<16xf32> to vector<16x1xf32>
    %68 = vector.broadcast %67 : vector<16x1xf32> to vector<16x16xf32>
    %69 = arith.subf %65, %68 : vector<16x16xf32>
    %70 = math.exp %69 : vector<16x16xf32>
    %cst_38 = arith.constant dense<0.000000e+00> : vector<16xf32>
    %71 = vector.multi_reduction <add>, %70, %cst_38 [1] : vector<16x16xf32> to vector<16xf32>
    %72 = vector.shape_cast %71 : vector<16xf32> to vector<16x1xf32>
    %73 = tpu.reciprocal %72 : vector<16x1xf32> -> vector<16x1xf32>
    %74 = vector.broadcast %73 : vector<16x1xf32> to vector<16x16xf32>
    %75 = arith.mulf %70, %74 : vector<16x16xf32>
    %76 = arith.truncf %75 : vector<16x16xf32> to vector<16x16xbf16>
    %77 = vector.extract_strided_slice %24 {offsets = [0, 8], sizes = [16, 8], strides = [1, 1]} : vector<16x32xbf16> to vector<16x8xbf16>
    %cst_39 = arith.constant dense<0.000000e+00> : vector<16x8xf32>
    %78 = tpu.matmul %76, %77, %cst_39 {dimension_numbers = #tpu.dot_dimension_numbers<[1], [0], [0], [1], [0, 0, 1, 1], [], []>} : vector<16x16xbf16>, vector<16x8xbf16>, vector<16x8xf32> -> vector<16x8xf32>
    %79 = vector.extract_strided_slice %26 {offsets = [0, 2], sizes = [16, 1], strides = [1, 1]} : vector<16x4xf32> to vector<16x1xf32>
    %80 = vector.extract_strided_slice %28 {offsets = [2, 0], sizes = [1, 16], strides = [1, 1]} : vector<4x16xf32> to vector<1x16xf32>
    %81 = vector.broadcast %79 : vector<16x1xf32> to vector<16x16xf32>
    %82 = vector.broadcast %80 : vector<1x16xf32> to vector<16x16xf32>
    %83 = arith.addf %81, %82 : vector<16x16xf32>
    %cst_40 = arith.constant 0.000000e+00 : f32
    %84 = vector.broadcast %cst_40 : f32 to vector<16x16xf32>
    %85 = arith.cmpf ogt, %83, %84 : vector<16x16xf32>
    %cst_41 = arith.constant 2.000000e-01 : f32
    %86 = vector.broadcast %cst_41 : f32 to vector<16x16xf32>
    %87 = arith.mulf %86, %83 : vector<16x16xf32>
    %88 = arith.select %85, %83, %87 : vector<16x16xi1>, vector<16x16xf32>
    %cst_42 = arith.constant -1.000000e+30 : f32
    %89 = vector.broadcast %cst_42 : f32 to vector<16x16xf32>
    %90 = arith.select %2, %88, %89 : vector<16x16xi1>, vector<16x16xf32>
    %cst_43 = arith.constant dense<0xFF800000> : vector<16xf32>
    %91 = vector.multi_reduction <maximumf>, %90, %cst_43 [1] : vector<16x16xf32> to vector<16xf32>
    %92 = vector.shape_cast %91 : vector<16xf32> to vector<16x1xf32>
    %93 = vector.broadcast %92 : vector<16x1xf32> to vector<16x16xf32>
    %94 = arith.subf %90, %93 : vector<16x16xf32>
    %95 = math.exp %94 : vector<16x16xf32>
    %cst_44 = arith.constant dense<0.000000e+00> : vector<16xf32>
    %96 = vector.multi_reduction <add>, %95, %cst_44 [1] : vector<16x16xf32> to vector<16xf32>
    %97 = vector.shape_cast %96 : vector<16xf32> to vector<16x1xf32>
    %98 = tpu.reciprocal %97 : vector<16x1xf32> -> vector<16x1xf32>
    %99 = vector.broadcast %98 : vector<16x1xf32> to vector<16x16xf32>
    %100 = arith.mulf %95, %99 : vector<16x16xf32>
    %101 = arith.truncf %100 : vector<16x16xf32> to vector<16x16xbf16>
    %102 = vector.extract_strided_slice %24 {offsets = [0, 16], sizes = [16, 8], strides = [1, 1]} : vector<16x32xbf16> to vector<16x8xbf16>
    %cst_45 = arith.constant dense<0.000000e+00> : vector<16x8xf32>
    %103 = tpu.matmul %101, %102, %cst_45 {dimension_numbers = #tpu.dot_dimension_numbers<[1], [0], [0], [1], [0, 0, 1, 1], [], []>} : vector<16x16xbf16>, vector<16x8xbf16>, vector<16x8xf32> -> vector<16x8xf32>
    %104 = vector.extract_strided_slice %26 {offsets = [0, 3], sizes = [16, 1], strides = [1, 1]} : vector<16x4xf32> to vector<16x1xf32>
    %105 = vector.extract_strided_slice %28 {offsets = [3, 0], sizes = [1, 16], strides = [1, 1]} : vector<4x16xf32> to vector<1x16xf32>
    %106 = vector.broadcast %104 : vector<16x1xf32> to vector<16x16xf32>
    %107 = vector.broadcast %105 : vector<1x16xf32> to vector<16x16xf32>
    %108 = arith.addf %106, %107 : vector<16x16xf32>
    %cst_46 = arith.constant 0.000000e+00 : f32
    %109 = vector.broadcast %cst_46 : f32 to vector<16x16xf32>
    %110 = arith.cmpf ogt, %108, %109 : vector<16x16xf32>
    %cst_47 = arith.constant 2.000000e-01 : f32
    %111 = vector.broadcast %cst_47 : f32 to vector<16x16xf32>
    %112 = arith.mulf %111, %108 : vector<16x16xf32>
    %113 = arith.select %110, %108, %112 : vector<16x16xi1>, vector<16x16xf32>
    %cst_48 = arith.constant -1.000000e+30 : f32
    %114 = vector.broadcast %cst_48 : f32 to vector<16x16xf32>
    %115 = arith.select %2, %113, %114 : vector<16x16xi1>, vector<16x16xf32>
    %cst_49 = arith.constant dense<0xFF800000> : vector<16xf32>
    %116 = vector.multi_reduction <maximumf>, %115, %cst_49 [1] : vector<16x16xf32> to vector<16xf32>
    %117 = vector.shape_cast %116 : vector<16xf32> to vector<16x1xf32>
    %118 = vector.broadcast %117 : vector<16x1xf32> to vector<16x16xf32>
    %119 = arith.subf %115, %118 : vector<16x16xf32>
    %120 = math.exp %119 : vector<16x16xf32>
    %cst_50 = arith.constant dense<0.000000e+00> : vector<16xf32>
    %121 = vector.multi_reduction <add>, %120, %cst_50 [1] : vector<16x16xf32> to vector<16xf32>
    %122 = vector.shape_cast %121 : vector<16xf32> to vector<16x1xf32>
    %123 = tpu.reciprocal %122 : vector<16x1xf32> -> vector<16x1xf32>
    %124 = vector.broadcast %123 : vector<16x1xf32> to vector<16x16xf32>
    %125 = arith.mulf %120, %124 : vector<16x16xf32>
    %126 = arith.truncf %125 : vector<16x16xf32> to vector<16x16xbf16>
    %127 = vector.extract_strided_slice %24 {offsets = [0, 24], sizes = [16, 8], strides = [1, 1]} : vector<16x32xbf16> to vector<16x8xbf16>
    %cst_51 = arith.constant dense<0.000000e+00> : vector<16x8xf32>
    %128 = tpu.matmul %126, %127, %cst_51 {dimension_numbers = #tpu.dot_dimension_numbers<[1], [0], [0], [1], [0, 0, 1, 1], [], []>} : vector<16x16xbf16>, vector<16x8xbf16>, vector<16x8xf32> -> vector<16x8xf32>
    %129 = tpu.concatenate %53, %78, %103, %128 in 1 : vector<16x8xf32>, vector<16x8xf32>, vector<16x8xf32>, vector<16x8xf32> -> vector<16x32xf32>
    %c1 = arith.constant 1 : index
    %c0_52 = arith.constant 0 : index
    %130 = vector.load %arg11[%c1, %c0_52] : memref<4x32xf32, #tpu.memory_space<vmem>>, vector<1x32xf32>
    %131 = vector.broadcast %130 : vector<1x32xf32> to vector<16x32xf32>
    %132 = arith.addf %129, %131 : vector<16x32xf32>
    %133 = arith.addf %132, %20 : vector<16x32xf32>
    %cst_53 = arith.constant dense<0.000000e+00> : vector<16xf32>
    %134 = vector.multi_reduction <add>, %133, %cst_53 [1] : vector<16x32xf32> to vector<16xf32>
    %135 = vector.shape_cast %134 : vector<16xf32> to vector<16x1xf32>
    %cst_54 = arith.constant 3.200000e+01 : f32
    %136 = vector.broadcast %cst_54 : f32 to vector<16x1xf32>
    %137 = arith.divf %135, %136 : vector<16x1xf32>
    %138 = vector.broadcast %137 : vector<16x1xf32> to vector<16x32xf32>
    %139 = arith.subf %133, %138 : vector<16x32xf32>
    %140 = arith.mulf %139, %139 : vector<16x32xf32>
    %cst_55 = arith.constant dense<0.000000e+00> : vector<16xf32>
    %141 = vector.multi_reduction <add>, %140, %cst_55 [1] : vector<16x32xf32> to vector<16xf32>
    %142 = vector.shape_cast %141 : vector<16xf32> to vector<16x1xf32>
    %cst_56 = arith.constant 3.200000e+01 : f32
    %143 = vector.broadcast %cst_56 : f32 to vector<16x1xf32>
    %144 = arith.divf %142, %143 : vector<16x1xf32>
    %cst_57 = arith.constant 9.99999974E-6 : f32
    %145 = vector.broadcast %cst_57 : f32 to vector<16x1xf32>
    %146 = arith.addf %144, %145 : vector<16x1xf32>
    %147 = math.rsqrt %146 : vector<16x1xf32>
    %148 = vector.broadcast %147 : vector<16x1xf32> to vector<16x32xf32>
    %149 = arith.mulf %139, %148 : vector<16x32xf32>
    %c2 = arith.constant 2 : index
    %c0_58 = arith.constant 0 : index
    %150 = vector.load %arg11[%c2, %c0_58] : memref<4x32xf32, #tpu.memory_space<vmem>>, vector<1x32xf32>
    %151 = vector.broadcast %150 : vector<1x32xf32> to vector<16x32xf32>
    %152 = arith.mulf %149, %151 : vector<16x32xf32>
    %c3 = arith.constant 3 : index
    %c0_59 = arith.constant 0 : index
    %153 = vector.load %arg11[%c3, %c0_59] : memref<4x32xf32, #tpu.memory_space<vmem>>, vector<1x32xf32>
    %154 = vector.broadcast %153 : vector<1x32xf32> to vector<16x32xf32>
    %155 = arith.addf %152, %154 : vector<16x32xf32>
    %cst_60 = arith.constant 0.000000e+00 : f32
    %156 = vector.broadcast %cst_60 : f32 to vector<16x32xf32>
    %157 = arith.maximumf %155, %156 : vector<16x32xf32>
    %158 = arith.truncf %157 : vector<16x32xf32> to vector<16x32xbf16>
    %c0_61 = arith.constant 0 : index
    %c0_62 = arith.constant 0 : index
    %159 = vector.load %arg12[%c0_61, %c0_62] : memref<32x32xbf16, #tpu.memory_space<vmem>>, vector<32x32xbf16>
    %cst_63 = arith.constant dense<0.000000e+00> : vector<16x32xf32>
    %160 = tpu.matmul %158, %159, %cst_63 {dimension_numbers = #tpu.dot_dimension_numbers<[1], [0], [0], [1], [0, 0, 1, 1], [], []>} : vector<16x32xbf16>, vector<32x32xbf16>, vector<16x32xf32> -> vector<16x32xf32>
    %161 = arith.truncf %160 : vector<16x32xf32> to vector<16x32xbf16>
    %cst_64 = arith.constant dense<0.000000e+00> : vector<16x32xf32>
    %162 = tpu.matmul %0, %161, %cst_64 {dimension_numbers = #tpu.dot_dimension_numbers<[1], [0], [0], [1], [0, 0, 1, 1], [], []>} : vector<16x16xbf16>, vector<16x32xbf16>, vector<16x32xf32> -> vector<16x32xf32>
    %c0_65 = arith.constant 0 : index
    %c0_66 = arith.constant 0 : index
    %163 = vector.load %arg16[%c0_65, %c0_66] : memref<4x32xf32, #tpu.memory_space<vmem>>, vector<1x32xf32>
    %164 = vector.broadcast %163 : vector<1x32xf32> to vector<16x32xf32>
    %165 = arith.addf %162, %164 : vector<16x32xf32>
    %166 = arith.truncf %165 : vector<16x32xf32> to vector<16x32xbf16>
    %c0_67 = arith.constant 0 : index
    %c0_68 = arith.constant 0 : index
    %167 = vector.load %arg13[%c0_67, %c0_68] : memref<32x32xbf16, #tpu.memory_space<vmem>>, vector<32x32xbf16>
    %cst_69 = arith.constant dense<0.000000e+00> : vector<16x32xf32>
    %168 = tpu.matmul %166, %167, %cst_69 {dimension_numbers = #tpu.dot_dimension_numbers<[1], [0], [0], [1], [0, 0, 1, 1], [], []>} : vector<16x32xbf16>, vector<32x32xbf16>, vector<16x32xf32> -> vector<16x32xf32>
    %169 = arith.truncf %168 : vector<16x32xf32> to vector<16x32xbf16>
    %c0_70 = arith.constant 0 : index
    %c0_71 = arith.constant 0 : index
    %170 = vector.load %arg15[%c0_70, %c0_71] : memref<32x4xbf16, #tpu.memory_space<vmem>>, vector<32x4xbf16>
    %cst_72 = arith.constant dense<0.000000e+00> : vector<16x4xf32>
    %171 = tpu.matmul %169, %170, %cst_72 {dimension_numbers = #tpu.dot_dimension_numbers<[1], [0], [0], [1], [0, 0, 1, 1], [], []>} : vector<16x32xbf16>, vector<32x4xbf16>, vector<16x4xf32> -> vector<16x4xf32>
    %c0_73 = arith.constant 0 : index
    %c0_74 = arith.constant 0 : index
    %172 = vector.load %arg14[%c0_73, %c0_74] : memref<4x32xbf16, #tpu.memory_space<vmem>>, vector<4x32xbf16>
    "tpu.trace_start"() <{level = 10 : i32, message = "hd,nd->hn"}> : () -> ()
    %cst_75 = arith.constant dense<0.000000e+00> : vector<4x16xf32>
    %173 = tpu.matmul %172, %169, %cst_75 {dimension_numbers = #tpu.dot_dimension_numbers<[1], [1], [0], [0], [0, 0, 1, 0], [], []>} : vector<4x32xbf16>, vector<16x32xbf16>, vector<4x16xf32> -> vector<4x16xf32>
    "tpu.trace_stop"() : () -> ()
    %174 = vector.extract_strided_slice %171 {offsets = [0, 0], sizes = [16, 1], strides = [1, 1]} : vector<16x4xf32> to vector<16x1xf32>
    %175 = vector.extract_strided_slice %173 {offsets = [0, 0], sizes = [1, 16], strides = [1, 1]} : vector<4x16xf32> to vector<1x16xf32>
    %176 = vector.broadcast %174 : vector<16x1xf32> to vector<16x16xf32>
    %177 = vector.broadcast %175 : vector<1x16xf32> to vector<16x16xf32>
    %178 = arith.addf %176, %177 : vector<16x16xf32>
    %cst_76 = arith.constant 0.000000e+00 : f32
    %179 = vector.broadcast %cst_76 : f32 to vector<16x16xf32>
    %180 = arith.cmpf ogt, %178, %179 : vector<16x16xf32>
    %cst_77 = arith.constant 2.000000e-01 : f32
    %181 = vector.broadcast %cst_77 : f32 to vector<16x16xf32>
    %182 = arith.mulf %181, %178 : vector<16x16xf32>
    %183 = arith.select %180, %178, %182 : vector<16x16xi1>, vector<16x16xf32>
    %cst_78 = arith.constant -1.000000e+30 : f32
    %184 = vector.broadcast %cst_78 : f32 to vector<16x16xf32>
    %185 = arith.select %2, %183, %184 : vector<16x16xi1>, vector<16x16xf32>
    %cst_79 = arith.constant dense<0xFF800000> : vector<16xf32>
    %186 = vector.multi_reduction <maximumf>, %185, %cst_79 [1] : vector<16x16xf32> to vector<16xf32>
    %187 = vector.shape_cast %186 : vector<16xf32> to vector<16x1xf32>
    %188 = vector.broadcast %187 : vector<16x1xf32> to vector<16x16xf32>
    %189 = arith.subf %185, %188 : vector<16x16xf32>
    %190 = math.exp %189 : vector<16x16xf32>
    %cst_80 = arith.constant dense<0.000000e+00> : vector<16xf32>
    %191 = vector.multi_reduction <add>, %190, %cst_80 [1] : vector<16x16xf32> to vector<16xf32>
    %192 = vector.shape_cast %191 : vector<16xf32> to vector<16x1xf32>
    %193 = tpu.reciprocal %192 : vector<16x1xf32> -> vector<16x1xf32>
    %194 = vector.broadcast %193 : vector<16x1xf32> to vector<16x16xf32>
    %195 = arith.mulf %190, %194 : vector<16x16xf32>
    %196 = arith.truncf %195 : vector<16x16xf32> to vector<16x16xbf16>
    %197 = vector.extract_strided_slice %169 {offsets = [0, 0], sizes = [16, 8], strides = [1, 1]} : vector<16x32xbf16> to vector<16x8xbf16>
    %cst_81 = arith.constant dense<0.000000e+00> : vector<16x8xf32>
    %198 = tpu.matmul %196, %197, %cst_81 {dimension_numbers = #tpu.dot_dimension_numbers<[1], [0], [0], [1], [0, 0, 1, 1], [], []>} : vector<16x16xbf16>, vector<16x8xbf16>, vector<16x8xf32> -> vector<16x8xf32>
    %199 = vector.extract_strided_slice %171 {offsets = [0, 1], sizes = [16, 1], strides = [1, 1]} : vector<16x4xf32> to vector<16x1xf32>
    %200 = vector.extract_strided_slice %173 {offsets = [1, 0], sizes = [1, 16], strides = [1, 1]} : vector<4x16xf32> to vector<1x16xf32>
    %201 = vector.broadcast %199 : vector<16x1xf32> to vector<16x16xf32>
    %202 = vector.broadcast %200 : vector<1x16xf32> to vector<16x16xf32>
    %203 = arith.addf %201, %202 : vector<16x16xf32>
    %cst_82 = arith.constant 0.000000e+00 : f32
    %204 = vector.broadcast %cst_82 : f32 to vector<16x16xf32>
    %205 = arith.cmpf ogt, %203, %204 : vector<16x16xf32>
    %cst_83 = arith.constant 2.000000e-01 : f32
    %206 = vector.broadcast %cst_83 : f32 to vector<16x16xf32>
    %207 = arith.mulf %206, %203 : vector<16x16xf32>
    %208 = arith.select %205, %203, %207 : vector<16x16xi1>, vector<16x16xf32>
    %cst_84 = arith.constant -1.000000e+30 : f32
    %209 = vector.broadcast %cst_84 : f32 to vector<16x16xf32>
    %210 = arith.select %2, %208, %209 : vector<16x16xi1>, vector<16x16xf32>
    %cst_85 = arith.constant dense<0xFF800000> : vector<16xf32>
    %211 = vector.multi_reduction <maximumf>, %210, %cst_85 [1] : vector<16x16xf32> to vector<16xf32>
    %212 = vector.shape_cast %211 : vector<16xf32> to vector<16x1xf32>
    %213 = vector.broadcast %212 : vector<16x1xf32> to vector<16x16xf32>
    %214 = arith.subf %210, %213 : vector<16x16xf32>
    %215 = math.exp %214 : vector<16x16xf32>
    %cst_86 = arith.constant dense<0.000000e+00> : vector<16xf32>
    %216 = vector.multi_reduction <add>, %215, %cst_86 [1] : vector<16x16xf32> to vector<16xf32>
    %217 = vector.shape_cast %216 : vector<16xf32> to vector<16x1xf32>
    %218 = tpu.reciprocal %217 : vector<16x1xf32> -> vector<16x1xf32>
    %219 = vector.broadcast %218 : vector<16x1xf32> to vector<16x16xf32>
    %220 = arith.mulf %215, %219 : vector<16x16xf32>
    %221 = arith.truncf %220 : vector<16x16xf32> to vector<16x16xbf16>
    %222 = vector.extract_strided_slice %169 {offsets = [0, 8], sizes = [16, 8], strides = [1, 1]} : vector<16x32xbf16> to vector<16x8xbf16>
    %cst_87 = arith.constant dense<0.000000e+00> : vector<16x8xf32>
    %223 = tpu.matmul %221, %222, %cst_87 {dimension_numbers = #tpu.dot_dimension_numbers<[1], [0], [0], [1], [0, 0, 1, 1], [], []>} : vector<16x16xbf16>, vector<16x8xbf16>, vector<16x8xf32> -> vector<16x8xf32>
    %224 = vector.extract_strided_slice %171 {offsets = [0, 2], sizes = [16, 1], strides = [1, 1]} : vector<16x4xf32> to vector<16x1xf32>
    %225 = vector.extract_strided_slice %173 {offsets = [2, 0], sizes = [1, 16], strides = [1, 1]} : vector<4x16xf32> to vector<1x16xf32>
    %226 = vector.broadcast %224 : vector<16x1xf32> to vector<16x16xf32>
    %227 = vector.broadcast %225 : vector<1x16xf32> to vector<16x16xf32>
    %228 = arith.addf %226, %227 : vector<16x16xf32>
    %cst_88 = arith.constant 0.000000e+00 : f32
    %229 = vector.broadcast %cst_88 : f32 to vector<16x16xf32>
    %230 = arith.cmpf ogt, %228, %229 : vector<16x16xf32>
    %cst_89 = arith.constant 2.000000e-01 : f32
    %231 = vector.broadcast %cst_89 : f32 to vector<16x16xf32>
    %232 = arith.mulf %231, %228 : vector<16x16xf32>
    %233 = arith.select %230, %228, %232 : vector<16x16xi1>, vector<16x16xf32>
    %cst_90 = arith.constant -1.000000e+30 : f32
    %234 = vector.broadcast %cst_90 : f32 to vector<16x16xf32>
    %235 = arith.select %2, %233, %234 : vector<16x16xi1>, vector<16x16xf32>
    %cst_91 = arith.constant dense<0xFF800000> : vector<16xf32>
    %236 = vector.multi_reduction <maximumf>, %235, %cst_91 [1] : vector<16x16xf32> to vector<16xf32>
    %237 = vector.shape_cast %236 : vector<16xf32> to vector<16x1xf32>
    %238 = vector.broadcast %237 : vector<16x1xf32> to vector<16x16xf32>
    %239 = arith.subf %235, %238 : vector<16x16xf32>
    %240 = math.exp %239 : vector<16x16xf32>
    %cst_92 = arith.constant dense<0.000000e+00> : vector<16xf32>
    %241 = vector.multi_reduction <add>, %240, %cst_92 [1] : vector<16x16xf32> to vector<16xf32>
    %242 = vector.shape_cast %241 : vector<16xf32> to vector<16x1xf32>
    %243 = tpu.reciprocal %242 : vector<16x1xf32> -> vector<16x1xf32>
    %244 = vector.broadcast %243 : vector<16x1xf32> to vector<16x16xf32>
    %245 = arith.mulf %240, %244 : vector<16x16xf32>
    %246 = arith.truncf %245 : vector<16x16xf32> to vector<16x16xbf16>
    %247 = vector.extract_strided_slice %169 {offsets = [0, 16], sizes = [16, 8], strides = [1, 1]} : vector<16x32xbf16> to vector<16x8xbf16>
    %cst_93 = arith.constant dense<0.000000e+00> : vector<16x8xf32>
    %248 = tpu.matmul %246, %247, %cst_93 {dimension_numbers = #tpu.dot_dimension_numbers<[1], [0], [0], [1], [0, 0, 1, 1], [], []>} : vector<16x16xbf16>, vector<16x8xbf16>, vector<16x8xf32> -> vector<16x8xf32>
    %249 = vector.extract_strided_slice %171 {offsets = [0, 3], sizes = [16, 1], strides = [1, 1]} : vector<16x4xf32> to vector<16x1xf32>
    %250 = vector.extract_strided_slice %173 {offsets = [3, 0], sizes = [1, 16], strides = [1, 1]} : vector<4x16xf32> to vector<1x16xf32>
    %251 = vector.broadcast %249 : vector<16x1xf32> to vector<16x16xf32>
    %252 = vector.broadcast %250 : vector<1x16xf32> to vector<16x16xf32>
    %253 = arith.addf %251, %252 : vector<16x16xf32>
    %cst_94 = arith.constant 0.000000e+00 : f32
    %254 = vector.broadcast %cst_94 : f32 to vector<16x16xf32>
    %255 = arith.cmpf ogt, %253, %254 : vector<16x16xf32>
    %cst_95 = arith.constant 2.000000e-01 : f32
    %256 = vector.broadcast %cst_95 : f32 to vector<16x16xf32>
    %257 = arith.mulf %256, %253 : vector<16x16xf32>
    %258 = arith.select %255, %253, %257 : vector<16x16xi1>, vector<16x16xf32>
    %cst_96 = arith.constant -1.000000e+30 : f32
    %259 = vector.broadcast %cst_96 : f32 to vector<16x16xf32>
    %260 = arith.select %2, %258, %259 : vector<16x16xi1>, vector<16x16xf32>
    %cst_97 = arith.constant dense<0xFF800000> : vector<16xf32>
    %261 = vector.multi_reduction <maximumf>, %260, %cst_97 [1] : vector<16x16xf32> to vector<16xf32>
    %262 = vector.shape_cast %261 : vector<16xf32> to vector<16x1xf32>
    %263 = vector.broadcast %262 : vector<16x1xf32> to vector<16x16xf32>
    %264 = arith.subf %260, %263 : vector<16x16xf32>
    %265 = math.exp %264 : vector<16x16xf32>
    %cst_98 = arith.constant dense<0.000000e+00> : vector<16xf32>
    %266 = vector.multi_reduction <add>, %265, %cst_98 [1] : vector<16x16xf32> to vector<16xf32>
    %267 = vector.shape_cast %266 : vector<16xf32> to vector<16x1xf32>
    %268 = tpu.reciprocal %267 : vector<16x1xf32> -> vector<16x1xf32>
    %269 = vector.broadcast %268 : vector<16x1xf32> to vector<16x16xf32>
    %270 = arith.mulf %265, %269 : vector<16x16xf32>
    %271 = arith.truncf %270 : vector<16x16xf32> to vector<16x16xbf16>
    %272 = vector.extract_strided_slice %169 {offsets = [0, 24], sizes = [16, 8], strides = [1, 1]} : vector<16x32xbf16> to vector<16x8xbf16>
    %cst_99 = arith.constant dense<0.000000e+00> : vector<16x8xf32>
    %273 = tpu.matmul %271, %272, %cst_99 {dimension_numbers = #tpu.dot_dimension_numbers<[1], [0], [0], [1], [0, 0, 1, 1], [], []>} : vector<16x16xbf16>, vector<16x8xbf16>, vector<16x8xf32> -> vector<16x8xf32>
    %274 = tpu.concatenate %198, %223, %248, %273 in 1 : vector<16x8xf32>, vector<16x8xf32>, vector<16x8xf32>, vector<16x8xf32> -> vector<16x32xf32>
    %c1_100 = arith.constant 1 : index
    %c0_101 = arith.constant 0 : index
    %275 = vector.load %arg16[%c1_100, %c0_101] : memref<4x32xf32, #tpu.memory_space<vmem>>, vector<1x32xf32>
    %276 = vector.broadcast %275 : vector<1x32xf32> to vector<16x32xf32>
    %277 = arith.addf %274, %276 : vector<16x32xf32>
    %278 = arith.addf %277, %165 : vector<16x32xf32>
    %cst_102 = arith.constant dense<0.000000e+00> : vector<16xf32>
    %279 = vector.multi_reduction <add>, %278, %cst_102 [1] : vector<16x32xf32> to vector<16xf32>
    %280 = vector.shape_cast %279 : vector<16xf32> to vector<16x1xf32>
    %cst_103 = arith.constant 3.200000e+01 : f32
    %281 = vector.broadcast %cst_103 : f32 to vector<16x1xf32>
    %282 = arith.divf %280, %281 : vector<16x1xf32>
    %283 = vector.broadcast %282 : vector<16x1xf32> to vector<16x32xf32>
    %284 = arith.subf %278, %283 : vector<16x32xf32>
    %285 = arith.mulf %284, %284 : vector<16x32xf32>
    %cst_104 = arith.constant dense<0.000000e+00> : vector<16xf32>
    %286 = vector.multi_reduction <add>, %285, %cst_104 [1] : vector<16x32xf32> to vector<16xf32>
    %287 = vector.shape_cast %286 : vector<16xf32> to vector<16x1xf32>
    %cst_105 = arith.constant 3.200000e+01 : f32
    %288 = vector.broadcast %cst_105 : f32 to vector<16x1xf32>
    %289 = arith.divf %287, %288 : vector<16x1xf32>
    %cst_106 = arith.constant 9.99999974E-6 : f32
    %290 = vector.broadcast %cst_106 : f32 to vector<16x1xf32>
    %291 = arith.addf %289, %290 : vector<16x1xf32>
    %292 = math.rsqrt %291 : vector<16x1xf32>
    %293 = vector.broadcast %292 : vector<16x1xf32> to vector<16x32xf32>
    %294 = arith.mulf %284, %293 : vector<16x32xf32>
    %c2_107 = arith.constant 2 : index
    %c0_108 = arith.constant 0 : index
    %295 = vector.load %arg16[%c2_107, %c0_108] : memref<4x32xf32, #tpu.memory_space<vmem>>, vector<1x32xf32>
    %296 = vector.broadcast %295 : vector<1x32xf32> to vector<16x32xf32>
    %297 = arith.mulf %294, %296 : vector<16x32xf32>
    %c3_109 = arith.constant 3 : index
    %c0_110 = arith.constant 0 : index
    %298 = vector.load %arg16[%c3_109, %c0_110] : memref<4x32xf32, #tpu.memory_space<vmem>>, vector<1x32xf32>
    %299 = vector.broadcast %298 : vector<1x32xf32> to vector<16x32xf32>
    %300 = arith.addf %297, %299 : vector<16x32xf32>
    %cst_111 = arith.constant 0.000000e+00 : f32
    %301 = vector.broadcast %cst_111 : f32 to vector<16x32xf32>
    %302 = arith.maximumf %300, %301 : vector<16x32xf32>
    %303 = arith.truncf %302 : vector<16x32xf32> to vector<16x32xbf16>
    %c0_112 = arith.constant 0 : index
    %c0_113 = arith.constant 0 : index
    %304 = vector.load %arg18[%c0_112, %c0_113] : memref<32x32xbf16, #tpu.memory_space<vmem>>, vector<32x32xbf16>
    %cst_114 = arith.constant dense<0.000000e+00> : vector<16x32xf32>
    %305 = tpu.matmul %303, %304, %cst_114 {dimension_numbers = #tpu.dot_dimension_numbers<[1], [0], [0], [1], [0, 0, 1, 1], [], []>} : vector<16x32xbf16>, vector<32x32xbf16>, vector<16x32xf32> -> vector<16x32xf32>
    %c0_115 = arith.constant 0 : index
    %c0_116 = arith.constant 0 : index
    %306 = vector.load %arg19[%c0_115, %c0_116] : memref<1x32xf32, #tpu.memory_space<vmem>>, vector<1x32xf32>
    %307 = vector.broadcast %306 : vector<1x32xf32> to vector<16x32xf32>
    %308 = arith.addf %305, %307 : vector<16x32xf32>
    %c0_117 = arith.constant 0 : index
    %c0_118 = arith.constant 0 : index
    %309 = vector.load %arg17[%c0_117, %c0_118] : memref<16x32xf32, #tpu.memory_space<vmem>>, vector<16x32xf32>
    %310 = arith.addf %308, %309 : vector<16x32xf32>
    %c0_119 = arith.constant 0 : index
    %c0_120 = arith.constant 0 : index
    %311 = vector.load %arg27[%c0_119, %c0_120] : memref<16x32xf32, #tpu.memory_space<vmem>>, vector<16x32xf32>
    tpu.vector_store %arg27[%c0_119, %c0_120], %310 {strides = array<i32>} : memref<16x32xf32, #tpu.memory_space<vmem>>, vector<16x32xf32>,
    %c0_121 = arith.constant 0 : index
    %c0_122 = arith.constant 0 : index
    %312 = vector.load %arg20[%c0_121, %c0_122] : memref<4x32xbf16, #tpu.memory_space<vmem>>, vector<4x32xbf16>
    %c0_123 = arith.constant 0 : index
    %c0_124 = arith.constant 0 : index
    %313 = vector.load %arg21[%c0_123, %c0_124] : memref<32x32xbf16, #tpu.memory_space<vmem>>, vector<32x32xbf16>
    %cst_125 = arith.constant dense<0.000000e+00> : vector<4x32xf32>
    %314 = tpu.matmul %312, %313, %cst_125 {dimension_numbers = #tpu.dot_dimension_numbers<[1], [0], [0], [1], [0, 0, 1, 1], [], []>} : vector<4x32xbf16>, vector<32x32xbf16>, vector<4x32xf32> -> vector<4x32xf32>
    %c0_126 = arith.constant 0 : index
    %c0_127 = arith.constant 0 : index
    %315 = vector.load %arg22[%c0_126, %c0_127] : memref<1x32xf32, #tpu.memory_space<vmem>>, vector<1x32xf32>
    %316 = vector.broadcast %315 : vector<1x32xf32> to vector<4x32xf32>
    %317 = arith.addf %314, %316 : vector<4x32xf32>
    %cst_128 = arith.constant 0.000000e+00 : f32
    %318 = vector.broadcast %cst_128 : f32 to vector<4x32xf32>
    %319 = arith.maximumf %317, %318 : vector<4x32xf32>
    %320 = arith.truncf %319 : vector<4x32xf32> to vector<4x32xbf16>
    %c0_129 = arith.constant 0 : index
    %c0_130 = arith.constant 0 : index
    %321 = vector.load %arg23[%c0_129, %c0_130] : memref<32x1xbf16, #tpu.memory_space<vmem>>, vector<32x1xbf16>
    %cst_131 = arith.constant dense<0.000000e+00> : vector<4x1xf32>
    %322 = tpu.matmul %320, %321, %cst_131 {dimension_numbers = #tpu.dot_dimension_numbers<[1], [0], [0], [1], [0, 0, 1, 1], [], []>} : vector<4x32xbf16>, vector<32x1xbf16>, vector<4x1xf32> -> vector<4x1xf32>
    %c0_132 = arith.constant 0 : index
    %c0_133 = arith.constant 0 : index
    %323 = vector.load %arg24[%c0_132, %c0_133] : memref<1x1xf32, #tpu.memory_space<vmem>>, vector<1x1xf32>
    %324 = vector.broadcast %323 : vector<1x1xf32> to vector<4x1xf32>
    %325 = arith.addf %322, %324 : vector<4x1xf32>
    %326 = arith.negf %325 : vector<4x1xf32>
    %327 = math.exp %326 : vector<4x1xf32>
    %cst_134 = arith.constant 1.000000e+00 : f32
    %328 = vector.broadcast %cst_134 : f32 to vector<4x1xf32>
    %329 = arith.addf %328, %327 : vector<4x1xf32>
    %330 = arith.divf %328, %329 : vector<4x1xf32>
    %c0_135 = arith.constant 0 : index
    %c0_136 = arith.constant 0 : index
    %331 = vector.load %arg28[%c0_135, %c0_136] : memref<4x1xf32, #tpu.memory_space<vmem>>, vector<4x1xf32>
    tpu.vector_store %arg28[%c0_135, %c0_136], %330 {strides = array<i32>} : memref<4x1xf32, #tpu.memory_space<vmem>>, vector<4x1xf32>,
    %c0_137 = arith.constant 0 : index
    %c0_138 = arith.constant 0 : index
    %332 = vector.load %arg25[%c0_137, %c0_138] : memref<32x128xbf16, #tpu.memory_space<vmem>>, vector<32x128xbf16>
    %c0_139 = arith.constant 0 : index
    %c0_140 = arith.constant 0 : index
    %333 = vector.load %arg3[%c0_139, %c0_140] : memref<128x128xbf16, #tpu.memory_space<vmem>>, vector<128x128xbf16>
    %cst_141 = arith.constant dense<0.000000e+00> : vector<32x128xf32>
    %334 = tpu.matmul %332, %333, %cst_141 {dimension_numbers = #tpu.dot_dimension_numbers<[1], [0], [0], [1], [0, 0, 1, 1], [], []>} : vector<32x128xbf16>, vector<128x128xbf16>, vector<32x128xf32> -> vector<32x128xf32>
    %c0_142 = arith.constant 0 : index
    %c0_143 = arith.constant 0 : index
    %335 = vector.load %arg4[%c0_142, %c0_143] : memref<1x128xf32, #tpu.memory_space<vmem>>, vector<1x128xf32>
    %336 = vector.broadcast %335 : vector<1x128xf32> to vector<32x128xf32>
    %337 = arith.addf %334, %336 : vector<32x128xf32>
    %c0_144 = arith.constant 0 : index
    %c0_145 = arith.constant 0 : index
    %338 = vector.load %arg26[%c0_144, %c0_145] : memref<32x128xbf16, #tpu.memory_space<vmem>>, vector<32x128xbf16>
    %c0_146 = arith.constant 0 : index
    %c0_147 = arith.constant 0 : index
    %339 = vector.load %arg3[%c0_146, %c0_147] : memref<128x128xbf16, #tpu.memory_space<vmem>>, vector<128x128xbf16>
    %cst_148 = arith.constant dense<0.000000e+00> : vector<32x128xf32>
    %340 = tpu.matmul %338, %339, %cst_148 {dimension_numbers = #tpu.dot_dimension_numbers<[1], [0], [0], [1], [0, 0, 1, 1], [], []>} : vector<32x128xbf16>, vector<128x128xbf16>, vector<32x128xf32> -> vector<32x128xf32>
    %c0_149 = arith.constant 0 : index
    %c0_150 = arith.constant 0 : index
    %341 = vector.load %arg4[%c0_149, %c0_150] : memref<1x128xf32, #tpu.memory_space<vmem>>, vector<1x128xf32>
    %342 = vector.broadcast %341 : vector<1x128xf32> to vector<32x128xf32>
    %343 = arith.addf %340, %342 : vector<32x128xf32>
    %344 = vector.extract_strided_slice %337 {offsets = [0, 0], sizes = [32, 32], strides = [1, 1]} : vector<32x128xf32> to vector<32x32xf32>
    %345 = vector.extract_strided_slice %337 {offsets = [0, 32], sizes = [32, 32], strides = [1, 1]} : vector<32x128xf32> to vector<32x32xf32>
    %346 = vector.extract_strided_slice %337 {offsets = [0, 64], sizes = [32, 32], strides = [1, 1]} : vector<32x128xf32> to vector<32x32xf32>
    %347 = vector.extract_strided_slice %337 {offsets = [0, 96], sizes = [32, 32], strides = [1, 1]} : vector<32x128xf32> to vector<32x32xf32>
    %348 = vector.extract_strided_slice %343 {offsets = [0, 0], sizes = [32, 32], strides = [1, 1]} : vector<32x128xf32> to vector<32x32xf32>
    %349 = vector.extract_strided_slice %343 {offsets = [0, 32], sizes = [32, 32], strides = [1, 1]} : vector<32x128xf32> to vector<32x32xf32>
    %350 = vector.extract_strided_slice %343 {offsets = [0, 64], sizes = [32, 32], strides = [1, 1]} : vector<32x128xf32> to vector<32x32xf32>
    %351 = vector.extract_strided_slice %343 {offsets = [0, 96], sizes = [32, 32], strides = [1, 1]} : vector<32x128xf32> to vector<32x32xf32>
    %352 = arith.mulf %344, %348 : vector<32x32xf32>
    %cst_151 = arith.constant dense<0.000000e+00> : vector<32xf32>
    %353 = vector.multi_reduction <add>, %352, %cst_151 [1] : vector<32x32xf32> to vector<32xf32>
    %354 = vector.shape_cast %353 : vector<32xf32> to vector<32x1xf32>
    %355 = arith.mulf %344, %344 : vector<32x32xf32>
    %cst_152 = arith.constant dense<0.000000e+00> : vector<32xf32>
    %356 = vector.multi_reduction <add>, %355, %cst_152 [1] : vector<32x32xf32> to vector<32xf32>
    %357 = vector.shape_cast %356 : vector<32xf32> to vector<32x1xf32>
    %358 = math.sqrt %357 : vector<32x1xf32>
    %359 = arith.mulf %348, %348 : vector<32x32xf32>
    %cst_153 = arith.constant dense<0.000000e+00> : vector<32xf32>
    %360 = vector.multi_reduction <add>, %359, %cst_153 [1] : vector<32x32xf32> to vector<32xf32>
    %361 = vector.shape_cast %360 : vector<32xf32> to vector<32x1xf32>
    %362 = math.sqrt %361 : vector<32x1xf32>
    %cst_154 = arith.constant 9.99999993E-9 : f32
    %363 = vector.broadcast %cst_154 : f32 to vector<32x1xf32>
    %364 = arith.maximumf %358, %363 : vector<32x1xf32>
    %cst_155 = arith.constant 9.99999993E-9 : f32
    %365 = vector.broadcast %cst_155 : f32 to vector<32x1xf32>
    %366 = arith.maximumf %362, %365 : vector<32x1xf32>
    %367 = arith.mulf %364, %366 : vector<32x1xf32>
    %368 = tpu.reciprocal %367 : vector<32x1xf32> -> vector<32x1xf32>
    %369 = arith.mulf %354, %368 : vector<32x1xf32>
    %370 = arith.mulf %345, %350 : vector<32x32xf32>
    %cst_156 = arith.constant dense<0.000000e+00> : vector<32xf32>
    %371 = vector.multi_reduction <add>, %370, %cst_156 [1] : vector<32x32xf32> to vector<32xf32>
    %372 = vector.shape_cast %371 : vector<32xf32> to vector<32x1xf32>
    %373 = arith.mulf %345, %345 : vector<32x32xf32>
    %cst_157 = arith.constant dense<0.000000e+00> : vector<32xf32>
    %374 = vector.multi_reduction <add>, %373, %cst_157 [1] : vector<32x32xf32> to vector<32xf32>
    %375 = vector.shape_cast %374 : vector<32xf32> to vector<32x1xf32>
    %376 = math.sqrt %375 : vector<32x1xf32>
    %377 = arith.mulf %350, %350 : vector<32x32xf32>
    %cst_158 = arith.constant dense<0.000000e+00> : vector<32xf32>
    %378 = vector.multi_reduction <add>, %377, %cst_158 [1] : vector<32x32xf32> to vector<32xf32>
    %379 = vector.shape_cast %378 : vector<32xf32> to vector<32x1xf32>
    %380 = math.sqrt %379 : vector<32x1xf32>
    %cst_159 = arith.constant 9.99999993E-9 : f32
    %381 = vector.broadcast %cst_159 : f32 to vector<32x1xf32>
    %382 = arith.maximumf %376, %381 : vector<32x1xf32>
    %cst_160 = arith.constant 9.99999993E-9 : f32
    %383 = vector.broadcast %cst_160 : f32 to vector<32x1xf32>
    %384 = arith.maximumf %380, %383 : vector<32x1xf32>
    %385 = arith.mulf %382, %384 : vector<32x1xf32>
    %386 = tpu.reciprocal %385 : vector<32x1xf32> -> vector<32x1xf32>
    %387 = arith.mulf %372, %386 : vector<32x1xf32>
    %388 = arith.mulf %346, %349 : vector<32x32xf32>
    %cst_161 = arith.constant dense<0.000000e+00> : vector<32xf32>
    %389 = vector.multi_reduction <add>, %388, %cst_161 [1] : vector<32x32xf32> to vector<32xf32>
    %390 = vector.shape_cast %389 : vector<32xf32> to vector<32x1xf32>
    %391 = arith.mulf %346, %346 : vector<32x32xf32>
    %cst_162 = arith.constant dense<0.000000e+00> : vector<32xf32>
    %392 = vector.multi_reduction <add>, %391, %cst_162 [1] : vector<32x32xf32> to vector<32xf32>
    %393 = vector.shape_cast %392 : vector<32xf32> to vector<32x1xf32>
    %394 = math.sqrt %393 : vector<32x1xf32>
    %395 = arith.mulf %349, %349 : vector<32x32xf32>
    %cst_163 = arith.constant dense<0.000000e+00> : vector<32xf32>
    %396 = vector.multi_reduction <add>, %395, %cst_163 [1] : vector<32x32xf32> to vector<32xf32>
    %397 = vector.shape_cast %396 : vector<32xf32> to vector<32x1xf32>
    %398 = math.sqrt %397 : vector<32x1xf32>
    %cst_164 = arith.constant 9.99999993E-9 : f32
    %399 = vector.broadcast %cst_164 : f32 to vector<32x1xf32>
    %400 = arith.maximumf %394, %399 : vector<32x1xf32>
    %cst_165 = arith.constant 9.99999993E-9 : f32
    %401 = vector.broadcast %cst_165 : f32 to vector<32x1xf32>
    %402 = arith.maximumf %398, %401 : vector<32x1xf32>
    %403 = arith.mulf %400, %402 : vector<32x1xf32>
    %404 = tpu.reciprocal %403 : vector<32x1xf32> -> vector<32x1xf32>
    %405 = arith.mulf %390, %404 : vector<32x1xf32>
    %406 = arith.mulf %347, %351 : vector<32x32xf32>
    %cst_166 = arith.constant dense<0.000000e+00> : vector<32xf32>
    %407 = vector.multi_reduction <add>, %406, %cst_166 [1] : vector<32x32xf32> to vector<32xf32>
    %408 = vector.shape_cast %407 : vector<32xf32> to vector<32x1xf32>
    %409 = arith.mulf %347, %347 : vector<32x32xf32>
    %cst_167 = arith.constant dense<0.000000e+00> : vector<32xf32>
    %410 = vector.multi_reduction <add>, %409, %cst_167 [1] : vector<32x32xf32> to vector<32xf32>
    %411 = vector.shape_cast %410 : vector<32xf32> to vector<32x1xf32>
    %412 = math.sqrt %411 : vector<32x1xf32>
    %413 = arith.mulf %351, %351 : vector<32x32xf32>
    %cst_168 = arith.constant dense<0.000000e+00> : vector<32xf32>
    %414 = vector.multi_reduction <add>, %413, %cst_168 [1] : vector<32x32xf32> to vector<32xf32>
    %415 = vector.shape_cast %414 : vector<32xf32> to vector<32x1xf32>
    %416 = math.sqrt %415 : vector<32x1xf32>
    %cst_169 = arith.constant 9.99999993E-9 : f32
    %417 = vector.broadcast %cst_169 : f32 to vector<32x1xf32>
    %418 = arith.maximumf %412, %417 : vector<32x1xf32>
    %cst_170 = arith.constant 9.99999993E-9 : f32
    %419 = vector.broadcast %cst_170 : f32 to vector<32x1xf32>
    %420 = arith.maximumf %416, %419 : vector<32x1xf32>
    %421 = arith.mulf %418, %420 : vector<32x1xf32>
    %422 = tpu.reciprocal %421 : vector<32x1xf32> -> vector<32x1xf32>
    %423 = arith.mulf %408, %422 : vector<32x1xf32>
    %424 = tpu.concatenate %369, %387, %405, %423 in 1 : vector<32x1xf32>, vector<32x1xf32>, vector<32x1xf32>, vector<32x1xf32> -> vector<32x4xf32>
    %cst_171 = arith.constant 0.000000e+00 : f32
    %425 = vector.broadcast %cst_171 : f32 to vector<32x124xf32>
    %426 = tpu.concatenate %424, %425 in 1 : vector<32x4xf32>, vector<32x124xf32> -> vector<32x128xf32>
    %c0_172 = arith.constant 0 : index
    %c0_173 = arith.constant 0 : index
    %427 = vector.load %arg29[%c0_172, %c0_173] : memref<32x128xf32, #tpu.memory_space<vmem>>, vector<32x128xf32>
    tpu.vector_store %arg29[%c0_172, %c0_173], %426 {strides = array<i32>} : memref<32x128xf32, #tpu.memory_space<vmem>>, vector<32x128xf32>,
    return
  }
  func.func @transform_0(%arg0: i32) -> (i32, i32) {
    %c0_i32 = arith.constant 0 : i32
    %c0_i32_0 = arith.constant 0 : i32
    %c0_i32_1 = arith.constant 0 : i32
    return %c0_i32, %c0_i32_0 : i32, i32
  }
  func.func @transform_1(%arg0: i32) -> (i32, i32) {
    %c0_i32 = arith.constant 0 : i32
    %c0_i32_0 = arith.constant 0 : i32
    %c0_i32_1 = arith.constant 0 : i32
    return %c0_i32, %c0_i32_0 : i32, i32
  }
  func.func @transform_2(%arg0: i32) -> (i32, i32) {
    %c0_i32 = arith.constant 0 : i32
    %c0_i32_0 = arith.constant 0 : i32
    %c0_i32_1 = arith.constant 0 : i32
    return %c0_i32, %c0_i32_0 : i32, i32
  }
  func.func @transform_3(%arg0: i32) -> (i32, i32) {
    %c0_i32 = arith.constant 0 : i32
    %c0_i32_0 = arith.constant 0 : i32
    %c0_i32_1 = arith.constant 0 : i32
    return %c0_i32, %c0_i32_0 : i32, i32
  }
  func.func @transform_4(%arg0: i32) -> (i32, i32) {
    %c0_i32 = arith.constant 0 : i32
    %c0_i32_0 = arith.constant 0 : i32
    %c0_i32_1 = arith.constant 0 : i32
    return %c0_i32, %c0_i32_0 : i32, i32
  }
  func.func @transform_5(%arg0: i32) -> (i32, i32) {
    %c0_i32 = arith.constant 0 : i32
    %c0_i32_0 = arith.constant 0 : i32
    %c0_i32_1 = arith.constant 0 : i32
    return %c0_i32, %c0_i32_0 : i32, i32
  }
  func.func @transform_6(%arg0: i32) -> (i32, i32) {
    %c0_i32 = arith.constant 0 : i32
    %c0_i32_0 = arith.constant 0 : i32
    %c0_i32_1 = arith.constant 0 : i32
    return %c0_i32, %c0_i32_0 : i32, i32
  }
  func.func @transform_7(%arg0: i32) -> (i32, i32) {
    %c0_i32 = arith.constant 0 : i32
    %c0_i32_0 = arith.constant 0 : i32
    %c0_i32_1 = arith.constant 0 : i32
    return %c0_i32, %c0_i32_0 : i32, i32
  }
  func.func @transform_8(%arg0: i32) -> (i32, i32) {
    %c0_i32 = arith.constant 0 : i32
    %c0_i32_0 = arith.constant 0 : i32
    %c0_i32_1 = arith.constant 0 : i32
    return %c0_i32, %c0_i32_0 : i32, i32
  }
  func.func @transform_9(%arg0: i32) -> (i32, i32) {
    %c0_i32 = arith.constant 0 : i32
    %c0_i32_0 = arith.constant 0 : i32
    %c0_i32_1 = arith.constant 0 : i32
    return %c0_i32, %c0_i32_0 : i32, i32
  }
  func.func @transform_10(%arg0: i32) -> (i32, i32) {
    %c0_i32 = arith.constant 0 : i32
    %c0_i32_0 = arith.constant 0 : i32
    %c0_i32_1 = arith.constant 0 : i32
    return %c0_i32, %c0_i32_0 : i32, i32
  }
  func.func @transform_11(%arg0: i32) -> (i32, i32) {
    %c0_i32 = arith.constant 0 : i32
    %c0_i32_0 = arith.constant 0 : i32
    %c0_i32_1 = arith.constant 0 : i32
    return %c0_i32, %c0_i32_0 : i32, i32
  }
  func.func @transform_12(%arg0: i32) -> (i32, i32) {
    %c0_i32 = arith.constant 0 : i32
    %c0_i32_0 = arith.constant 0 : i32
    %c0_i32_1 = arith.constant 0 : i32
    return %c0_i32, %c0_i32_0 : i32, i32
  }
  func.func @transform_13(%arg0: i32) -> (i32, i32) {
    %c0_i32 = arith.constant 0 : i32
    %c0_i32_0 = arith.constant 0 : i32
    %c0_i32_1 = arith.constant 0 : i32
    return %c0_i32, %c0_i32_0 : i32, i32
  }
  func.func @transform_14(%arg0: i32) -> (i32, i32) {
    %c0_i32 = arith.constant 0 : i32
    %c0_i32_0 = arith.constant 0 : i32
    %c0_i32_1 = arith.constant 0 : i32
    return %c0_i32, %c0_i32_0 : i32, i32
  }
  func.func @transform_15(%arg0: i32) -> (i32, i32) {
    %c0_i32 = arith.constant 0 : i32
    %c0_i32_0 = arith.constant 0 : i32
    %c0_i32_1 = arith.constant 0 : i32
    return %c0_i32, %c0_i32_0 : i32, i32
  }
  func.func @transform_16(%arg0: i32) -> (i32, i32) {
    %c0_i32 = arith.constant 0 : i32
    %c0_i32_0 = arith.constant 0 : i32
    %c0_i32_1 = arith.constant 0 : i32
    return %c0_i32, %c0_i32_0 : i32, i32
  }
  func.func @transform_17(%arg0: i32) -> (i32, i32) {
    %c0_i32 = arith.constant 0 : i32
    %c0_i32_0 = arith.constant 0 : i32
    %c0_i32_1 = arith.constant 0 : i32
    return %c0_i32, %c0_i32_0 : i32, i32
  }
  func.func @transform_18(%arg0: i32) -> (i32, i32) {
    %c0_i32 = arith.constant 0 : i32
    %c0_i32_0 = arith.constant 0 : i32
    %c0_i32_1 = arith.constant 0 : i32
    return %c0_i32, %c0_i32_0 : i32, i32
  }
  func.func @transform_19(%arg0: i32) -> (i32, i32) {
    %c0_i32 = arith.constant 0 : i32
    %c0_i32_0 = arith.constant 0 : i32
    %c0_i32_1 = arith.constant 0 : i32
    return %c0_i32, %c0_i32_0 : i32, i32
  }
  func.func @transform_20(%arg0: i32) -> (i32, i32) {
    %c0_i32 = arith.constant 0 : i32
    %c0_i32_0 = arith.constant 0 : i32
    %c0_i32_1 = arith.constant 0 : i32
    return %c0_i32, %c0_i32_0 : i32, i32
  }
  func.func @transform_21(%arg0: i32) -> (i32, i32) {
    %c0_i32 = arith.constant 0 : i32
    %c0_i32_0 = arith.constant 0 : i32
    %c0_i32_1 = arith.constant 0 : i32
    return %c0_i32, %c0_i32_0 : i32, i32
  }
  func.func @transform_22(%arg0: i32) -> (i32, i32) {
    %c0_i32 = arith.constant 0 : i32
    %c0_i32_0 = arith.constant 0 : i32
    %c0_i32_1 = arith.constant 0 : i32
    return %c0_i32, %c0_i32_0 : i32, i32
  }
  func.func @transform_23(%arg0: i32) -> (i32, i32) {
    %c0_i32 = arith.constant 0 : i32
    %c0_i32_0 = arith.constant 0 : i32
    %c0_i32_1 = arith.constant 0 : i32
    return %c0_i32, %c0_i32_0 : i32, i32
  }
  func.func @transform_24(%arg0: i32) -> (i32, i32) {
    %c0_i32 = arith.constant 0 : i32
    %c0_i32_0 = arith.constant 0 : i32
    %c0_i32_1 = arith.constant 0 : i32
    return %c0_i32, %c0_i32_0 : i32, i32
  }
  func.func @transform_25(%arg0: i32) -> (i32, i32) {
    %c0_i32 = arith.constant 0 : i32
    %c0_i32_0 = arith.constant 0 : i32
    %c0_i32_1 = arith.constant 0 : i32
    return %c0_i32, %c0_i32_0 : i32, i32
  }
  func.func @transform_26(%arg0: i32) -> (i32, i32) {
    %c0_i32 = arith.constant 0 : i32
    %c0_i32_0 = arith.constant 0 : i32
    %c0_i32_1 = arith.constant 0 : i32
    return %c0_i32, %c0_i32_0 : i32, i32
  }
  func.func @transform_27(%arg0: i32) -> (i32, i32) {
    %c0_i32 = arith.constant 0 : i32
    %c0_i32_0 = arith.constant 0 : i32
    %c0_i32_1 = arith.constant 0 : i32
    return %c0_i32, %c0_i32_0 : i32, i32
  }
  func.func @transform_28(%arg0: i32) -> (i32, i32) {
    %c0_i32 = arith.constant 0 : i32
    %c0_i32_0 = arith.constant 0 : i32
    %c0_i32_1 = arith.constant 0 : i32
    return %c0_i32, %c0_i32_0 : i32, i32
  }
}

</mosaic_0001>

<bundles_post_ra>
// kernel: forward.1
= control target key start
LH: loop header
LB: loop body
LE: loop exit
PB: predicated region body
PF: predicated region fallthrough
CT: control target
= control target key end

     0   :  { %s4816_s0 = inlined_call_operand.vmem [shape: bf16[16,128], index: 0, kind: input, shape index: {}]   ;;  %s4817_s1 = inlined_call_operand.vmem [shape: bf16[16,128], index: 1, kind: input, shape index: {}]   ;;  %s4818_s2 = inlined_call_operand.vmem [shape: bf16[128,128], index: 2, kind: input, shape index: {}]   ;;  %s4819_s3 = inlined_call_operand.vmem [shape: f32[1,128], index: 3, kind: input, shape index: {}]   ;;  %s4820_s4 = inlined_call_operand.vmem [shape: bf16[16,16], index: 4, kind: input, shape index: {}]   ;;  %s4821_s5 = inlined_call_operand.vmem [shape: bf16[128,32], index: 5, kind: input, shape index: {}]   ;;  %s4822_s6 = inlined_call_operand.vmem [shape: bf16[128,32], index: 6, kind: input, shape index: {}]   ;;  %s4823_s7 = inlined_call_operand.vmem [shape: bf16[32,32], index: 7, kind: input, shape index: {}]   ;;  %s4824_s8 = inlined_call_operand.vmem [shape: bf16[4,32], index: 8, kind: input, shape index: {}]   ;;  %s4825_s9 = inlined_call_operand.vmem [shape: bf16[32,4], index: 9, kind: input, shape index: {}]   ;;  %s4826_s10 = inlined_call_operand.vmem [shape: f32[4,32], index: 10, kind: input, shape index: {}]   ;;  %s4827_s11 = inlined_call_operand.vmem [shape: bf16[32,32], index: 11, kind: input, shape index: {}]   ;;  %s4828_s12 = inlined_call_operand.vmem [shape: bf16[32,32], index: 12, kind: input, shape index: {}]   ;;  %s4829_s13 = inlined_call_operand.vmem [shape: bf16[4,32], index: 13, kind: input, shape index: {}]   ;;  %s4830_s14 = inlined_call_operand.vmem [shape: bf16[32,4], index: 14, kind: input, shape index: {}]   ;;  %s4831_s15 = inlined_call_operand.vmem [shape: f32[4,32], index: 15, kind: input, shape index: {}]   ;;  %s4832_s16 = inlined_call_operand.vmem [shape: f32[16,32], index: 16, kind: input, shape index: {}]   ;;  %s4833_s17 = inlined_call_operand.vmem [shape: bf16[32,32], index: 17, kind: input, shape index: {}]   ;;  %s4834_s18 = inlined_call_operand.vmem [shape: f32[1,32], index: 18, kind: input, shape index: {}]   ;;  %s4835_s19 = inlined_call_operand.vmem [shape: bf16[4,32], index: 19, kind: input, shape index: {}]   ;;  %s4836_s20 = inlined_call_operand.vmem [shape: bf16[32,32], index: 20, kind: input, shape index: {}]   ;;  %s4837_s21 = inlined_call_operand.vmem [shape: f32[1,32], index: 21, kind: input, shape index: {}]   ;;  %s4838_s22 = inlined_call_operand.vmem [shape: bf16[32,1], index: 22, kind: input, shape index: {}]   ;;  %s4839_s23 = inlined_call_operand.<no memory space> [shape: f32[1,1], index: 23, kind: input, shape index: {}]   ;;  %s4840_s24 = inlined_call_operand.vmem [shape: bf16[32,128], index: 24, kind: input, shape index: {}]   ;;  %s4841_s25 = inlined_call_operand.vmem [shape: bf16[32,128], index: 25, kind: input, shape index: {}]   ;;  %s4842_s26 = inlined_call_operand.hbm [shape: f32[16,32], index: 26, kind: output, shape index: {0}]   ;;  %s4843_s27 = inlined_call_operand.vmem [shape: f32[4,1], index: 27, kind: output, shape index: {1}]   ;;  %s4844_s28 = inlined_call_operand.vmem [shape: f32[32,128], index: 28, kind: output, shape index: {2}]  }
   0x1   :  { %4855 = sst [smem:[#allocation6_spill]] %s4816_s0  ;;  %v34_v0 = vstv %s4839_s23 }
   0x2   :  { %4856 = sst [smem:[#allocation7_spill]] %s4817_s1  ;;  %35 = vst [vmem:[#allocation2] sm:$0x1] %v34_v0 }
   0x3   :  { %4857 = sst [smem:[#allocation8_spill]] %s4818_s2 }
   0x4   :  { %4858 = sst [smem:[#allocation9_spill]] %s4819_s3 }
   0x5   :  { %4859 = sst [smem:[#allocation10_spill]] %s4820_s4 }
   0x6   :  { %4860 = sst [smem:[#allocation11_spill]] %s4821_s5 }
   0x7   :  { %4861 = sst [smem:[#allocation12_spill]] %s4822_s6 }
   0x8   :  { %4862 = sst [smem:[#allocation13_spill]] %s4823_s7 }
   0x9   :  { %4863 = sst [smem:[#allocation14_spill]] %s4824_s8 }
   0xa   :  { %4864 = sst [smem:[#allocation15_spill]] %s4825_s9 }
   0xb   :  { %4865 = sst [smem:[#allocation16_spill]] %s4826_s10 }
   0xc   :  { %4866 = sst [smem:[#allocation17_spill]] %s4827_s11 }
   0xd   :  { %4867 = sst [smem:[#allocation18_spill]] %s4828_s12 }
   0xe   :  { %s4868_s3 = sld [smem:[#allocation8_spill]]  ;;  %v3630_v2 = vmov 0.0   ;;  %vm3631_vm0 = vmmov 0  }
   0xf   :  { %3113 = vmatprep.subr.bf16.mxu0 %v3630_v2  ;;  %3133 = vmatprep.subr.bf16.mxu1 %v3630_v2  ;;  %s4869_s12 = sld [smem:[#allocation12_spill]] }
  0x10   :  { %3129 = vmatprep.mubr.msk.bf16.mxu0 %vm3631_vm0, %v3630_v2  ;;  %3149 = vmatprep.mubr.msk.bf16.mxu1 %vm3631_vm0, %v3630_v2  ;;  %s4870_s9 = sld [smem:[#allocation7_spill]] }
  0x11   :  { %s4871_s0 = sld [smem:[#allocation11_spill]] }
  0x14   :  { %v3381_v1 = vld [vmem:[%s4868_s3 + $0x38] sm:$0xff]   ;;  %v3382_v3 = vld [vmem:[%s4868_s3 + $0x30] sm:$0xff]   ;;  %v3383_v4 = vld [vmem:[%s4868_s3 + $0x28] sm:$0xff]  }
  0x15   :  { %3114 = vmatpush3.bf16.msra.mxu0 %v3381_v1  ;;  %v3384_v5 = vld [vmem:[%s4868_s3 + $0x20] sm:$0xff]   ;;  %v3392_v6 = vld [vmem:[%s4869_s12 + $0x38] sm:$0xff]   ;;  %v3394_v7 = vld [vmem:[%s4869_s12 + $0x30] sm:$0xff]  }
  0x16   :  { %3115 = vmatprep.subr.bf16.mxu0 %v3630_v2  ;;  %3134 = vmatpush3.bf16.msra.mxu1 %v3392_v6  ;;  %v3385_v8 = vld [vmem:[%s4868_s3 + $0x18] sm:$0xff]   ;;  %v3396_v9 = vld [vmem:[%s4869_s12 + $0x28] sm:$0xff]   ;;  %v3386_v10 = vld [vmem:[%s4868_s3 + $0x10] sm:$0xff]  }
  0x17   :  { %3135 = vmatprep.subr.bf16.mxu1 %v3630_v2  ;;  %v3398_v11 = vld [vmem:[%s4869_s12 + $0x20] sm:$0xff]   ;;  %v3387_v12 = vld [vmem:[%s4868_s3 + $0x8] sm:$0xff]   ;;  %v3400_v13 = vld [vmem:[%s4869_s12 + $0x18] sm:$0xff]  }
  0x18   :  { %v3388_v14 = vld [vmem:[%s4868_s3] sm:$0xff]   ;;  %v3402_v16 = vld [vmem:[%s4869_s12 + $0x10] sm:$0xff]   ;;  %v3390_v17 = vld [vmem:[%s4871_s0 + $0x38] sm:$0xff]  }
  0x19   :  { %3116 = vmatpush3.bf16.msra.mxu0 %v3382_v3  ;;  %v3389_v15 = vld [vmem:[%s4870_s9] sm:$0xff]   ;;  %v3391_v18 = vld [vmem:[%s4871_s0 + $0x30] sm:$0xff]   ;;  %v3393_v19 = vld [vmem:[%s4871_s0 + $0x28] sm:$0xff]  }
  0x1a   :  { %3117 = vmatprep.subr.bf16.mxu0 %v3630_v2  ;;  %3136 = vmatpush3.bf16.msra.mxu1 %v3394_v7  ;;  %v3395_v20 = vld [vmem:[%s4871_s0 + $0x20] sm:$0xff]  }
  0x1b   :  { %3137 = vmatprep.subr.bf16.mxu1 %v3630_v2 }
  0x1d   :  { %3118 = vmatpush3.bf16.msra.mxu0 %v3383_v4 }
  0x1e   :  { %3119 = vmatprep.subr.bf16.mxu0 %v3630_v2  ;;  %3138 = vmatpush3.bf16.msra.mxu1 %v3396_v9 }
  0x1f   :  { %3139 = vmatprep.subr.bf16.mxu1 %v3630_v2 }
  0x21   :  { %3120 = vmatpush3.bf16.msra.mxu0 %v3384_v5 }
  0x22   :  { %3121 = vmatprep.subr.bf16.mxu0 %v3630_v2  ;;  %3140 = vmatpush3.bf16.msra.mxu1 %v3398_v11 }
  0x23   :  { %3141 = vmatprep.subr.bf16.mxu1 %v3630_v2 }
  0x25   :  { %3122 = vmatpush3.bf16.msra.mxu0 %v3385_v8 }
  0x26   :  { %3123 = vmatprep.subr.bf16.mxu0 %v3630_v2  ;;  %3142 = vmatpush3.bf16.msra.mxu1 %v3400_v13 }
  0x27   :  { %3143 = vmatprep.subr.bf16.mxu1 %v3630_v2 }
  0x29   :  { %3124 = vmatpush3.bf16.msra.mxu0 %v3386_v10 }
  0x2a   :  { %3125 = vmatprep.subr.bf16.mxu0 %v3630_v2  ;;  %3144 = vmatpush3.bf16.msra.mxu1 %v3402_v16 }
  0x2b   :  { %3145 = vmatprep.subr.bf16.mxu1 %v3630_v2 }
  0x2d   :  { %3126 = vmatpush3.bf16.msra.mxu0 %v3387_v12 }
  0x2e   :  { %3127 = vmatprep.subr.bf16.mxu0 %v3630_v2 }
  0x31   :  { %3128 = vmatpush3.bf16.msra.mxu0 %v3388_v14 }
  0x32   :  { %3153 = vmatprep.subr.bf16.mxu0 %v3630_v2 }
  0x34   :  { %3130 = vmatmul.mubr.bf16.vlgmr.msra.gmra.mxu0 %v3389_v15 }
  0x35   :  { %3154 = vmatpush3.bf16.msra.mxu0 %v3390_v17  ;;  %3169 = vmatprep.mubr.msk.bf16.mxu0 %vm3631_vm0, %v3630_v2 }
  0x36   :  { %3155 = vmatprep.subr.bf16.mxu0 %v3630_v2 }
  0x39   :  { %3156 = vmatpush3.bf16.msra.mxu0 %v3391_v18 }
  0x3a   :  { %3157 = vmatprep.subr.bf16.mxu0 %v3630_v2 }
  0x3d   :  { %3158 = vmatpush3.bf16.msra.mxu0 %v3393_v19 }
  0x3e   :  { %3159 = vmatprep.subr.bf16.mxu0 %v3630_v2 }
  0x3f   :  { %36 = vsyncpa [#allocation4], 0  ;;  %v3397_v21 = vld [vmem:[%s4871_s0 + $0x18] sm:$0xff]   ;;  %v3399_v22 = vld [vmem:[%s4871_s0 + $0x10] sm:$0xff]   ;;  %s4872_s4 = sld [smem:[#allocation6_spill]]  ;;  %vm446_vm1 = vcmask 130048   ;;  %v668_v18 = vlaneseq }
  0x40   :  { %v3401_v23 = vld [vmem:[%s4871_s0 + $0x8] sm:$0xff]   ;;  %v3403_v24 = vld [vmem:[%s4871_s0] sm:$0xff]   ;;  %s4873_s30 = sld [smem:[#allocation9_spill]]  ;;  %vm508_vm2 = vcmask 261120   ;;  %v3632_v62 = vmov 1   ;;  %v3633_v63 = vmov 0  }
  0x41   :  { %3160 = vmatpush3.bf16.msra.mxu0 %v3395_v20  ;;  %v3404_v25 = vld [vmem:[%s4869_s12 + $0x8] sm:$0xff]   ;;  %v3406_v27 = vld [vmem:[%s4869_s12] sm:$0xff]   ;;  %s4874_s10 = sld [smem:[#allocation10_spill]]  ;;  %3367 = vset.pattern.permute.xlu1 %v3632_v62  ;;  %v3634_v13 = vmov 2   ;;  %v3635_v16 = vmov 3   ;;  %v3986_v19 = vshrl.u32 %v668_v18, 7 }
  0x42   :  { %3161 = vmatprep.subr.bf16.mxu0 %v3630_v2  ;;  %3146 = vmatpush3.bf16.msra.mxu1 %v3404_v25  ;;  %s4875_s7 = sld [smem:[#allocation13_spill]]  ;;  %s3637_s1 = smov 104   ;;  %vm1056_vm15 = vcmask 64512  }
  0x43   :  { %3147 = vmatprep.subr.bf16.mxu1 %v3630_v2  ;;  %s4876_s0 = sld [smem:[#allocation16_spill]]  ;;  %3366 = vset.pattern.permute.xlu0 %v3633_v63  ;;  %v765_v20 = vsub.s32 1, %v3986_v19  ;;  %s3639_s8 = smov 8  }
  0x44   :  { %s4877_s6 = sld [smem:[#allocation15_spill]]  ;;  %s3640_s5 = smov 16  }
  0x45   :  { %3162 = vmatpush3.bf16.msra.mxu0 %v3397_v21  ;;  %v3405_v26 = vld [vmem:[%s4872_s4] sm:$0xff]   ;;  %s4878_s2 = sld [smem:[#allocation14_spill]]  ;;  %v670_v21 = vsub.s32 0, %v3986_v19  ;;  %s3638_s4 = smov 112  }
  0x46   :  { %3163 = vmatprep.subr.bf16.mxu0 %v3630_v2  ;;  %3148 = vmatpush3.bf16.msra.mxu1 %v3406_v27  ;;  %v2929_v29 = vld [vmem:[%s4873_s30] ss:$0 sm:$0xff]  ;;  %s3641_s9 = smov 24   ;;  %s4883_s11 = sld [smem:[#allocation17_spill]] }
  0x47   :  { %3173 = vmatprep.subr.bf16.mxu1 %v3630_v2  ;;  %v3915_v45 = vld [vmem:[%s4874_s10] sm:$0xf]  ;;  %v3920_v46 = vld [vmem:[%s4874_s10 + $0x4] sm:$0xf]  ;;  %s4884_s29 = sld [smem:[#allocation18_spill]] }
  0x48   :  { %v3924_v49 = vcombine.low %v3915_v45, %v3920_v46  ;;  %v3408_v50 = vld [vmem:[%s4875_s7 + $0x8] sm:$0xff]   ;;  %v3409_v51 = vld [vmem:[%s4875_s7] sm:$0xff]   ;;  %vm94_vm3 = vcmp.gt.bf16.partialorder %v3915_v45, 0  ;;  %vm95_vm4 = vcmp.gt.bf16.partialorder %v3920_v46, 0  ;;  %s3636_s7 = smov 120  }
  0x49   :  { %3164 = vmatpush3.bf16.msra.mxu0 %v3399_v22  ;;  %v2956_v53 = vld [vmem:[%s4876_s0] ss:$0 sm:$0xff]  ;;  %v680_v22 = vsel %vm94_vm3, 65537, %v3633_v63  ;;  %vm1061_vm3 = vcmask 195584  }
  0x4a   :  { %3165 = vmatprep.subr.bf16.mxu0 %v3630_v2  ;;  %v3410_v60 = vld [vmem:[%s4877_s6 + $0x8] sm:$0xff]   ;;  %v3411_v61 = vld [vmem:[%s4877_s6] sm:$0xff]   ;;  %v682_v25 = vunpack.c.l.b16 %v680_v22 }
  0x4b   :  { %v614_v7 = vld [vmem:[%s4878_s2] sm:$0x3] }
  0x4c   :  { %vm4000_vm5 = vcmp.ne.s32.totalorder %v682_v25, 0 }
  0x4d   :  { %3166 = vmatpush3.bf16.msra.mxu0 %v3401_v23 }
  0x4e   :  { %3167 = vmatprep.subr.bf16.mxu0 %v3630_v2 }
  0x51   :  { %3168 = vmatpush3.bf16.msra.mxu0 %v3403_v24 }
  0x52   :  { %3201 = vmatprep.subr.bf16.mxu0 %v3630_v2 }
  0x54   :  { %3170 = vmatmul.mubr.bf16.vlgmr.msra.gmra.mxu0 %v3405_v26  ;;  %v681_v26 = vsel %vm95_vm4, 65537, %v3633_v63 }
  0x55   :  { %3203 = vmatprep.mubr.msk.bf16.mxu0 %vm3631_vm0, %v3630_v2 }
  0xf4   :  { %v209_v28 = vpop.f32.mrf.mxu0 }
  0xf5   :  { %v210_v32 = vadd.f32 %v2929_v29, %v209_v28 }
  0xf6   :  { %v3131_v30 = vpop.f32.mrf.mxu0 }
  0xf8   :  { %v212_v31 = vpop.f32.mrf.mxu0 }
  0xf9   :  { %v213_v33 = vadd.f32 %v2929_v29, %v212_v31  ;;  %v683_v31 = vunpack.c.l.b16 %v681_v26 }
  0xfa   :  { %v3132_v34 = vpop.f32.mrf.mxu0 }
  0xfb   :  { %v234_v35 = vpack.c.bf16 %v213_v33, %v210_v32  ;;  %vm4005_vm8 = vcmp.ne.s32.totalorder %v683_v31, 0 }
  0xfd   :  { %3150 = vmatmul.mubr.bf16.vlgmr.msra.gmra.mxu1 %v234_v35 }
  0xfe   :  { %3175 = vmatprep.mubr.msk.bf16.mxu1 %vm3631_vm0, %v3630_v2 }
 0x114   :  { %v428_v36 = vpop.f32.mrf.mxu0 }
 0x116   :  { %v3171_v37 = vpop.f32.mrf.mxu0 }
 0x117   :  { %v858_v37 = vsub.s32 2, %v3986_v19 }
 0x118   :  { %v431_v38 = vpop.f32.mrf.mxu0 }
 0x11a   :  { %v3172_v39 = vpop.f32.mrf.mxu0 }
 0x1bd   :  { %v333_v40 = vpop.f32.mrf.mxu1 }
 0x1be   :  { %v429_v43 = vadd.f32 %v428_v36, %v333_v40 }
 0x1bf   :  { %v3151_v41 = vpop.f32.mrf.mxu1 }
 0x1c1   :  { %v336_v42 = vpop.f32.mrf.mxu1 }
 0x1c2   :  { %v432_v44 = vadd.f32 %v431_v38, %v336_v42 }
 0x1c3   :  { %v3152_v47 = vpop.f32.mrf.mxu1 }
 0x1c4   :  { %v435_v48 = vpack.c.bf16 %v432_v44, %v429_v43 }
 0x1c6   :  { %3174 = vmatpush3.bf16.msra.mxu1 %v435_v48 }
 0x1c7   :  { %3179 = vmatprep.subr.bf16.mxu1 %v3630_v2 }
 0x1c9   :  { %3176 = vmatmul.mubr.msk.bf16.vlgmr.msra.gmra.mxu1 %vm446_vm1, %v3924_v49 }
 0x1ca   :  { %3183 = vmatprep.mubr.msk.bf16.mxu1 %vm3631_vm0, %v3630_v2  ;;  %3180 = vmatpush3.bf16.msra.mxu1 %v3408_v50 }
 0x1cb   :  { %3181 = vmatprep.subr.bf16.mxu1 %v3630_v2 }
 0x1ce   :  { %3182 = vmatpush3.bf16.msra.mxu1 %v3409_v51 }
 0x1cf   :  { %3187 = vmatprep.subr.bf16.mxu1 %v3630_v2 }
 0x289   :  { %v484_v52 = vpop.f32.mrf.mxu1 }
 0x28a   :  { %v3942_v56 = vadd.f32 %v2956_v53, %v484_v52 }
 0x28b   :  { %v3177_v54 = vpop.f32.mrf.mxu1 }
 0x28d   :  { %v487_v55 = vpop.f32.mrf.mxu1 }
 0x28e   :  { %v3944_v57 = vadd.f32 %v2956_v53, %v487_v55  ;;  %v950_v53 = vsub.s32 3, %v3986_v19 }
 0x28f   :  { %v3178_v58 = vpop.f32.mrf.mxu1 }
 0x290   :  { %v491_v59 = vpack.c.bf16 %v3944_v57, %v3942_v56 }
 0x292   :  { %3184 = vmatmul.mubr.msk.bf16.vlgmr.msra.gmra.mxu1 %vm508_vm2, %v491_v59 }
 0x293   :  { %3191 = vmatprep.mubr.msk.bf16.mxu1 %vm3631_vm0, %v3630_v2  ;;  %3188 = vmatpush3.bf16.msra.mxu1 %v3410_v60 }
 0x294   :  { %3189 = vmatprep.subr.bf16.mxu1 %v3630_v2 }
 0x297   :  { %3190 = vmatpush3.bf16.msra.mxu1 %v3411_v61 }
 0x298   :  { %3195 = vmatprep.subr.bf16.mxu1 %v3630_v2 }
 0x352   :  { %v546_v0 = vpop.f32.mrf.mxu1 }
 0x354   :  { %v3185_v1 = vpop.f32.mrf.mxu1 }
 0x356   :  { %v549_v3 = vpop.f32.mrf.mxu1 }
 0x357   :  { %v3961_v4 = vpack.c.bf16 %v549_v3, %v546_v0 }
 0x358   :  { %v3186_v5 = vpop.f32.mrf.mxu1 }
 0x359   :  { %3192 = vmatmul.mubr.msk.bf16.vlgmr.msra.gmra.mxu1 %vm508_vm2, %v3961_v4  ;;  %3202 = vmatpush3.bf16.msra.mxu0 %v3961_v4  ;;  %v571_v6 = vsel %vm508_vm2, %v3961_v4, 0 }
 0x35a   :  { %3196 = vmatpush3.bf16.xpose.msra.mxu1 %v571_v6  ;;  %3197 = vmatprep.mubr.msk.bf16.mxu1 %vm3631_vm0, %v3630_v2 }
 0x35b   :  { %3207 = vmatprep.subr.bf16.mxu1 %v3630_v2  ;;  %3213 = vmatprep.subr.bf16.mxu0 %v3630_v2 }
 0x361   :  { %3198 = vmatmul.mubr.msk.bf16.vlgmr.msra.gmra.mxu1 %vm508_vm2, %v614_v7 }
 0x362   :  { %3209 = vmatprep.mubr.msk.bf16.mxu1 %vm3631_vm0, %v3630_v2 }
 0x419   :  { %v607_v8 = vpop.f32.mrf.mxu1 }
 0x41a   :  { %756 = vperm.xlu1 %3367, %v607_v8   ;;  %660 = vperm.xlu0 %3366, %v607_v8  }
 0x41b   :  { %v3193_v9 = vpop.f32.mrf.mxu1 }
 0x41d   :  { %v610_v10 = vpop.f32.mrf.mxu1 }
 0x41e   :  { %760 = vperm.xlu1 %3367, %v610_v10   ;;  %665 = vperm.xlu0 %3366, %v610_v10  }
 0x41f   :  { %v3194_v11 = vpop.f32.mrf.mxu1 }
 0x421   :  { %v3978_v12 = vpop.f32.mrf.mxu1 }
 0x422   :  { %3369 = vset.pattern.permute.xlu1 %v3634_v13  ;;  %3368 = vset.pattern.permute.xlu0 %v3634_v13  ;;  %v766_v23 = vrot.slane %v3978_v12, %v765_v20  ;;  %v671_v24 = vrot.slane %v3978_v12, %v670_v21  ;;  %v859_v47 = vrot.slane %v3978_v12, %v858_v37 }
 0x423   :  { %853 = vperm.xlu1 %3369, %v610_v10   ;;  %849 = vperm.xlu0 %3368, %v607_v8   ;;  %v3199_v14 = vpop.f32.mrf.mxu1  ;;  %v951_v5 = vrot.slane %v3978_v12, %v950_v53 }
 0x425   :  { %v655_v15 = vpop.f32.mrf.mxu1 }
 0x427   :  { %3370 = vset.pattern.permute.xlu1 %v3635_v16  ;;  %3371 = vset.pattern.permute.xlu0 %v3635_v16  ;;  %v3200_v17 = vpop.f32.mrf.mxu1 }
 0x428   :  { %941 = vperm.xlu1 %3370, %v607_v8   ;;  %945 = vperm.xlu0 %3371, %v610_v10  }
 0x42c   :  { %3373 = vset.pattern.permute.xlu1 %v3632_v62  ;;  %3372 = vset.pattern.permute.xlu0 %v3633_v63 }
 0x495   :  { %v757_v27 = vpop.permute.xlu1 %756  ;;  %v661_v28 = vpop.permute.xlu0 %660 }
 0x496   :  { %v767_v29 = vadd.f32 %v766_v23, %v757_v27  ;;  %v672_v30 = vadd.f32 %v671_v24, %v661_v28 }
 0x498   :  { %v771_v33 = vmul.f32 0.2, %v767_v29  ;;  %v676_v34 = vmul.f32 0.2, %v672_v30  ;;  %vm674_vm6 = vcmp.gt.f32.partialorder %v672_v30, 0.0  ;;  %vm769_vm7 = vcmp.gt.f32.partialorder %v767_v29, 0.0 }
 0x499   :  { %v761_v35 = vpop.permute.xlu1 %760  ;;  %v666_v36 = vpop.permute.xlu0 %665 }
 0x49a   :  { %v768_v38 = vadd.f32 %v766_v23, %v761_v35  ;;  %v673_v39 = vadd.f32 %v671_v24, %v666_v36  ;;  %v678_v40 = vsel %vm674_vm6, %v672_v30, %v676_v34  ;;  %v773_v41 = vsel %vm769_vm7, %v767_v29, %v771_v33 }
 0x49b   :  { %v686_v43 = vsel %vm4000_vm5, %v678_v40, -1e+30  ;;  %v775_v48 = vsel %vm4000_vm5, %v773_v41, -1e+30 }
 0x49c   :  { %v772_v44 = vmul.f32 0.2, %v768_v38  ;;  %v677_v45 = vmul.f32 0.2, %v673_v39  ;;  %v688_v46 = vsel %vm446_vm1, %v686_v43, -inf  ;;  %vm675_vm9 = vcmp.gt.f32.partialorder %v673_v39, 0.0 }
 0x49d   :  { %689 = vmax.xlane.f32.xlu1 %v688_v46  ;;  %vm770_vm10 = vcmp.gt.f32.partialorder %v768_v38, 0.0  ;;  %v777_v61 = vsel %vm446_vm1, %v775_v48, -inf }
 0x49e   :  { %v854_v50 = vpop.permute.xlu1 %853  ;;  %v850_v51 = vpop.permute.xlu0 %849  ;;  %v679_v52 = vsel %vm675_vm9, %v673_v39, %v677_v45  ;;  %v774_v54 = vsel %vm770_vm10, %v768_v38, %v772_v44 }
 0x49f   :  { %v861_v55 = vadd.f32 %v859_v47, %v854_v50  ;;  %v860_v58 = vadd.f32 %v859_v47, %v850_v51  ;;  %v687_v59 = vsel %vm4005_vm8, %v679_v52, -1e+30  ;;  %v776_v0 = vsel %vm4005_vm8, %v774_v54, -1e+30 }
 0x4a0   :  { %v691_v60 = vsel %vm446_vm1, %v687_v59, -inf  ;;  %v780_v14 = vsel %vm446_vm1, %v776_v0, -inf }
 0x4a1   :  { %v865_v1 = vmul.f32 0.2, %v861_v55  ;;  %v864_v3 = vmul.f32 0.2, %v860_v58  ;;  %692 = vmax.xlane.f32.xlu0 %v691_v60  ;;  %778 = vmax.xlane.f32.xlu1 %v777_v61  ;;  %vm862_vm11 = vcmp.gt.f32.partialorder %v860_v58, 0.0  ;;  %vm863_vm12 = vcmp.gt.f32.partialorder %v861_v55, 0.0 }
 0x4a3   :  { %v942_v6 = vpop.permute.xlu1 %941  ;;  %v946_v7 = vpop.permute.xlu0 %945  ;;  %v866_v8 = vsel %vm862_vm11, %v860_v58, %v864_v3  ;;  %v867_v9 = vsel %vm863_vm12, %v861_v55, %v865_v1 }
 0x4a4   :  { %v952_v10 = vadd.f32 %v951_v5, %v942_v6  ;;  %v953_v11 = vadd.f32 %v951_v5, %v946_v7  ;;  %v868_v15 = vsel %vm4000_vm5, %v866_v8, -1e+30  ;;  %v869_v18 = vsel %vm4005_vm8, %v867_v9, -1e+30 }
 0x4a5   :  { %781 = vmax.xlane.f32.xlu0 %v780_v14  ;;  %v870_v17 = vsel %vm446_vm1, %v868_v15, -inf  ;;  %v873_v12 = vsel %vm446_vm1, %v869_v18, -inf }
 0x4a6   :  { %v956_v22 = vmul.f32 0.2, %v952_v10  ;;  %v957_v23 = vmul.f32 0.2, %v953_v11  ;;  %871 = vmax.xlane.f32.xlu1 %v870_v17  ;;  %vm954_vm13 = vcmp.gt.f32.partialorder %v952_v10, 0.0  ;;  %vm955_vm14 = vcmp.gt.f32.partialorder %v953_v11, 0.0 }
 0x4a8   :  { %v958_v24 = vsel %vm954_vm13, %v952_v10, %v956_v22  ;;  %v959_v25 = vsel %vm955_vm14, %v953_v11, %v957_v23 }
 0x4a9   :  { %874 = vmax.xlane.f32.xlu0 %v873_v12  ;;  %v960_v26 = vsel %vm4000_vm5, %v958_v24, -1e+30  ;;  %v961_v27 = vsel %vm4005_vm8, %v959_v25, -1e+30 }
 0x4aa   :  { %v962_v28 = vsel %vm446_vm1, %v960_v26, -inf  ;;  %v965_v29 = vsel %vm446_vm1, %v961_v27, -inf }
 0x4ab   :  { %963 = vmax.xlane.f32.xlu1 %v962_v28 }
 0x4ad   :  { %966 = vmax.xlane.f32.xlu0 %v965_v29 }
 0x4bc   :  { %801 = vrot.lane.b32.xlu1 %v3961_v4, %s3636_s7 }
 0x526   :  { %v690_v30 = vpop.xlane.xlu1 %689 }
 0x527   :  { %v694_v31 = vsub.f32 %v686_v43, %v690_v30 }
 0x529   :  { %v696_v33 = vmul.f32 1.442695, %v694_v31 }
 0x52a   :  { %v693_v34 = vpop.xlane.xlu0 %692  ;;  %v779_v35 = vpop.xlane.xlu1 %778 }
 0x52b   :  { %3436 = vpow2.f32 %v696_v33  ;;  %v695_v36 = vsub.f32 %v687_v59, %v693_v34  ;;  %v783_v38 = vsub.f32 %v775_v48, %v779_v35 }
 0x52d   :  { %v698_v39 = vmul.f32 1.442695, %v695_v36  ;;  %v785_v40 = vmul.f32 1.442695, %v783_v38 }
 0x52e   :  { %v782_v41 = vpop.xlane.xlu0 %781 }
 0x52f   :  { %3438 = vpow2.f32 %v698_v39  ;;  %v784_v44 = vsub.f32 %v776_v0, %v782_v41  ;;  %v872_v45 = vpop.xlane.xlu1 %871 }
 0x530   :  { %3440 = vpow2.f32 %v785_v40  ;;  %v876_v46 = vsub.f32 %v868_v15, %v872_v45 }
 0x531   :  { %v787_v47 = vmul.f32 1.442695, %v784_v44 }
 0x532   :  { %v878_v50 = vmul.f32 1.442695, %v876_v46  ;;  %v875_v51 = vpop.xlane.xlu0 %874 }
 0x533   :  { %3442 = vpow2.f32 %v787_v47  ;;  %v877_v52 = vsub.f32 %v869_v18, %v875_v51 }
 0x534   :  { %3444 = vpow2.f32 %v878_v50  ;;  %v964_v43 = vpop.xlane.xlu1 %963 }
 0x535   :  { %v880_v54 = vmul.f32 1.442695, %v877_v52  ;;  %v968_v55 = vsub.f32 %v960_v26, %v964_v43 }
 0x536   :  { %v967_v58 = vpop.xlane.xlu0 %966 }
 0x537   :  { %3446 = vpow2.f32 %v880_v54  ;;  %v970_v48 = vmul.f32 1.442695, %v968_v55  ;;  %v969_v59 = vsub.f32 %v961_v27, %v967_v58 }
 0x538   :  { %v3437_v60 = vpop.eup %3436  ;;  %v802_v61 = vpop.permute.xlu1 %801 }
 0x539   :  { %3448 = vpow2.f32 %v970_v48  ;;  %v972_v0 = vmul.f32 1.442695, %v969_v59  ;;  %3208 = vmatpush3.bf16.msra.mxu1 %v802_v61  ;;  %v700_v1 = vsel %vm446_vm1, %v3437_v60, 0.0 }
 0x53a   :  { %701 = vadd.xlane.f32.xlu1 %v700_v1  ;;  %3219 = vmatprep.subr.bf16.mxu1 %v3630_v2 }
 0x53b   :  { %3450 = vpow2.f32 %v972_v0 }
 0x53c   :  { %v3439_v3 = vpop.eup %3438 }
 0x53d   :  { %v3441_v5 = vpop.eup %3440  ;;  %v703_v6 = vsel %vm446_vm1, %v3439_v3, 0.0 }
 0x53e   :  { %704 = vadd.xlane.f32.xlu0 %v703_v6  ;;  %v789_v7 = vsel %vm446_vm1, %v3441_v5, 0.0 }
 0x53f   :  { %790 = vadd.xlane.f32.xlu1 %v789_v7 }
 0x540   :  { %v3443_v8 = vpop.eup %3442 }
 0x541   :  { %v3445_v9 = vpop.eup %3444  ;;  %v792_v10 = vsel %vm446_vm1, %v3443_v8, 0.0 }
 0x542   :  { %793 = vadd.xlane.f32.xlu0 %v792_v10  ;;  %v882_v11 = vsel %vm446_vm1, %v3445_v9, 0.0 }
 0x543   :  { %883 = vadd.xlane.f32.xlu1 %v882_v11 }
 0x544   :  { %v3447_v14 = vpop.eup %3446 }
 0x545   :  { %v885_v15 = vsel %vm446_vm1, %v3447_v14, 0.0 }
 0x546   :  { %v3449_v17 = vpop.eup %3448  ;;  %886 = vadd.xlane.f32.xlu0 %v885_v15 }
 0x547   :  { %v974_v18 = vsel %vm446_vm1, %v3449_v17, 0.0 }
 0x548   :  { %v3451_v22 = vpop.eup %3450  ;;  %975 = vadd.xlane.f32.xlu1 %v974_v18 }
 0x549   :  { %v977_v23 = vsel %vm446_vm1, %v3451_v22, 0.0 }
 0x54a   :  { %978 = vadd.xlane.f32.xlu0 %v977_v23 }
 0x559   :  { %985 = vrot.lane.b32.xlu1 %v3961_v4, %s3637_s1 }
 0x560   :  { %893 = vrot.lane.b32.xlu0 %v3961_v4, %s3638_s4 }
 0x5c3   :  { %v702_v12 = vpop.xlane.xlu1 %701 }
 0x5c4   :  { %3452 = vrcp.f32 %v702_v12 }
 0x5c7   :  { %v705_v24 = vpop.xlane.xlu0 %704 }
 0x5c8   :  { %3454 = vrcp.f32 %v705_v24  ;;  %v791_v25 = vpop.xlane.xlu1 %790  ;;  %v2970_v24 = vld [vmem:[%s4876_s0 + $0x1] ss:$0 sm:$0xff] }
 0x5c9   :  { %3456 = vrcp.f32 %v791_v25 }
 0x5cb   :  { %v794_v26 = vpop.xlane.xlu0 %793 }
 0x5cc   :  { %3458 = vrcp.f32 %v794_v26  ;;  %v884_v27 = vpop.xlane.xlu1 %883 }
 0x5cd   :  { %3460 = vrcp.f32 %v884_v27 }
 0x5cf   :  { %v887_v28 = vpop.xlane.xlu0 %886 }
 0x5d0   :  { %3462 = vrcp.f32 %v887_v28 }
 0x5d1   :  { %v976_v29 = vpop.xlane.xlu1 %975  ;;  %v3453_v30 = vpop.eup %3452 }
 0x5d2   :  { %3464 = vrcp.f32 %v976_v29  ;;  %v708_v34 = vmul.f32 %v3453_v30, %v3437_v60 }
 0x5d3   :  { %v979_v31 = vpop.xlane.xlu0 %978 }
 0x5d4   :  { %3466 = vrcp.f32 %v979_v31 }
 0x5d5   :  { %v3455_v33 = vpop.eup %3454  ;;  %v986_v47 = vpop.permute.xlu1 %985 }
 0x5d6   :  { %v709_v4 = vmul.f32 %v3455_v33, %v3439_v3  ;;  %v3457_v35 = vpop.eup %3456 }
 0x5d7   :  { %v894_v39 = vpop.permute.xlu0 %893  ;;  %v797_v40 = vmul.f32 %v3457_v35, %v3441_v5 }
 0x5d8   :  { %v710_v36 = vpack.c.bf16 %v709_v4, %v708_v34 }
 0x5d9   :  { %v3459_v38 = vpop.eup %3458 }
 0x5da   :  { %3204 = vmatmul.mubr.msk.bf16.vlgmr.msra.gmra.mxu0 %vm446_vm1, %v710_v36  ;;  %v798_v41 = vmul.f32 %v3459_v38, %v3443_v8  ;;  %v3461_v44 = vpop.eup %3460 }
 0x5db   :  { %3214 = vmatpush3.bf16.msra.mxu0 %v894_v39  ;;  %3215 = vmatprep.mubr.msk.bf16.mxu0 %vm3631_vm0, %v3630_v2  ;;  %v890_v50 = vmul.f32 %v3461_v44, %v3445_v9 }
 0x5dc   :  { %v799_v45 = vpack.c.bf16 %v798_v41, %v797_v40  ;;  %3225 = vmatprep.subr.bf16.mxu0 %v3630_v2 }
 0x5dd   :  { %v3463_v46 = vpop.eup %3462 }
 0x5de   :  { %3210 = vmatmul.mubr.msk.bf16.vlgmr.msra.gmra.mxu1 %vm446_vm1, %v799_v45  ;;  %v891_v51 = vmul.f32 %v3463_v46, %v3447_v14 }
 0x5df   :  { %v3465_v52 = vpop.eup %3464  ;;  %3220 = vmatpush3.bf16.msra.mxu1 %v986_v47  ;;  %3221 = vmatprep.mubr.msk.bf16.mxu1 %vm3631_vm0, %v3630_v2 }
 0x5e0   :  { %v892_v43 = vpack.c.bf16 %v891_v51, %v890_v50  ;;  %3233 = vmatprep.subr.bf16.mxu1 %v3630_v2  ;;  %v982_v55 = vmul.f32 %v3465_v52, %v3449_v17 }
 0x5e1   :  { %v3467_v54 = vpop.eup %3466 }
 0x5e2   :  { %3216 = vmatmul.mubr.msk.bf16.vlgmr.msra.gmra.mxu0 %vm446_vm1, %v892_v43  ;;  %v983_v58 = vmul.f32 %v3467_v54, %v3451_v22  ;;  %v3413_v43 = vld [vmem:[%s4883_s11] sm:$0xff]  }
 0x5e3   :  { %3229 = vmatprep.mubr.msk.bf16.mxu0 %vm3631_vm0, %v3630_v2 }
 0x5e4   :  { %v984_v48 = vpack.c.bf16 %v983_v58, %v982_v55 }
 0x5e6   :  { %3222 = vmatmul.mubr.msk.bf16.vlgmr.msra.gmra.mxu1 %vm446_vm1, %v984_v48 }
 0x5e7   :  { %3235 = vmatprep.mubr.msk.bf16.mxu1 %vm3631_vm0, %v3630_v2 }
 0x69a   :  { %v748_v59 = vpop.f32.mrf.mxu0 }
 0x69c   :  { %v3205_v60 = vpop.f32.mrf.mxu0 }
 0x69e   :  { %v751_v61 = vpop.f32.mrf.mxu0  ;;  %v841_v0 = vpop.f32.mrf.mxu1 }
 0x69f   :  { %1034 = vrot.lane.b32.xlu1 %v841_v0, %s3639_s8  ;;  %v2971_v0 = vld [vmem:[%s4876_s0 + $0x2] ss:$0 sm:$0xff] }
 0x6a0   :  { %v3206_v1 = vpop.f32.mrf.mxu0  ;;  %v3211_v3 = vpop.f32.mrf.mxu1 }
 0x6a2   :  { %v844_v5 = vpop.f32.mrf.mxu1  ;;  %v933_v6 = vpop.f32.mrf.mxu0 }
 0x6a3   :  { %1036 = vrot.lane.b32.xlu0 %v844_v5, %s3639_s8  ;;  %1042 = vrot.lane.b32.xlu1 %v933_v6, %s3640_s5  ;;  %v2972_v6 = vld [vmem:[%s4876_s0 + $0x3] ss:$0 sm:$0xff] }
 0x6a4   :  { %v3212_v7 = vpop.f32.mrf.mxu1  ;;  %v3217_v8 = vpop.f32.mrf.mxu0 }
 0x6a6   :  { %v936_v9 = vpop.f32.mrf.mxu0  ;;  %v1025_v10 = vpop.f32.mrf.mxu1 }
 0x6a7   :  { %1044 = vrot.lane.b32.xlu0 %v936_v9, %s3640_s5  ;;  %1050 = vrot.lane.b32.xlu1 %v1025_v10, %s3641_s9 }
 0x6a8   :  { %v3218_v11 = vpop.f32.mrf.mxu0  ;;  %v3223_v14 = vpop.f32.mrf.mxu1 }
 0x6aa   :  { %v1028_v15 = vpop.f32.mrf.mxu1 }
 0x6ab   :  { %1052 = vrot.lane.b32.xlu0 %v1028_v15, %s3641_s9 }
 0x6ac   :  { %v3224_v17 = vpop.f32.mrf.mxu1 }
 0x711   :  { %v1035_v18 = vpop.permute.xlu1 %1034 }
 0x712   :  { %v1057_v12 = vsel %vm1056_vm15, %v748_v59, %v1035_v18 }
 0x715   :  { %v1037_v22 = vpop.permute.xlu0 %1036  ;;  %v1043_v23 = vpop.permute.xlu1 %1042 }
 0x716   :  { %v1059_v25 = vsel %vm446_vm1, %v1057_v12, %v1043_v23  ;;  %v1058_v30 = vsel %vm1056_vm15, %v751_v61, %v1037_v22 }
 0x719   :  { %v1045_v26 = vpop.permute.xlu0 %1044  ;;  %v1051_v27 = vpop.permute.xlu1 %1050 }
 0x71a   :  { %v1062_v28 = vsel %vm1061_vm3, %v1059_v25, %v1051_v27  ;;  %v1060_v31 = vsel %vm446_vm1, %v1058_v30, %v1045_v26  ;;  %v3415_v25 = vld [vmem:[%s4884_s29] sm:$0xff]  }
 0x71b   :  { %v1069_v29 = vadd.f32 %v2970_v24, %v1062_v28  ;;  %v2976_v27 = vld [vmem:[%s4831_s15] ss:$0 sm:$0xff] }
 0x71d   :  { %v1053_v33 = vpop.permute.xlu0 %1052  ;;  %v1071_v34 = vadd.f32 %v1069_v29, %v3942_v56 }
 0x71e   :  { %v1063_v4 = vsel %vm1061_vm3, %v1060_v31, %v1053_v33 }
 0x71f   :  { %v1070_v35 = vadd.f32 %v2970_v24, %v1063_v4  ;;  %v1073_v36 = vsel %vm508_vm2, %v1071_v34, 0.0  ;;  %v3414_v24 = vld [vmem:[%s4884_s29 + $0x8] sm:$0xff]   ;;  %v3417_v4 = vld [vmem:[%s4830_s14] sm:$0xff]   ;;  %s3643_s29 = smov 64  }
 0x720   :  { %1074 = vadd.xlane.f32.xlu1 %v1073_v36 }
 0x721   :  { %v1072_v38 = vadd.f32 %v1070_v35, %v3944_v57  ;;  %v3412_v57 = vld [vmem:[%s4883_s11 + $0x8] sm:$0xff]  }
 0x722   :  { %3226 = vmatpush3.bf16.msra.mxu0 %v3412_v57 }
 0x723   :  { %v1076_v39 = vsel %vm508_vm2, %v1072_v38, 0.0  ;;  %3227 = vmatprep.subr.bf16.mxu0 %v3630_v2 }
 0x724   :  { %1077 = vadd.xlane.f32.xlu0 %v1076_v39 }
 0x726   :  { %3228 = vmatpush3.bf16.msra.mxu0 %v3413_v43 }
 0x727   :  { %3239 = vmatprep.subr.bf16.mxu0 %v3630_v2 }
 0x7a9   :  { %v1075_v40 = vpop.xlane.xlu1 %1074 }
 0x7aa   :  { %v1080_v41 = vmul.f32 0.03125, %v1075_v40 }
 0x7ac   :  { %v1082_v44 = vsub.f32 %v1071_v34, %v1080_v41 }
 0x7ad   :  { %v1078_v45 = vpop.xlane.xlu0 %1077 }
 0x7ae   :  { %v1081_v46 = vmul.f32 0.03125, %v1078_v45  ;;  %v1084_v47 = vmul.f32 %v1082_v44, %v1082_v44 }
 0x7b0   :  { %v1083_v50 = vsub.f32 %v1072_v38, %v1081_v46  ;;  %v1086_v56 = vsel %vm508_vm2, %v1084_v47, 0.0 }
 0x7b1   :  { %1087 = vadd.xlane.f32.xlu0 %v1086_v56 }
 0x7b2   :  { %v1085_v51 = vmul.f32 %v1083_v50, %v1083_v50 }
 0x7b4   :  { %v1089_v52 = vsel %vm508_vm2, %v1085_v51, 0.0 }
 0x7b5   :  { %1090 = vadd.xlane.f32.xlu1 %v1089_v52 }
 0x83a   :  { %v1088_v54 = vpop.xlane.xlu0 %1087 }
 0x83b   :  { %v1092_v55 = vmul.f32 0.03125, %v1088_v54 }
 0x83d   :  { %v1094_v58 = vadd.f32 1e-05, %v1092_v55 }
 0x83e   :  { %v1091_v48 = vpop.xlane.xlu1 %1090 }
 0x83f   :  { %3468 = vrsqrt.f32 %v1094_v58  ;;  %v1093_v59 = vmul.f32 0.03125, %v1091_v48 }
 0x841   :  { %v1095_v60 = vadd.f32 1e-05, %v1093_v59 }
 0x843   :  { %3470 = vrsqrt.f32 %v1095_v60 }
 0x84c   :  { %v3469_v61 = vpop.eup %3468 }
 0x84d   :  { %v1098_v1 = vmul.f32 %v3469_v61, %v1082_v44  ;;  %v1346_v44 = vld [vmem:[%s4829_s13] sm:$0x3] }
 0x84f   :  { %v1105_v3 = vmul.f32 %v2971_v0, %v1098_v1 }
 0x850   :  { %v3471_v5 = vpop.eup %3470 }
 0x851   :  { %v1099_v7 = vmul.f32 %v3471_v5, %v1083_v50  ;;  %v1112_v9 = vadd.f32 %v2972_v6, %v1105_v3 }
 0x853   :  { %v1106_v8 = vmul.f32 %v2971_v0, %v1099_v7  ;;  %v1114_v11 = vmax.f32 %v1112_v9, 0.0 }
 0x855   :  { %v1113_v10 = vadd.f32 %v2972_v6, %v1106_v8 }
 0x857   :  { %v1115_v14 = vmax.f32 %v1113_v10, 0.0 }
 0x859   :  { %v1116_v15 = vpack.c.bf16 %v1115_v14, %v1114_v11 }
 0x85b   :  { %3230 = vmatmul.mubr.msk.bf16.vlgmr.msra.gmra.mxu0 %vm508_vm2, %v1116_v15 }
 0x85c   :  { %3243 = vmatprep.mubr.msk.bf16.mxu0 %vm3631_vm0, %v3630_v2  ;;  %3240 = vmatpush3.bf16.msra.mxu0 %v3414_v24 }
 0x85d   :  { %3241 = vmatprep.subr.bf16.mxu0 %v3630_v2 }
 0x860   :  { %3242 = vmatpush3.bf16.msra.mxu0 %v3415_v25 }
 0x861   :  { %3255 = vmatprep.subr.bf16.mxu0 %v3630_v2 }
 0x91b   :  { %v1170_v17 = vpop.f32.mrf.mxu0 }
 0x91d   :  { %v3231_v18 = vpop.f32.mrf.mxu0 }
 0x91f   :  { %v1173_v22 = vpop.f32.mrf.mxu0 }
 0x920   :  { %v1177_v23 = vpack.c.bf16 %v1173_v22, %v1170_v17 }
 0x921   :  { %v3232_v12 = vpop.f32.mrf.mxu0 }
 0x922   :  { %3234 = vmatpush3.bf16.msra.mxu1 %v1177_v23 }
 0x923   :  { %3247 = vmatprep.subr.bf16.mxu1 %v3630_v2 }
 0x925   :  { %3236 = vmatmul.mubr.msk.bf16.vlgmr.msra.gmra.mxu1 %vm446_vm1, %v3924_v49  ;;  %v3416_v49 = vld [vmem:[%s4830_s14 + $0x8] sm:$0xff]  }
 0x926   :  { %3251 = vmatprep.mubr.msk.bf16.mxu1 %vm3631_vm0, %v3630_v2  ;;  %3248 = vmatpush3.bf16.msra.mxu1 %v3416_v49 }
 0x927   :  { %3249 = vmatprep.subr.bf16.mxu1 %v3630_v2 }
 0x92a   :  { %3250 = vmatpush3.bf16.msra.mxu1 %v3417_v4 }
 0x92b   :  { %3261 = vmatprep.subr.bf16.mxu1 %v3630_v2 }
 0x9e5   :  { %v1217_v26 = vpop.f32.mrf.mxu1 }
 0x9e6   :  { %v4127_v30 = vadd.f32 %v2976_v27, %v1217_v26 }
 0x9e7   :  { %v3237_v28 = vpop.f32.mrf.mxu1 }
 0x9e9   :  { %v1220_v29 = vpop.f32.mrf.mxu1 }
 0x9ea   :  { %v4129_v31 = vadd.f32 %v2976_v27, %v1220_v29 }
 0x9eb   :  { %v3238_v33 = vpop.f32.mrf.mxu1 }
 0x9ec   :  { %v1224_v34 = vpack.c.bf16 %v4129_v31, %v4127_v30 }
 0x9ee   :  { %3244 = vmatmul.mubr.msk.bf16.vlgmr.msra.gmra.mxu0 %vm508_vm2, %v1224_v34 }
 0x9ef   :  { %3257 = vmatprep.mubr.msk.bf16.mxu0 %vm3631_vm0, %v3630_v2 }
 0xaae   :  { %v1278_v35 = vpop.f32.mrf.mxu0 }
 0xab0   :  { %v3245_v36 = vpop.f32.mrf.mxu0 }
 0xab2   :  { %v1281_v38 = vpop.f32.mrf.mxu0 }
 0xab3   :  { %v4140_v39 = vpack.c.bf16 %v1281_v38, %v1278_v35 }
 0xab4   :  { %v3246_v40 = vpop.f32.mrf.mxu0 }
 0xab5   :  { %3252 = vmatmul.mubr.msk.bf16.vlgmr.msra.gmra.mxu1 %vm508_vm2, %v4140_v39  ;;  %v1303_v41 = vsel %vm508_vm2, %v4140_v39, 0 }
 0xab6   :  { %3262 = vmatpush3.bf16.msra.mxu1 %v4140_v39  ;;  %3256 = vmatpush3.bf16.xpose.msra.mxu0 %v1303_v41 }
 0xab7   :  { %3267 = vmatprep.subr.bf16.mxu0 %v3630_v2  ;;  %3263 = vmatprep.mubr.msk.bf16.mxu1 %vm3631_vm0, %v3630_v2 }
 0xab8   :  { %3273 = vmatprep.subr.bf16.mxu1 %v3630_v2 }
 0xabd   :  { %3258 = vmatmul.mubr.msk.bf16.vlgmr.msra.gmra.mxu0 %vm508_vm2, %v1346_v44 }
 0xabe   :  { %3269 = vmatprep.mubr.msk.bf16.mxu0 %vm3631_vm0, %v3630_v2 }
 0xb75   :  { %v1339_v45 = vpop.f32.mrf.mxu1 }
 0xb76   :  { %1482 = vperm.xlu1 %3373, %v1339_v45   ;;  %1392 = vperm.xlu0 %3372, %v1339_v45  }
 0xb77   :  { %v3253_v46 = vpop.f32.mrf.mxu1 }
 0xb79   :  { %v1342_v47 = vpop.f32.mrf.mxu1 }
 0xb7a   :  { %3374 = vset.pattern.permute.xlu1 %v3634_v13  ;;  %3380 = vset.pattern.permute.xlu0 %v3635_v16 }
 0xb7b   :  { %1575 = vperm.xlu1 %3374, %v1339_v45   ;;  %v3254_v50 = vpop.f32.mrf.mxu1 }
 0xb7d   :  { %v1384_v56 = vpop.f32.mrf.mxu0 }
 0xb7e   :  { %v1403_v43 = vrot.slane %v1384_v56, %v670_v21  ;;  %v1585_v61 = vrot.slane %v1384_v56, %v858_v37  ;;  %v1677_v5 = vrot.slane %v1384_v56, %v950_v53 }
 0xb7f   :  { %3375 = vset.pattern.permute.xlu1 %v3635_v16  ;;  %v3259_v51 = vpop.f32.mrf.mxu0 }
 0xb80   :  { %1667 = vperm.xlu1 %3375, %v1339_v45  }
 0xb81   :  { %v1387_v52 = vpop.f32.mrf.mxu0 }
 0xb83   :  { %v3260_v57 = vpop.f32.mrf.mxu0 }
 0xb84   :  { %3376 = vset.pattern.permute.xlu1 %v3633_v63 }
 0xb85   :  { %1397 = vperm.xlu1 %3376, %v1342_v47  }
 0xb89   :  { %3377 = vset.pattern.permute.xlu1 %v3632_v62 }
 0xb8a   :  { %1486 = vperm.xlu1 %3377, %v1342_v47  }
 0xb8e   :  { %3378 = vset.pattern.permute.xlu1 %v3634_v13 }
 0xb8f   :  { %1579 = vperm.xlu1 %3378, %v1342_v47  }
 0xb93   :  { %3379 = vset.pattern.permute.xlu1 %v3635_v16  ;;  %v1492_v16 = vrot.slane %v1384_v56, %v765_v20 }
 0xb94   :  { %1671 = vperm.xlu1 %3379, %v1342_v47  }
 0xbf1   :  { %v1483_v54 = vpop.permute.xlu1 %1482  ;;  %v1393_v55 = vpop.permute.xlu0 %1392 }
 0xbf2   :  { %v1404_v58 = vadd.f32 %v1403_v43, %v1393_v55  ;;  %v1493_v21 = vadd.f32 %v1492_v16, %v1483_v54 }
 0xbf4   :  { %v1408_v48 = vmul.f32 0.2, %v1404_v58  ;;  %vm1406_vm4 = vcmp.gt.f32.partialorder %v1404_v58, 0.0  ;;  %v1497_v1 = vmul.f32 0.2, %v1493_v21  ;;  %vm1495_vm6 = vcmp.gt.f32.partialorder %v1493_v21, 0.0 }
 0xbf6   :  { %v1576_v59 = vpop.permute.xlu1 %1575  ;;  %v1410_v63 = vsel %vm1406_vm4, %v1404_v58, %v1408_v48  ;;  %v1499_v11 = vsel %vm1495_vm6, %v1493_v21, %v1497_v1 }
 0xbf7   :  { %v4168_v62 = vsel %vm4000_vm5, %v1410_v63, -1e+30  ;;  %v1586_v3 = vadd.f32 %v1585_v61, %v1576_v59  ;;  %v1501_v19 = vsel %vm4000_vm5, %v1499_v11, -1e+30 }
 0xbf8   :  { %v1414_v13 = vsel %vm446_vm1, %v4168_v62, -inf  ;;  %v1503_v24 = vsel %vm446_vm1, %v1501_v19, -inf }
 0xbf9   :  { %1415 = vmax.xlane.f32.xlu1 %v1414_v13  ;;  %v1590_v8 = vmul.f32 0.2, %v1586_v3  ;;  %vm1588_vm9 = vcmp.gt.f32.partialorder %v1586_v3, 0.0 }
 0xbfb   :  { %v1668_v60 = vpop.permute.xlu1 %1667  ;;  %v1592_v18 = vsel %vm1588_vm9, %v1586_v3, %v1590_v8 }
 0xbfc   :  { %v1678_v9 = vadd.f32 %v1677_v5, %v1668_v60  ;;  %v1594_v26 = vsel %vm4000_vm5, %v1592_v18, -1e+30 }
 0xbfd   :  { %v1596_v33 = vsel %vm446_vm1, %v1594_v26, -inf }
 0xbfe   :  { %v1682_v53 = vmul.f32 0.2, %v1678_v9  ;;  %vm1680_vm11 = vcmp.gt.f32.partialorder %v1678_v9, 0.0 }
 0xc00   :  { %v1398_v0 = vpop.permute.xlu1 %1397  ;;  %v1684_v28 = vsel %vm1680_vm11, %v1678_v9, %v1682_v53 }
 0xc01   :  { %v1405_v6 = vadd.f32 %v1403_v43, %v1398_v0  ;;  %v1686_v36 = vsel %vm4000_vm5, %v1684_v28, -1e+30 }
 0xc02   :  { %v1688_v41 = vsel %vm446_vm1, %v1686_v36, -inf }
 0xc03   :  { %v1409_v7 = vmul.f32 0.2, %v1405_v6  ;;  %vm1407_vm7 = vcmp.gt.f32.partialorder %v1405_v6, 0.0 }
 0xc05   :  { %v1487_v10 = vpop.permute.xlu1 %1486  ;;  %v1411_v20 = vsel %vm1407_vm7, %v1405_v6, %v1409_v7 }
 0xc06   :  { %v1494_v14 = vadd.f32 %v1492_v16, %v1487_v10  ;;  %v1413_v15 = vsel %vm4005_vm8, %v1411_v20, -1e+30 }
 0xc07   :  { %v1417_v37 = vsel %vm446_vm1, %v1413_v15, -inf }
 0xc08   :  { %v1498_v17 = vmul.f32 0.2, %v1494_v14  ;;  %1418 = vmax.xlane.f32.xlu0 %v1417_v37  ;;  %vm1496_vm10 = vcmp.gt.f32.partialorder %v1494_v14, 0.0 }
 0xc0a   :  { %v1580_v22 = vpop.permute.xlu1 %1579  ;;  %v1500_v23 = vsel %vm1496_vm10, %v1494_v14, %v1498_v17 }
 0xc0b   :  { %v1587_v12 = vadd.f32 %v1585_v61, %v1580_v22  ;;  %v1502_v25 = vsel %vm4005_vm8, %v1500_v23, -1e+30 }
 0xc0c   :  { %1504 = vmax.xlane.f32.xlu0 %v1503_v24  ;;  %v1506_v49 = vsel %vm446_vm1, %v1502_v25, -inf }
 0xc0d   :  { %v1591_v27 = vmul.f32 0.2, %v1587_v12  ;;  %1507 = vmax.xlane.f32.xlu1 %v1506_v49  ;;  %vm1589_vm12 = vcmp.gt.f32.partialorder %v1587_v12, 0.0 }
 0xc0f   :  { %v1672_v29 = vpop.permute.xlu1 %1671  ;;  %v1593_v34 = vsel %vm1589_vm12, %v1587_v12, %v1591_v27 }
 0xc10   :  { %v1679_v4 = vadd.f32 %v1677_v5, %v1672_v29  ;;  %1597 = vmax.xlane.f32.xlu0 %v1596_v33  ;;  %v1595_v35 = vsel %vm4005_vm8, %v1593_v34, -1e+30 }
 0xc11   :  { %v1599_v38 = vsel %vm446_vm1, %v1595_v35, -inf }
 0xc12   :  { %v1683_v40 = vmul.f32 0.2, %v1679_v4  ;;  %1600 = vmax.xlane.f32.xlu1 %v1599_v38  ;;  %vm1681_vm13 = vcmp.gt.f32.partialorder %v1679_v4, 0.0 }
 0xc14   :  { %1689 = vmax.xlane.f32.xlu0 %v1688_v41  ;;  %v1685_v44 = vsel %vm1681_vm13, %v1679_v4, %v1683_v40 }
 0xc15   :  { %v1687_v45 = vsel %vm4005_vm8, %v1685_v44, -1e+30 }
 0xc16   :  { %v1691_v46 = vsel %vm446_vm1, %v1687_v45, -inf }
 0xc17   :  { %1692 = vmax.xlane.f32.xlu1 %v1691_v46 }
 0xc28   :  { %1619 = vrot.lane.b32.xlu1 %v4140_v39, %s3638_s4 }
 0xc82   :  { %v1416_v32 = vpop.xlane.xlu1 %1415 }
 0xc83   :  { %v1420_v47 = vsub.f32 %v4168_v62, %v1416_v32 }
 0xc85   :  { %v1422_v50 = vmul.f32 1.442695, %v1420_v47 }
 0xc87   :  { %3472 = vpow2.f32 %v1422_v50 }
 0xc91   :  { %v1419_v56 = vpop.xlane.xlu0 %1418 }
 0xc92   :  { %v1421_v51 = vsub.f32 %v1413_v15, %v1419_v56 }
 0xc94   :  { %v4202_v52 = vpop.eup %3472  ;;  %v1424_v57 = vmul.f32 1.442695, %v1421_v51 }
 0xc95   :  { %v1505_v43 = vpop.xlane.xlu0 %1504  ;;  %v1426_v42 = vsel %vm446_vm1, %v4202_v52, 0.0 }
 0xc96   :  { %3474 = vpow2.f32 %v1424_v57  ;;  %v1509_v54 = vsub.f32 %v1501_v19, %v1505_v43  ;;  %1427 = vadd.xlane.f32.xlu0 %v1426_v42  ;;  %v1508_v55 = vpop.xlane.xlu1 %1507 }
 0xc97   :  { %v1510_v58 = vsub.f32 %v1502_v25, %v1508_v55 }
 0xc98   :  { %v1511_v48 = vmul.f32 1.442695, %v1509_v54  ;;  %v3418_v54 = vld [vmem:[%s4836_s20 + $0x8] sm:$0xff]  }
 0xc99   :  { %v1513_v59 = vmul.f32 1.442695, %v1510_v58  ;;  %v1598_v63 = vpop.xlane.xlu0 %1597  ;;  %v3419_v58 = vld [vmem:[%s4836_s20] sm:$0xff]  }
 0xc9a   :  { %3476 = vpow2.f32 %v1511_v48  ;;  %v1602_v62 = vsub.f32 %v1594_v26, %v1598_v63  ;;  %v4243_v48 = vld [vmem:[%s4868_s3 + $0x38] sm:$0xff]   ;;  %v3428_v63 = vld [vmem:[%s4840_s24] sm:$0xff]  }
 0xc9b   :  { %3478 = vpow2.f32 %v1513_v59  ;;  %v1601_v13 = vpop.xlane.xlu1 %1600  ;;  %v1913_v59 = vld [vmem:[%s4835_s19] sm:$0x3] }
 0xc9c   :  { %v1604_v16 = vmul.f32 1.442695, %v1602_v62  ;;  %v1603_v60 = vsub.f32 %v1595_v35, %v1601_v13  ;;  %v4255_v62 = vld [vmem:[%s4868_s3 + $0x30] sm:$0xff]   ;;  %v4263_v13 = vld [vmem:[%s4868_s3 + $0x28] sm:$0xff]  }
 0xc9d   :  { %v1690_v21 = vpop.xlane.xlu0 %1689 }
 0xc9e   :  { %3480 = vpow2.f32 %v1604_v16  ;;  %v1606_v61 = vmul.f32 1.442695, %v1603_v60  ;;  %v1694_v0 = vsub.f32 %v1686_v36, %v1690_v21  ;;  %v4270_v16 = vld [vmem:[%s4868_s3 + $0x20] sm:$0xff]   ;;  %v4277_v60 = vld [vmem:[%s4868_s3 + $0x18] sm:$0xff]   ;;  %v4284_v21 = vld [vmem:[%s4868_s3 + $0x10] sm:$0xff]  }
 0xca0   :  { %3482 = vpow2.f32 %v1606_v61  ;;  %v1696_v1 = vmul.f32 1.442695, %v1694_v0  ;;  %v1693_v3 = vpop.xlane.xlu1 %1692  ;;  %v4291_v61 = vld [vmem:[%s4868_s3 + $0x8] sm:$0xff]   ;;  %v4298_v0 = vld [vmem:[%s4868_s3] sm:$0xff]  }
 0xca1   :  { %v1695_v5 = vsub.f32 %v1687_v45, %v1693_v3 }
 0xca2   :  { %3484 = vpow2.f32 %v1696_v1  ;;  %v3429_v1 = vld [vmem:[%s4840_s24 + $0x8] sm:$0xff]  }
 0xca3   :  { %v3475_v6 = vpop.eup %3474  ;;  %v1698_v7 = vmul.f32 1.442695, %v1695_v5 }
 0xca4   :  { %v1429_v8 = vsel %vm446_vm1, %v3475_v6, 0.0  ;;  %v1620_v23 = vpop.permute.xlu1 %1619 }
 0xca5   :  { %3486 = vpow2.f32 %v1698_v7  ;;  %1430 = vadd.xlane.f32.xlu1 %v1429_v8 }
 0xca7   :  { %v3477_v9 = vpop.eup %3476 }
 0xca8   :  { %v3479_v10 = vpop.eup %3478  ;;  %v1515_v20 = vsel %vm446_vm1, %v3477_v9, 0.0 }
 0xca9   :  { %1516 = vadd.xlane.f32.xlu0 %v1515_v20  ;;  %v1518_v11 = vsel %vm446_vm1, %v3479_v10, 0.0 }
 0xcaa   :  { %1519 = vadd.xlane.f32.xlu1 %v1518_v11 }
 0xcab   :  { %v3481_v14 = vpop.eup %3480 }
 0xcac   :  { %v1608_v15 = vsel %vm446_vm1, %v3481_v14, 0.0 }
 0xcad   :  { %v3483_v37 = vpop.eup %3482  ;;  %1609 = vadd.xlane.f32.xlu0 %v1608_v15 }
 0xcae   :  { %v1611_v17 = vsel %vm446_vm1, %v3483_v37, 0.0 }
 0xcaf   :  { %v3485_v19 = vpop.eup %3484  ;;  %1612 = vadd.xlane.f32.xlu1 %v1611_v17 }
 0xcb0   :  { %v1700_v53 = vsel %vm446_vm1, %v3485_v19, 0.0 }
 0xcb1   :  { %1701 = vadd.xlane.f32.xlu0 %v1700_v53 }
 0xcb2   :  { %v3487_v18 = vpop.eup %3486 }
 0xcb3   :  { %v1703_v22 = vsel %vm446_vm1, %v3487_v18, 0.0 }
 0xcb4   :  { %1704 = vadd.xlane.f32.xlu1 %v1703_v22 }
 0xcc5   :  { %1711 = vrot.lane.b32.xlu1 %v4140_v39, %s3637_s1 }
 0xcc7   :  { %1527 = vrot.lane.b32.xlu0 %v4140_v39, %s3636_s7 }
 0xd1f   :  { %v1428_v12 = vpop.xlane.xlu0 %1427 }
 0xd20   :  { %3488 = vrcp.f32 %v1428_v12 }
 0xd2d   :  { %v3489_v28 = vpop.eup %3488 }
 0xd2e   :  { %v1431_v24 = vpop.xlane.xlu1 %1430  ;;  %v1434_v39 = vmul.f32 %v3489_v28, %v4202_v52 }
 0xd2f   :  { %3490 = vrcp.f32 %v1431_v24 }
 0xd32   :  { %v1517_v25 = vpop.xlane.xlu0 %1516 }
 0xd33   :  { %3492 = vrcp.f32 %v1517_v25  ;;  %v1520_v49 = vpop.xlane.xlu1 %1519 }
 0xd34   :  { %3494 = vrcp.f32 %v1520_v49 }
 0xd36   :  { %v1610_v26 = vpop.xlane.xlu0 %1609 }
 0xd37   :  { %3496 = vrcp.f32 %v1610_v26 }
 0xd38   :  { %v1613_v27 = vpop.xlane.xlu1 %1612 }
 0xd39   :  { %3498 = vrcp.f32 %v1613_v27 }
 0xd3a   :  { %v1702_v29 = vpop.xlane.xlu0 %1701 }
 0xd3b   :  { %3500 = vrcp.f32 %v1702_v29 }
 0xd3c   :  { %v3491_v33 = vpop.eup %3490 }
 0xd3d   :  { %v1705_v34 = vpop.xlane.xlu1 %1704  ;;  %v1435_v4 = vmul.f32 %v3491_v33, %v3475_v6  ;;  %v4317_v33 = vld [vmem:[%s4873_s30] ss:$0 sm:$0xff]  ;;  %s3642_s30 = smov 96  }
 0xd3e   :  { %3502 = vrcp.f32 %v1705_v34  ;;  %v1528_v35 = vpop.permute.xlu0 %1527 }
 0xd3f   :  { %3268 = vmatpush3.bf16.msra.mxu0 %v1528_v35  ;;  %v1436_v36 = vpack.c.bf16 %v1435_v4, %v1434_v39  ;;  %v2989_v35 = vld [vmem:[%s4831_s15 + $0x1] ss:$0 sm:$0xff] }
 0xd40   :  { %v3493_v38 = vpop.eup %3492  ;;  %3279 = vmatprep.subr.bf16.mxu0 %v3630_v2 }
 0xd41   :  { %v3495_v40 = vpop.eup %3494  ;;  %3264 = vmatmul.mubr.msk.bf16.vlgmr.msra.gmra.mxu1 %vm446_vm1, %v1436_v36  ;;  %v1523_v41 = vmul.f32 %v3493_v38, %v3477_v9  ;;  %v1712_v47 = vpop.permute.xlu1 %1711 }
 0xd42   :  { %3274 = vmatpush3.bf16.msra.mxu1 %v1620_v23  ;;  %v1524_v44 = vmul.f32 %v3495_v40, %v3479_v10  ;;  %3275 = vmatprep.mubr.msk.bf16.mxu1 %vm3631_vm0, %v3630_v2 }
 0xd43   :  { %3285 = vmatprep.subr.bf16.mxu1 %v3630_v2 }
 0xd44   :  { %v3497_v45 = vpop.eup %3496  ;;  %v1525_v46 = vpack.c.bf16 %v1524_v44, %v1523_v41 }
 0xd45   :  { %v1616_v50 = vmul.f32 %v3497_v45, %v3481_v14 }
 0xd46   :  { %v3499_v32 = vpop.eup %3498  ;;  %3270 = vmatmul.mubr.msk.bf16.vlgmr.msra.gmra.mxu0 %vm446_vm1, %v1525_v46 }
 0xd47   :  { %3280 = vmatpush3.bf16.msra.mxu0 %v1712_v47  ;;  %v1617_v56 = vmul.f32 %v3499_v32, %v3483_v37  ;;  %3281 = vmatprep.mubr.msk.bf16.mxu0 %vm3631_vm0, %v3630_v2 }
 0xd48   :  { %3293 = vmatprep.subr.bf16.mxu0 %v3630_v2  ;;  %v3501_v51 = vpop.eup %3500 }
 0xd49   :  { %v1618_v52 = vpack.c.bf16 %v1617_v56, %v1616_v50  ;;  %v1708_v43 = vmul.f32 %v3501_v51, %v3485_v19 }
 0xd4b   :  { %v3503_v57 = vpop.eup %3502  ;;  %3276 = vmatmul.mubr.msk.bf16.vlgmr.msra.gmra.mxu1 %vm446_vm1, %v1618_v52 }
 0xd4c   :  { %v1709_v42 = vmul.f32 %v3503_v57, %v3487_v18  ;;  %3289 = vmatprep.mubr.msk.bf16.mxu1 %vm3631_vm0, %v3630_v2 }
 0xd4e   :  { %v1710_v55 = vpack.c.bf16 %v1709_v42, %v1708_v43 }
 0xd50   :  { %3282 = vmatmul.mubr.msk.bf16.vlgmr.msra.gmra.mxu0 %vm446_vm1, %v1710_v55 }
 0xd51   :  { %3294 = vmatpush3.bf16.msra.mxu0 %v3418_v54  ;;  %3297 = vmatprep.mubr.msk.bf16.mxu0 %vm3631_vm0, %v3630_v2 }
 0xd52   :  { %3295 = vmatprep.subr.bf16.mxu0 %v3630_v2 }
 0xd55   :  { %3296 = vmatpush3.bf16.msra.mxu0 %v3419_v58 }
 0xd56   :  { %3309 = vmatprep.subr.bf16.mxu0 %v4243_v48 }
 0xd58   :  { %3298 = vmatmul.mubr.msk.bf16.vlgmr.msra.gmra.mxu0 %vm508_vm2, %v1913_v59 }
 0xd59   :  { %3310 = vmatpush3.bf16.msra.mxu0 %v4243_v48  ;;  %3325 = vmatprep.mubr.bf16.mxu0 %v3428_v63 }
 0xd5a   :  { %3311 = vmatprep.subr.bf16.mxu0 %v4255_v62 }
 0xd5d   :  { %3312 = vmatpush3.bf16.msra.mxu0 %v4255_v62 }
 0xd5e   :  { %3313 = vmatprep.subr.bf16.mxu0 %v4263_v13 }
 0xd61   :  { %3314 = vmatpush3.bf16.msra.mxu0 %v4263_v13 }
 0xd62   :  { %3315 = vmatprep.subr.bf16.mxu0 %v4270_v16 }
 0xd65   :  { %3316 = vmatpush3.bf16.msra.mxu0 %v4270_v16 }
 0xd66   :  { %3317 = vmatprep.subr.bf16.mxu0 %v4277_v60 }
 0xd69   :  { %3318 = vmatpush3.bf16.msra.mxu0 %v4277_v60 }
 0xd6a   :  { %3319 = vmatprep.subr.bf16.mxu0 %v4284_v21 }
 0xd6d   :  { %3320 = vmatpush3.bf16.msra.mxu0 %v4284_v21 }
 0xd6e   :  { %3321 = vmatprep.subr.bf16.mxu0 %v4291_v61 }
 0xd71   :  { %3322 = vmatpush3.bf16.msra.mxu0 %v4291_v61 }
 0xd72   :  { %3323 = vmatprep.subr.bf16.mxu0 %v4298_v0 }
 0xd75   :  { %3324 = vmatpush3.bf16.msra.mxu0 %v4298_v0 }
 0xd78   :  { %3326 = vmatmul.mubr.bf16.vlgmr.msra.gmra.mxu0 %v3429_v1 }
 0xe01   :  { %v1474_v3 = vpop.f32.mrf.mxu1 }
 0xe03   :  { %v3265_v5 = vpop.f32.mrf.mxu1 }
 0xe05   :  { %v1477_v6 = vpop.f32.mrf.mxu1 }
 0xe06   :  { %v1567_v7 = vpop.f32.mrf.mxu0 }
 0xe07   :  { %v3266_v8 = vpop.f32.mrf.mxu1  ;;  %1760 = vrot.lane.b32.xlu0 %v1567_v7, %s3639_s8 }
 0xe08   :  { %v3271_v9 = vpop.f32.mrf.mxu0 }
 0xe0a   :  { %v1570_v10 = vpop.f32.mrf.mxu0 }
 0xe0b   :  { %v1659_v20 = vpop.f32.mrf.mxu1  ;;  %1762 = vrot.lane.b32.xlu1 %v1570_v10, %s3639_s8 }
 0xe0c   :  { %1768 = vrot.lane.b32.xlu0 %v1659_v20, %s3640_s5  ;;  %v3272_v11 = vpop.f32.mrf.mxu0 }
 0xe0d   :  { %v3277_v14 = vpop.f32.mrf.mxu1 }
 0xe0f   :  { %v1662_v15 = vpop.f32.mrf.mxu1 }
 0xe10   :  { %1770 = vrot.lane.b32.xlu1 %v1662_v15, %s3640_s5  ;;  %v1751_v37 = vpop.f32.mrf.mxu0 }
 0xe11   :  { %v3278_v17 = vpop.f32.mrf.mxu1  ;;  %1776 = vrot.lane.b32.xlu0 %v1751_v37, %s3641_s9 }
 0xe12   :  { %v3283_v19 = vpop.f32.mrf.mxu0 }
 0xe14   :  { %v1754_v53 = vpop.f32.mrf.mxu0 }
 0xe15   :  { %1778 = vrot.lane.b32.xlu1 %v1754_v53, %s3641_s9 }
 0xe16   :  { %v3284_v18 = vpop.f32.mrf.mxu0 }
 0xe18   :  { %v4312_v22 = vpop.f32.mrf.mxu0 }
 0xe1a   :  { %v3299_v23 = vpop.f32.mrf.mxu0 }
 0xe1c   :  { %v1977_v12 = vpop.f32.mrf.mxu0 }
 0xe1e   :  { %v3300_v24 = vpop.f32.mrf.mxu0 }
 0xe38   :  { %v3327_v25 = vpop.f32.mrf.mxu0 }
 0xe39   :  { %v4347_v54 = vadd.f32 %v3327_v25, %v4317_v33 }
 0xe3a   :  { %v2177_v49 = vpop.f32.mrf.mxu0 }
 0xe3b   :  { %v4337_v51 = vadd.f32 %v4317_v33, %v2177_v49  ;;  %v4364_v1 = vmul.f32 %v4347_v54, %v4347_v54 }
 0xe3c   :  { %v3328_v27 = vpop.f32.mrf.mxu0 }
 0xe3d   :  { %v4340_v52 = vadd.f32 %v3328_v27, %v4317_v33  ;;  %v4356_v59 = vmul.f32 %v4337_v51, %v4337_v51 }
 0xe3e   :  { %v2180_v34 = vpop.f32.mrf.mxu0 }
 0xe3f   :  { %v4325_v40 = vadd.f32 %v4317_v33, %v2180_v34  ;;  %v4352_v58 = vmul.f32 %v4340_v52, %v4340_v52  ;;  %v2277_v63 = vsel %vm508_vm2, %v4356_v59, 0.0 }
 0xe41   :  { %v4333_v50 = vmul.f32 %v4325_v40, %v4325_v40 }
 0xe79   :  { %v1761_v26 = vpop.permute.xlu0 %1760 }
 0xe7a   :  { %v1782_v39 = vsel %vm1056_vm15, %v1474_v3, %v1761_v26  ;;  %v2283_v3 = vsel %vm508_vm2, %v4364_v1, 0.0 }
 0xe7d   :  { %v1763_v28 = vpop.permute.xlu1 %1762 }
 0xe7e   :  { %v1769_v29 = vpop.permute.xlu0 %1768  ;;  %v1783_v45 = vsel %vm1056_vm15, %v1477_v6, %v1763_v28  ;;  %v3430_v28 = vld [vmem:[%s4833_s17 + $0x8] sm:$0xff]  }
 0xe7f   :  { %v1784_v36 = vsel %vm446_vm1, %v1782_v39, %v1769_v29  ;;  %3286 = vmatpush3.bf16.msra.mxu1 %v3430_v28  ;;  %v3431_v29 = vld [vmem:[%s4833_s17] sm:$0xff]   ;;  %s3644_s17 = smov 32  }
 0xe80   :  { %3287 = vmatprep.subr.bf16.mxu1 %v3630_v2  ;;  %v1907_v28 = vld [vmem:[%s4832_s16] sm:$0xff] }
 0xe82   :  { %v1771_v4 = vpop.permute.xlu1 %1770 }
 0xe83   :  { %v1777_v38 = vpop.permute.xlu0 %1776  ;;  %v1785_v46 = vsel %vm446_vm1, %v1783_v45, %v1771_v4  ;;  %3288 = vmatpush3.bf16.msra.mxu1 %v3431_v29 }
 0xe84   :  { %v1786_v41 = vsel %vm1061_vm3, %v1784_v36, %v1777_v38  ;;  %3301 = vmatprep.subr.bf16.mxu1 %v3630_v2 }
 0xe85   :  { %v1793_v44 = vadd.f32 %v2989_v35, %v1786_v41 }
 0xe87   :  { %v1779_v32 = vpop.permute.xlu1 %1778  ;;  %v1795_v47 = vadd.f32 %v1793_v44, %v4127_v30  ;;  %v2280_v30 = vsel %vm508_vm2, %v4333_v50, 0.0 }
 0xe88   :  { %v1787_v56 = vsel %vm1061_vm3, %v1785_v46, %v1779_v32 }
 0xe89   :  { %v1794_v57 = vadd.f32 %v2989_v35, %v1787_v56  ;;  %v1797_v43 = vsel %vm508_vm2, %v1795_v47, 0.0 }
 0xe8a   :  { %1798 = vadd.xlane.f32.xlu0 %v1797_v43 }
 0xe8b   :  { %v1796_v42 = vadd.f32 %v1794_v57, %v4129_v31  ;;  %v2286_v31 = vsel %vm508_vm2, %v4352_v58, 0.0 }
 0xe8d   :  { %v1800_v55 = vsel %vm508_vm2, %v1796_v42, 0.0 }
 0xe8e   :  { %1801 = vadd.xlane.f32.xlu1 %v1800_v55  ;;  %2281 = vadd.xlane.f32.xlu0 %v2280_v30 }
 0xe92   :  { %2287 = vadd.xlane.f32.xlu0 %v2286_v31  ;;  %2278 = vadd.xlane.f32.xlu1 %v2277_v63  ;;  %v2990_v63 = vld [vmem:[%s4831_s15 + $0x2] ss:$0 sm:$0xff] }
 0xe96   :  { %2284 = vadd.xlane.f32.xlu1 %v2283_v3 }
 0xea7   :  { %2433 = vrot.lane.b32.xlu1 %v4356_v59, %s3642_s30 }
 0xea8   :  { %2435 = vrot.lane.b32.xlu0 %v4333_v50, %s3642_s30 }
 0xeab   :  { %2437 = vrot.lane.b32.xlu1 %v4364_v1, %s3642_s30 }
 0xeaf   :  { %2439 = vrot.lane.b32.xlu1 %v4352_v58, %s3642_s30 }
 0xeb3   :  { %2605 = vrot.lane.b32.xlu1 %v4356_v59, %s3643_s29 }
 0xf13   :  { %v1799_v5 = vpop.xlane.xlu0 %1798 }
 0xf14   :  { %v1803_v37 = vmul.f32 0.03125, %v1799_v5 }
 0xf16   :  { %v1805_v19 = vsub.f32 %v1795_v47, %v1803_v37 }
 0xf17   :  { %v1802_v6 = vpop.xlane.xlu1 %1801  ;;  %v4378_v7 = vpop.xlane.xlu0 %2281 }
 0xf18   :  { %v1804_v53 = vmul.f32 0.03125, %v1802_v6  ;;  %v1807_v25 = vmul.f32 %v1805_v19, %v1805_v19  ;;  %vm2298_vm7 = vcmp.eq.f32.partialorder %v4378_v7, inf  ;;  %vm2300_vm9 = vcmp.eq.f32.partialorder %v4378_v7, 0.0 }
 0xf1a   :  { %v1806_v12 = vsub.f32 %v1796_v42, %v1804_v53  ;;  %v1809_v49 = vsel %vm508_vm2, %v1807_v25, 0.0 }
 0xf1b   :  { %v4380_v8 = vpop.xlane.xlu0 %2287  ;;  %v4382_v9 = vpop.xlane.xlu1 %2278 }
 0xf1c   :  { %v1808_v26 = vmul.f32 %v1806_v12, %v1806_v12  ;;  %vm2312_vm1 = vcmp.eq.f32.partialorder %v4380_v8, inf  ;;  %vm2314_vm5 = vcmp.eq.f32.partialorder %v4380_v8, 0.0  ;;  %vm2291_vm12 = vcmp.eq.f32.partialorder %v4382_v9, inf }
 0xf1d   :  { %vm2293_vm13 = vcmp.eq.f32.partialorder %v4382_v9, 0.0 }
 0xf1e   :  { %v1812_v27 = vsel %vm508_vm2, %v1808_v26, 0.0  ;;  %v2992_v26 = vld [vmem:[%s4834_s18] ss:$0 sm:$0xff] }
 0xf1f   :  { %v2436_v10 = vpop.permute.xlu0 %2435  ;;  %v4384_v20 = vpop.xlane.xlu1 %2284 }
 0xf20   :  { %v2448_v11 = vsel %vm508_vm2, %v2436_v10, 0.0  ;;  %v2991_v10 = vld [vmem:[%s4831_s15 + $0x3] ss:$0 sm:$0xff]  ;;  %vm2305_vm15 = vcmp.eq.f32.partialorder %v4384_v20, inf  ;;  %vm2307_vm3 = vcmp.eq.f32.partialorder %v4384_v20, 0.0 }
 0xf21   :  { %2449 = vadd.xlane.f32.xlu1 %v2448_v11 }
 0xf23   :  { %v2434_v14 = vpop.permute.xlu1 %2433 }
 0xf24   :  { %v2445_v18 = vsel %vm508_vm2, %v2434_v14, 0.0 }
 0xf27   :  { %v2438_v15 = vpop.permute.xlu1 %2437 }
 0xf28   :  { %v2451_v17 = vsel %vm508_vm2, %v2438_v15, 0.0 }
 0xf29   :  { %2452 = vadd.xlane.f32.xlu0 %v2451_v17 }
 0xf2b   :  { %v2440_v23 = vpop.permute.xlu1 %2439 }
 0xf2c   :  { %v2454_v24 = vsel %vm508_vm2, %v2440_v23, 0.0 }
 0xf2d   :  { %2446 = vadd.xlane.f32.xlu0 %v2445_v18 }
 0xf2f   :  { %v2606_v34 = vpop.permute.xlu1 %2605 }
 0xf30   :  { %v2617_v39 = vsel %vm508_vm2, %v2606_v34, 0.0 }
 0xf31   :  { %2455 = vadd.xlane.f32.xlu0 %v2454_v24 }
 0xf32   :  { %2609 = vrot.lane.b32.xlu1 %v4364_v1, %s3643_s29 }
 0xf35   :  { %1810 = vadd.xlane.f32.xlu0 %v1809_v49 }
 0xf36   :  { %2611 = vrot.lane.b32.xlu1 %v4352_v58, %s3643_s29 }
 0xf39   :  { %1813 = vadd.xlane.f32.xlu0 %v1812_v27 }
 0xf4f   :  { %2607 = vrot.lane.b32.xlu0 %v4333_v50, %s3643_s29 }
 0xf6e   :  { %2618 = vadd.xlane.f32.xlu0 %v2617_v39 }
 0xfaa   :  { %v4407_v4 = vpop.xlane.xlu1 %2449 }
 0xfae   :  { %v2610_v35 = vpop.permute.xlu1 %2609 }
 0xfaf   :  { %v2623_v36 = vsel %vm508_vm2, %v2610_v35, 0.0 }
 0xfb0   :  { %2624 = vadd.xlane.f32.xlu0 %v2623_v36  ;;  %v1908_v36 = vld [vmem:[%s4832_s16 + $0x8] sm:$0xff] }
 0xfb2   :  { %v4410_v38 = vpop.xlane.xlu0 %2452  ;;  %v2612_v41 = vpop.permute.xlu1 %2611 }
 0xfb3   :  { %v2626_v44 = vsel %vm508_vm2, %v2612_v41, 0.0 }
 0xfb4   :  { %2627 = vadd.xlane.f32.xlu0 %v2626_v44 }
 0xfb6   :  { %v4413_v45 = vpop.xlane.xlu0 %2446 }
 0xfba   :  { %v4415_v46 = vpop.xlane.xlu0 %2455 }
 0xfbe   :  { %v1811_v32 = vpop.xlane.xlu0 %1810 }
 0xfbf   :  { %v1815_v47 = vmul.f32 0.03125, %v1811_v32  ;;  %v3000_v32 = vld [vmem:[#allocation2] ss:$0 sm:$0xff] }
 0xfc1   :  { %v1817_v56 = vadd.f32 1e-05, %v1815_v47 }
 0xfc2   :  { %v1814_v57 = vpop.xlane.xlu0 %1813 }
 0xfc3   :  { %3504 = vrsqrt.f32 %v1817_v56  ;;  %v1816_v43 = vmul.f32 0.03125, %v1814_v57 }
 0xfc5   :  { %v1818_v42 = vadd.f32 1e-05, %v1816_v43 }
 0xfc6   :  { %v2608_v30 = vpop.permute.xlu0 %2607 }
 0xfc7   :  { %3506 = vrsqrt.f32 %v1818_v42  ;;  %v2620_v55 = vsel %vm508_vm2, %v2608_v30, 0.0 }
 0xfc8   :  { %2621 = vadd.xlane.f32.xlu1 %v2620_v55 }
 0xfca   :  { %2759 = vrot.lane.b32.xlu0 %v4333_v50, %s3644_s17  ;;  %v2996_v50 = vld [vmem:[%s4837_s21] ss:$0 sm:$0xff] }
 0xfcb   :  { %v1975_v18 = vadd.f32 %v2996_v50, %v4312_v22  ;;  %v3434_v22 = vld [vmem:[%s4841_s25] sm:$0xff]  }
 0xfd0   :  { %v3505_v31 = vpop.eup %3504 }
 0xfd1   :  { %v1821_v3 = vmul.f32 %v3505_v31, %v1805_v19  ;;  %v3432_v19 = vld [vmem:[%s4838_s22 + $0x8] sm:$0xff]  }
 0xfd3   :  { %v1828_v5 = vmul.f32 %v2990_v63, %v1821_v3 }
 0xfd4   :  { %v3507_v6 = vpop.eup %3506 }
 0xfd5   :  { %v1822_v11 = vmul.f32 %v3507_v6, %v1806_v12  ;;  %v1835_v15 = vadd.f32 %v2991_v10, %v1828_v5  ;;  %v1980_v12 = vmax.f32 %v1975_v18, 0.0 }
 0xfd7   :  { %v1829_v14 = vmul.f32 %v2990_v63, %v1822_v11  ;;  %v1837_v17 = vmax.f32 %v1835_v15, 0.0 }
 0xfd9   :  { %2757 = vrot.lane.b32.xlu1 %v4356_v59, %s3644_s17  ;;  %v1836_v37 = vadd.f32 %v2991_v10, %v1829_v14  ;;  %v3433_v59 = vld [vmem:[%s4838_s22] sm:$0xff]  }
 0xfdb   :  { %v1838_v53 = vmax.f32 %v1836_v37, 0.0 }
 0xfdd   :  { %2761 = vrot.lane.b32.xlu1 %v4364_v1, %s3644_s17  ;;  %v1839_v23 = vpack.c.bf16 %v1838_v53, %v1837_v17  ;;  %v1981_v1 = vpack.c.bf16 %v1980_v12, %v1980_v12 }
 0xfdf   :  { %3290 = vmatmul.mubr.msk.bf16.vlgmr.msra.gmra.mxu1 %vm508_vm2, %v1839_v23 }
 0xfe0   :  { %3302 = vmatpush3.bf16.msra.mxu1 %v3432_v19  ;;  %3305 = vmatprep.mubr.msk.bf16.mxu1 %vm3631_vm0, %v3630_v2  ;;  %vm2054_vm0 = vcmask 3072  }
 0xfe1   :  { %2763 = vrot.lane.b32.xlu1 %v4352_v58, %s3644_s17  ;;  %3303 = vmatprep.subr.bf16.mxu1 %v3630_v2  ;;  %v3435_v2 = vld [vmem:[%s4841_s25 + $0x8] sm:$0xff]  }
 0xfe4   :  { %3304 = vmatpush3.bf16.msra.mxu1 %v3433_v59 }
 0xfe5   :  { %3329 = vmatprep.subr.bf16.mxu1 %v4243_v48 }
 0xfe7   :  { %3306 = vmatmul.mubr.msk.bf16.vlgmr.msra.gmra.mxu1 %vm508_vm2, %v1981_v1 }
 0xfe8   :  { %3330 = vmatpush3.bf16.msra.mxu1 %v4243_v48  ;;  %3345 = vmatprep.mubr.bf16.mxu1 %v3434_v22 }
 0xfe9   :  { %3331 = vmatprep.subr.bf16.mxu1 %v4255_v62 }
 0xfec   :  { %3332 = vmatpush3.bf16.msra.mxu1 %v4255_v62 }
 0xfed   :  { %3333 = vmatprep.subr.bf16.mxu1 %v4263_v13 }
 0xff0   :  { %3334 = vmatpush3.bf16.msra.mxu1 %v4263_v13 }
 0xff1   :  { %3335 = vmatprep.subr.bf16.mxu1 %v4270_v16 }
 0xff4   :  { %3336 = vmatpush3.bf16.msra.mxu1 %v4270_v16 }
 0xff5   :  { %3337 = vmatprep.subr.bf16.mxu1 %v4277_v60 }
 0xff7   :  { %v4469_v48 = vpop.xlane.xlu0 %2618 }
 0xff8   :  { %3338 = vmatpush3.bf16.msra.mxu1 %v4277_v60 }
 0xff9   :  { %3339 = vmatprep.subr.bf16.mxu1 %v4284_v21 }
 0xffc   :  { %3340 = vmatpush3.bf16.msra.mxu1 %v4284_v21 }
 0xffd   :  { %3341 = vmatprep.subr.bf16.mxu1 %v4291_v61 }
0x1000   :  { %3342 = vmatpush3.bf16.msra.mxu1 %v4291_v61 }
0x1001   :  { %3343 = vmatprep.subr.bf16.mxu1 %v4298_v0 }
0x1004   :  { %3344 = vmatpush3.bf16.msra.mxu1 %v4298_v0 }
0x1007   :  { %3346 = vmatmul.mubr.bf16.vlgmr.msra.gmra.mxu1 %v3435_v2 }
0x1039   :  { %v4471_v62 = vpop.xlane.xlu0 %2624 }
0x103d   :  { %v4473_v13 = vpop.xlane.xlu0 %2627 }
0x1041   :  { %v2760_v16 = vpop.permute.xlu0 %2759 }
0x1042   :  { %v2772_v60 = vsel %vm508_vm2, %v2760_v16, 0.0 }
0x1043   :  { %2773 = vadd.xlane.f32.xlu1 %v2772_v60 }
0x1051   :  { %v4476_v21 = vpop.xlane.xlu1 %2621 }
0x1055   :  { %v2758_v61 = vpop.permute.xlu1 %2757 }
0x1056   :  { %v2769_v58 = vsel %vm508_vm2, %v2758_v61, 0.0 }
0x1057   :  { %2770 = vadd.xlane.f32.xlu0 %v2769_v58 }
0x1059   :  { %v2762_v24 = vpop.permute.xlu1 %2761 }
0x105a   :  { %v2775_v0 = vsel %vm508_vm2, %v2762_v24, 0.0 }
0x105b   :  { %2776 = vadd.xlane.f32.xlu0 %v2775_v0 }
0x105d   :  { %v2764_v25 = vpop.permute.xlu1 %2763 }
0x105e   :  { %v2778_v49 = vsel %vm508_vm2, %v2764_v25, 0.0 }
0x105f   :  { %2779 = vadd.xlane.f32.xlu0 %v2778_v49 }
0x109f   :  { %v1900_v27 = vpop.f32.mrf.mxu1 }
0x10a0   :  { %v1901_v29 = vadd.f32 %v2992_v26, %v1900_v27 }
0x10a1   :  { %v3291_v34 = vpop.f32.mrf.mxu1 }
0x10a2   :  { %v1909_v39 = vadd.f32 %v1907_v28, %v1901_v29 }
0x10a3   :  { %v1903_v35 = vpop.f32.mrf.mxu1 }
0x10a4   :  { %1911 = vst.msk [vmem:[#allocation3] sm:$0xff] %vm508_vm2, %v1909_v39  ;;  %v1904_v41 = vadd.f32 %v2992_v26, %v1903_v35 }
0x10a5   :  { %v3292_v44 = vpop.f32.mrf.mxu1 }
0x10a6   :  { %v1910_v47 = vadd.f32 %v1908_v36, %v1904_v41 }
0x10a7   :  { %v2042_v56 = vpop.f32.mrf.mxu1 }
0x10a8   :  { %1912 = vst.msk [vmem:[#allocation3 + $0x8] sm:$0xff] %vm508_vm2, %v1910_v47  ;;  %v2043_v57 = vadd.f32 %v3000_v32, %v2042_v56 }
0x10a9   :  { %v3307_v43 = vpop.f32.mrf.mxu1 }
0x10aa   :  { %v3004_v42 = vmul.f32 -1.442695, %v2043_v57 }
0x10ab   :  { %v2045_v30 = vpop.f32.mrf.mxu1 }
0x10ac   :  { %3508 = vpow2.f32 %v3004_v42 }
0x10ad   :  { %v3308_v55 = vpop.f32.mrf.mxu1 }
0x10b9   :  { %v3509_v31 = vpop.eup %3508 }
0x10ba   :  { %v2051_v63 = vadd.f32 1.0, %v3509_v31 }
0x10bc   :  { %3510 = vrcp.f32 %v2051_v63 }
0x10bd   :  { %3512 = vrsqrt.f32 %v4380_v8 }
0x10c7   :  { %v3347_v3 = vpop.f32.mrf.mxu1 }
0x10c8   :  { %v2251_v5 = vadd.f32 %v3347_v3, %v4317_v33  ;;  %v2315_v3 = vand.u32 2147483648, %v4380_v8 }
0x10c9   :  { %v3511_v6 = vpop.eup %3510  ;;  %v2242_v10 = vpop.f32.mrf.mxu1 }
0x10ca   :  { %2055 = vst.msk [vmem:[%s4843_s27] sm:$0xf] %vm2054_vm0, %v3511_v6  ;;  %2389 = vrot.lane.b32.xlu1 %v2251_v5, %s3642_s30  ;;  %v2243_v37 = vadd.f32 %v4317_v33, %v2242_v10  ;;  %v2319_v50 = vmul.f32 %v2251_v5, %v2251_v5  ;;  %v2259_v17 = vmul.f32 %v2251_v5, %v4347_v54  ;;  %v3513_v30 = vpop.eup %3512  ;;  %s3645_s27 = smov [#allocation3]  }
0x10cb   :  { %v3348_v11 = vpop.f32.mrf.mxu1  ;;  %v2311_v55 = vmul.f32 %v3513_v30, %v4380_v8 }
0x10cc   :  { %v2254_v53 = vadd.f32 %v3348_v11, %v4317_v33  ;;  %v2267_v12 = vsel %vm508_vm2, %v2259_v17, 0.0  ;;  %v2327_v1 = vsel %vm508_vm2, %v2319_v50, 0.0  ;;  %v2317_v2 = vmul.f32 %v2243_v37, %v2243_v37  ;;  %v4529_v58 = vpop.xlane.xlu1 %2773 }
0x10cd   :  { %v2245_v14 = vpop.f32.mrf.mxu1  ;;  %v2257_v16 = vmul.f32 %v2243_v37, %v4337_v51  ;;  %v2313_v31 = vsel %vm2312_vm1, %v4380_v8, %v2311_v55 }
0x10ce   :  { %v2246_v15 = vadd.f32 %v4317_v33, %v2245_v14  ;;  %2565 = vrot.lane.b32.xlu1 %v2251_v5, %s3644_s17  ;;  %v2260_v19 = vmul.f32 %v2254_v53, %v4340_v52  ;;  %v2320_v18 = vmul.f32 %v2254_v53, %v2254_v53  ;;  %v2321_v27 = vsel %vm508_vm2, %v2317_v2, 0.0 }
0x10cf   :  { %v2261_v26 = vsel %vm508_vm2, %v2257_v16, 0.0  ;;  %v2316_v10 = vsel %vm2314_vm5, %v2315_v3, %v2313_v31  ;;  %vm2473_vm5 = vcmp.eq.f32.partialorder %v4410_v38, inf }
0x10d0   :  { %2387 = vrot.lane.b32.xlu0 %v2246_v15, %s3642_s30  ;;  %v2270_v23 = vsel %vm508_vm2, %v2260_v19, 0.0  ;;  %v2330_v59 = vsel %vm508_vm2, %v2320_v18, 0.0  ;;  %v2318_v22 = vmul.f32 %v2246_v15, %v2246_v15  ;;  %v2258_v33 = vmul.f32 %v2246_v15, %v4325_v40 }
0x10d2   :  { %2385 = vrot.lane.b32.xlu1 %v2243_v37, %s3642_s30  ;;  %v2264_v60 = vsel %vm508_vm2, %v2258_v33, 0.0  ;;  %v2324_v61 = vsel %vm508_vm2, %v2318_v22, 0.0 }
0x10d4   :  { %2563 = vrot.lane.b32.xlu0 %v2246_v15, %s3644_s17 }
0x10d6   :  { %2493 = vrot.lane.b32.xlu1 %v2319_v50, %s3643_s29 }
0x10da   :  { %2561 = vrot.lane.b32.xlu1 %v2243_v37, %s3644_s17 }
0x10de   :  { %2661 = vrot.lane.b32.xlu1 %v2319_v50, %s3642_s30 }
0x10e0   :  { %v4537_v29 = vpop.xlane.xlu0 %2770 }
0x10e2   :  { %2737 = vrot.lane.b32.xlu1 %v2259_v17, %s3644_s17 }
0x10e4   :  { %v4539_v39 = vpop.xlane.xlu0 %2776 }
0x10e6   :  { %2813 = vrot.lane.b32.xlu1 %v2319_v50, %s3644_s17  ;;  %v2364_v50 = vmax.f32 %v2316_v10, 1e-08 }
0x10e8   :  { %v4542_v36 = vpop.xlane.xlu0 %2779 }
0x10f3   :  { %2271 = vadd.xlane.f32.xlu0 %v2270_v23 }
0x10f7   :  { %2331 = vadd.xlane.f32.xlu0 %v2330_v59 }
0x110a   :  { %2268 = vadd.xlane.f32.xlu1 %v2267_v12 }
0x110d   :  { %2491 = vrot.lane.b32.xlu0 %v2318_v22, %s3643_s29 }
0x110e   :  { %2328 = vadd.xlane.f32.xlu1 %v2327_v1 }
0x1111   :  { %2659 = vrot.lane.b32.xlu0 %v2318_v22, %s3642_s30 }
0x1115   :  { %2735 = vrot.lane.b32.xlu0 %v2258_v33, %s3644_s17 }
0x1119   :  { %2811 = vrot.lane.b32.xlu0 %v2318_v22, %s3644_s17 }
0x111f   :  { %2391 = vrot.lane.b32.xlu1 %v2254_v53, %s3642_s30 }
0x1123   :  { %2489 = vrot.lane.b32.xlu1 %v2317_v2, %s3643_s29 }
0x1127   :  { %2567 = vrot.lane.b32.xlu1 %v2254_v53, %s3644_s17 }
0x112b   :  { %2657 = vrot.lane.b32.xlu1 %v2317_v2, %s3642_s30 }
0x112f   :  { %2733 = vrot.lane.b32.xlu1 %v2257_v16, %s3644_s17 }
0x1133   :  { %2809 = vrot.lane.b32.xlu1 %v2317_v2, %s3644_s17 }
0x1138   :  { %2265 = vadd.xlane.f32.xlu0 %v2264_v60 }
0x113c   :  { %2325 = vadd.xlane.f32.xlu0 %v2324_v61  ;;  %v2390_v24 = vpop.permute.xlu1 %2389  ;;  %v2308_v61 = vand.u32 2147483648, %v4384_v20 }
0x113d   :  { %v2399_v0 = vmul.f32 %v2390_v24, %v4347_v54 }
0x1140   :  { %v2566_v25 = vpop.permute.xlu1 %2565 }
0x1141   :  { %v2575_v49 = vmul.f32 %v2566_v25, %v4347_v54 }
0x1142   :  { %v4545_v54 = vpop.permute.xlu0 %2387 }
0x1144   :  { %v2386_v28 = vpop.permute.xlu1 %2385 }
0x1145   :  { %v2397_v14 = vmul.f32 %v2386_v28, %v4337_v51 }
0x1146   :  { %v4549_v32 = vpop.permute.xlu0 %2563 }
0x1148   :  { %v2494_v34 = vpop.permute.xlu1 %2493 }
0x1149   :  { %v2507_v44 = vsel %vm508_vm2, %v2494_v34, 0.0 }
0x114c   :  { %v2562_v35 = vpop.permute.xlu1 %2561 }
0x114d   :  { %v2573_v8 = vmul.f32 %v2562_v35, %v4337_v51 }
0x1150   :  { %v2662_v41 = vpop.permute.xlu1 %2661 }
0x1151   :  { %v2675_v47 = vsel %vm508_vm2, %v2662_v41, 0.0 }
0x1152   :  { %2409 = vrot.lane.b32.xlu0 %v2399_v0, %s3642_s30 }
0x1154   :  { %v2738_v56 = vpop.permute.xlu1 %2737 }
0x1155   :  { %v2751_v57 = vsel %vm508_vm2, %v2738_v56, 0.0 }
0x1156   :  { %2585 = vrot.lane.b32.xlu0 %v2575_v49, %s3643_s29 }
0x1157   :  { %2262 = vadd.xlane.f32.xlu1 %v2261_v26  ;;  %v2398_v26 = vmul.f32 %v4545_v54, %v4325_v40 }
0x1158   :  { %v4560_v5 = vpop.permute.xlu1 %2813 }
0x115b   :  { %2322 = vadd.xlane.f32.xlu1 %v2321_v27 }
0x116c   :  { %2495 = vrot.lane.b32.xlu1 %v2320_v18, %s3643_s29 }
0x1170   :  { %2663 = vrot.lane.b32.xlu1 %v2320_v18, %s3642_s30 }
0x1174   :  { %2739 = vrot.lane.b32.xlu1 %v2260_v19, %s3644_s17 }
0x1175   :  { %2508 = vadd.xlane.f32.xlu0 %v2507_v44 }
0x1178   :  { %2815 = vrot.lane.b32.xlu1 %v2320_v18, %s3644_s17 }
0x1179   :  { %2676 = vadd.xlane.f32.xlu0 %v2675_v47 }
0x117c   :  { %v2272_v43 = vpop.xlane.xlu0 %2271 }
0x117d   :  { %2752 = vadd.xlane.f32.xlu0 %v2751_v57 }
0x1180   :  { %v2332_v42 = vpop.xlane.xlu0 %2331 }
0x1181   :  { %3514 = vrsqrt.f32 %v2332_v42  ;;  %vm2356_vm8 = vcmp.eq.f32.partialorder %v2332_v42, inf  ;;  %v2359_v11 = vand.u32 2147483648, %v2332_v42  ;;  %vm2358_vm14 = vcmp.eq.f32.partialorder %v2332_v42, 0.0 }
0x1182   :  { %3516 = vrsqrt.f32 %v4384_v20 }
0x1184   :  { %v2492_v35 = vpop.permute.xlu0 %2491 }
0x1188   :  { %v2660_v44 = vpop.permute.xlu0 %2659 }
0x118c   :  { %v2736_v54 = vpop.permute.xlu0 %2735 }
0x118e   :  { %v3515_v63 = vpop.eup %3514 }
0x118f   :  { %v2355_v6 = vmul.f32 %v3515_v63, %v2332_v42  ;;  %v3517_v12 = vpop.eup %3516 }
0x1190   :  { %v2304_v1 = vmul.f32 %v3517_v12, %v4384_v20  ;;  %v4588_v55 = vpop.permute.xlu0 %2811  ;;  %v2748_v12 = vsel %vm508_vm2, %v2736_v54, 0.0 }
0x1191   :  { %v2357_v15 = vsel %vm2356_vm8, %v2332_v42, %v2355_v6  ;;  %vm2475_vm8 = vcmp.eq.f32.partialorder %v4410_v38, 0.0 }
0x1192   :  { %v2360_v37 = vsel %vm2358_vm14, %v2359_v11, %v2357_v15  ;;  %v2306_v51 = vsel %vm2305_vm15, %v4384_v20, %v2304_v1  ;;  %v2574_v20 = vmul.f32 %v4549_v32, %v4325_v40  ;;  %v2504_v11 = vsel %vm508_vm2, %v2492_v35, 0.0 }
0x1193   :  { %v2368_v17 = vmax.f32 %v2360_v37, 1e-08  ;;  %2405 = vrot.lane.b32.xlu0 %v2397_v14, %s3642_s30  ;;  %v2269_v53 = vpop.xlane.xlu1 %2268  ;;  %v2309_v25 = vsel %vm2307_vm3, %v2308_v61, %v2306_v51  ;;  %v2301_v37 = vand.u32 2147483648, %v4378_v7  ;;  %vm2645_vm14 = vcmp.eq.f32.partialorder %v4471_v62, inf }
0x1195   :  { %v2372_v19 = vmul.f32 %v2368_v17, %v2364_v50 }
0x1197   :  { %3518 = vrcp.f32 %v2372_v19  ;;  %2581 = vrot.lane.b32.xlu0 %v2573_v8, %s3643_s29  ;;  %v2329_v18 = vpop.xlane.xlu1 %2328 }
0x1198   :  { %3520 = vrsqrt.f32 %v2329_v18  ;;  %vm2349_vm4 = vcmp.eq.f32.partialorder %v2329_v18, inf  ;;  %v2352_v49 = vand.u32 2147483648, %v2329_v18  ;;  %vm2351_vm6 = vcmp.eq.f32.partialorder %v2329_v18, 0.0 }
0x119b   :  { %v2392_v23 = vpop.permute.xlu1 %2391 }
0x119c   :  { %v2400_v59 = vmul.f32 %v2392_v23, %v4340_v52 }
0x119e   :  { %2411 = vrot.lane.b32.xlu1 %v2400_v59, %s3642_s30 }
0x119f   :  { %v2490_v22 = vpop.permute.xlu1 %2489 }
0x11a0   :  { %v2501_v56 = vsel %vm508_vm2, %v2490_v22, 0.0 }
0x11a3   :  { %v2568_v33 = vpop.permute.xlu1 %2567 }
0x11a4   :  { %v3519_v2 = vpop.eup %3518  ;;  %v2576_v16 = vmul.f32 %v2568_v33, %v4340_v52  ;;  %v2363_v52 = vmax.f32 %v2309_v25, 1e-08 }
0x11a5   :  { %v3521_v60 = vpop.eup %3520  ;;  %v4574_v24 = vmul.f32 %v3519_v2, %v2272_v43 }
0x11a6   :  { %v2348_v0 = vmul.f32 %v3521_v60, %v2329_v18  ;;  %2587 = vrot.lane.b32.xlu1 %v2576_v16, %s3643_s29 }
0x11a7   :  { %v2658_v47 = vpop.permute.xlu1 %2657 }
0x11a8   :  { %v2350_v27 = vsel %vm2349_vm4, %v2329_v18, %v2348_v0  ;;  %v2669_v43 = vsel %vm508_vm2, %v2658_v47, 0.0  ;;  %vm2647_vm4 = vcmp.eq.f32.partialorder %v4471_v62, 0.0 }
0x11a9   :  { %v2353_v28 = vsel %vm2351_vm6, %v2352_v49, %v2350_v27 }
0x11aa   :  { %v2367_v34 = vmax.f32 %v2353_v28, 1e-08  ;;  %2407 = vrot.lane.b32.xlu1 %v2398_v26, %s3642_s30  ;;  %s2910_s30 = sshll.u32 %s3645_s27, 4  ;;  %s2911_s30 = int_to_ptr.vmem [resolvable:$true] %s2910_s30 }
0x11ab   :  { %v2734_v57 = vpop.permute.xlu1 %2733  ;;  %p3613_p1 = scmp.lt.s32.totalorder %s2911_s30, %s2911_s30 }
0x11ac   :  { %v2371_v41 = vmul.f32 %v2367_v34, %v2363_v52  ;;  %v2745_v40 = vsel %vm508_vm2, %v2734_v57, 0.0  ;;  %v2294_v34 = vand.u32 2147483648, %v4382_v9 }
0x11ae   :  { %3522 = vrcp.f32 %v2371_v41  ;;  %2583 = vrot.lane.b32.xlu1 %v2574_v20, %s3643_s29  ;;  %s3608_s29 = scalar_lea.vmem %s2911_s30, 256 }
0x11af   :  { %3524 = vrsqrt.f32 %v4378_v7  ;;  %v2810_v32 = vpop.permute.xlu1 %2809  ;;  %p3609_p0 = scmp.ne.s32.totalorder %s2911_s30, %s3608_s29  ;;  %p3614_p2 = scmp.lt.s32.totalorder %s3608_s29, %s3608_s29 }
0x11b0   :  { %v2821_v31 = vsel %vm508_vm2, %v2810_v32, 0.0 }
0x11b1   :  { %p3615_p3 = por %p3614_p2, %p3613_p1 }
0x11b3   :  { %p3616_p4 = pnand %p3615_p3, %p3609_p0 }
0x11b6   :  { %2502 = vadd.xlane.f32.xlu0 %v2501_v56 }
0x11ba   :  { %2670 = vadd.xlane.f32.xlu0 %v2669_v43 }
0x11bb   :  { %v3523_v42 = vpop.eup %3522 }
0x11bc   :  { %v4586_v30 = vmul.f32 %v3523_v42, %v2269_v53  ;;  %v3525_v6 = vpop.eup %3524  ;;  %v2672_v53 = vsel %vm508_vm2, %v2660_v44, 0.0 }
0x11bd   :  { %v2297_v10 = vmul.f32 %v3525_v6, %v4378_v7 }
0x11be   :  { %2746 = vadd.xlane.f32.xlu0 %v2745_v40 }
0x11bf   :  { %v2299_v14 = vsel %vm2298_vm7, %v4378_v7, %v2297_v10 }
0x11c0   :  { %v2302_v17 = vsel %vm2300_vm9, %v2301_v37, %v2299_v14 }
0x11c1   :  { %v2266_v63 = vpop.xlane.xlu0 %2265  ;;  %v2362_v23 = vmax.f32 %v2302_v17, 1e-08 }
0x11c2   :  { %2822 = vadd.xlane.f32.xlu0 %v2821_v31 }
0x11c5   :  { %v2326_v3 = vpop.xlane.xlu0 %2325 }
0x11c6   :  { %3526 = vrsqrt.f32 %v2326_v3  ;;  %vm2342_vm10 = vcmp.eq.f32.partialorder %v2326_v3, inf  ;;  %v2345_v8 = vand.u32 2147483648, %v2326_v3  ;;  %vm2344_vm11 = vcmp.eq.f32.partialorder %v2326_v3, 0.0 }
0x11c9   :  { %v2410_v49 = vpop.permute.xlu0 %2409 }
0x11ca   :  { %v2423_v44 = vsel %vm508_vm2, %v2410_v49, 0.0 }
0x11cd   :  { %v2586_v56 = vpop.permute.xlu0 %2585 }
0x11ce   :  { %v2599_v42 = vsel %vm508_vm2, %v2586_v56, 0.0 }
0x11d2   :  { %2505 = vadd.xlane.f32.xlu1 %v2504_v11 }
0x11d3   :  { %v3527_v15 = vpop.eup %3526 }
0x11d4   :  { %v2341_v50 = vmul.f32 %v3527_v15, %v2326_v3 }
0x11d6   :  { %v2343_v19 = vsel %vm2342_vm10, %v2326_v3, %v2341_v50  ;;  %2673 = vadd.xlane.f32.xlu1 %v2672_v53  ;;  %v2476_v53 = vand.u32 2147483648, %v4410_v38 }
0x11d7   :  { %v2346_v18 = vsel %vm2344_vm11, %v2345_v8, %v2343_v19 }
0x11d8   :  { %v2366_v59 = vmax.f32 %v2346_v18, 1e-08 }
0x11da   :  { %v2370_v22 = vmul.f32 %v2366_v59, %v2362_v23  ;;  %2749 = vadd.xlane.f32.xlu1 %v2748_v12 }
0x11dc   :  { %3528 = vrcp.f32 %v2370_v22 }
0x11dd   :  { %3530 = vrsqrt.f32 %v4382_v9 }
0x11e0   :  { %v2263_v7 = vpop.xlane.xlu1 %2262 }
0x11e4   :  { %v2323_v1 = vpop.xlane.xlu1 %2322 }
0x11e5   :  { %3532 = vrsqrt.f32 %v2323_v1  ;;  %vm2335_vm0 = vcmp.eq.f32.partialorder %v2323_v1, inf  ;;  %v2338_v41 = vand.u32 2147483648, %v2323_v1  ;;  %vm2337_vm1 = vcmp.eq.f32.partialorder %v2323_v1, 0.0 }
0x11e6   :  { %3534 = vrsqrt.f32 %v4410_v38 }
0x11e7   :  { %3536 = vrsqrt.f32 %v4471_v62 }
0x11e8   :  { %v2496_v33 = vpop.permute.xlu1 %2495 }
0x11e9   :  { %v3529_v2 = vpop.eup %3528  ;;  %v2510_v51 = vsel %vm508_vm2, %v2496_v33, 0.0  ;;  %v2648_v33 = vand.u32 2147483648, %v4471_v62 }
0x11ea   :  { %v3531_v16 = vpop.eup %3530  ;;  %2511 = vadd.xlane.f32.xlu0 %v2510_v51  ;;  %v4603_v60 = vmul.f32 %v3529_v2, %v2266_v63 }
0x11eb   :  { %v2290_v0 = vmul.f32 %v3531_v16, %v4382_v9 }
0x11ec   :  { %v2664_v61 = vpop.permute.xlu1 %2663 }
0x11ed   :  { %v2678_v25 = vsel %vm508_vm2, %v2664_v61, 0.0  ;;  %v2292_v27 = vsel %vm2291_vm12, %v4382_v9, %v2290_v0 }
0x11ee   :  { %2679 = vadd.xlane.f32.xlu0 %v2678_v25  ;;  %v2295_v20 = vsel %vm2293_vm13, %v2294_v34, %v2292_v27 }
0x11ef   :  { %v2361_v57 = vmax.f32 %v2295_v20, 1e-08 }
0x11f0   :  { %v2740_v26 = vpop.permute.xlu1 %2739 }
0x11f1   :  { %v2754_v28 = vsel %vm508_vm2, %v2740_v26, 0.0 }
0x11f2   :  { %v3533_v52 = vpop.eup %3532  ;;  %2755 = vadd.xlane.f32.xlu0 %v2754_v28 }
0x11f3   :  { %v2334_v35 = vmul.f32 %v3533_v52, %v2323_v1  ;;  %v3535_v31 = vpop.eup %3534 }
0x11f4   :  { %v3537_v3 = vpop.eup %3536  ;;  %v2472_v6 = vmul.f32 %v3535_v31, %v4410_v38  ;;  %v2816_v8 = vpop.permute.xlu1 %2815 }
0x11f5   :  { %v2336_v47 = vsel %vm2335_vm0, %v2323_v1, %v2334_v35  ;;  %v2644_v37 = vmul.f32 %v3537_v3, %v4471_v62 }
0x11f6   :  { %v2339_v54 = vsel %vm2337_vm1, %v2338_v41, %v2336_v47  ;;  %2424 = vadd.xlane.f32.xlu0 %v2423_v44  ;;  %v2474_v15 = vsel %vm2473_vm5, %v4410_v38, %v2472_v6  ;;  %v2827_v44 = vsel %vm508_vm2, %v4560_v5, 0.0 }
0x11f7   :  { %v2365_v43 = vmax.f32 %v2339_v54, 1e-08  ;;  %v2477_v18 = vsel %vm2475_vm8, %v2476_v53, %v2474_v15  ;;  %v2646_v12 = vsel %vm2645_vm14, %v4471_v62, %v2644_v37  ;;  %v2830_v54 = vsel %vm508_vm2, %v2816_v8, 0.0 }
0x11f8   :  { %v2543_v38 = vmax.f32 %v2477_v18, 1e-08  ;;  %v2649_v0 = vsel %vm2647_vm4, %v2648_v33, %v2646_v12 }
0x11f9   :  { %v2369_v40 = vmul.f32 %v2365_v43, %v2361_v57  ;;  %v2711_v52 = vmax.f32 %v2649_v0, 1e-08  ;;  %v2824_v43 = vsel %vm508_vm2, %v4588_v55, 0.0 }
0x11fa   :  { %2600 = vadd.xlane.f32.xlu0 %v2599_v42 }
0x11fb   :  { %3538 = vrcp.f32 %v2369_v40 }
0x11fe   :  { %v2509_v9 = vpop.xlane.xlu0 %2508 }
0x11ff   :  { %3540 = vrsqrt.f32 %v2509_v9  ;;  %vm2529_vm15 = vcmp.eq.f32.partialorder %v2509_v9, inf  ;;  %v2532_v23 = vand.u32 2147483648, %v2509_v9  ;;  %vm2531_vm3 = vcmp.eq.f32.partialorder %v2509_v9, 0.0 }
0x1202   :  { %v2677_v32 = vpop.xlane.xlu0 %2676 }
0x1203   :  { %3542 = vrsqrt.f32 %v2677_v32  ;;  %vm2697_vm6 = vcmp.eq.f32.partialorder %v2677_v32, inf  ;;  %v2700_v25 = vand.u32 2147483648, %v2677_v32  ;;  %vm2699_vm7 = vcmp.eq.f32.partialorder %v2677_v32, 0.0 }
0x1206   :  { %v4616_v63 = vpop.xlane.xlu0 %2752 }
0x1208   :  { %v3539_v10 = vpop.eup %3538 }
0x1209   :  { %v4619_v11 = vmul.f32 %v3539_v10, %v2263_v7 }
0x120a   :  { %v2406_v14 = vpop.permute.xlu0 %2405 }
0x120b   :  { %v2417_v50 = vsel %vm508_vm2, %v2406_v14, 0.0 }
0x120c   :  { %v3541_v17 = vpop.eup %3540  ;;  %2418 = vadd.xlane.f32.xlu0 %v2417_v50 }
0x120d   :  { %v2528_v19 = vmul.f32 %v3541_v17, %v2509_v9 }
0x120e   :  { %v2582_v59 = vpop.permute.xlu0 %2581 }
0x120f   :  { %v2530_v22 = vsel %vm2529_vm15, %v2509_v9, %v2528_v19  ;;  %v2593_v7 = vsel %vm508_vm2, %v2582_v59, 0.0 }
0x1210   :  { %v3543_v1 = vpop.eup %3542  ;;  %v2533_v2 = vsel %vm2531_vm3, %v2532_v23, %v2530_v22  ;;  %2594 = vadd.xlane.f32.xlu0 %v2593_v7  ;;  %v2412_v51 = vpop.permute.xlu1 %2411 }
0x1211   :  { %v2547_v16 = vmax.f32 %v2533_v2, 1e-08  ;;  %v2696_v61 = vmul.f32 %v3543_v1, %v2677_v32  ;;  %v2426_v26 = vsel %vm508_vm2, %v2412_v51, 0.0 }
0x1213   :  { %v2698_v49 = vsel %vm2697_vm6, %v2677_v32, %v2696_v61  ;;  %v2551_v27 = vmul.f32 %v2547_v16, %v2543_v38 }
0x1214   :  { %v2701_v28 = vsel %vm2699_vm7, %v2700_v25, %v2698_v49  ;;  %2427 = vadd.xlane.f32.xlu0 %v2426_v26 }
0x1215   :  { %v2715_v34 = vmax.f32 %v2701_v28, 1e-08 }
0x1217   :  { %v2719_v35 = vmul.f32 %v2715_v34, %v2711_v52 }
0x1218   :  { %v2588_v20 = vpop.permute.xlu1 %2587 }
0x1219   :  { %v2602_v41 = vsel %vm508_vm2, %v2588_v20, 0.0 }
0x121a   :  { %2603 = vadd.xlane.f32.xlu0 %v2602_v41 }
0x121c   :  { %v2408_v62 = vpop.permute.xlu1 %2407 }
0x121d   :  { %v2420_v47 = vsel %vm508_vm2, %v2408_v62, 0.0 }
0x121e   :  { %2828 = vadd.xlane.f32.xlu0 %v2827_v44  ;;  %2421 = vadd.xlane.f32.xlu1 %v2420_v47 }
0x1220   :  { %v2584_v56 = vpop.permute.xlu1 %2583 }
0x1221   :  { %v2596_v57 = vsel %vm508_vm2, %v2584_v56, 0.0 }
0x1222   :  { %2831 = vadd.xlane.f32.xlu0 %v2830_v54  ;;  %2597 = vadd.xlane.f32.xlu1 %v2596_v57 }
0x1226   :  { %2825 = vadd.xlane.f32.xlu1 %v2824_v43 }
0x123f   :  { %v4641_v42 = vpop.xlane.xlu0 %2502 }
0x1243   :  { %v4643_v5 = vpop.xlane.xlu0 %2670 }
0x1244   :  { %3619 = shalt.err (!%p3616_p4)
}
0x1245   :  { %s3646_s2 = smov 128   ;;  %3544 = vrsqrt.f32 %v4413_v45  ;;  %vm2459_vm2 = vcmp.eq.f32.partialorder %v4413_v45, inf  ;;  %v2462_v37 = vand.u32 2147483648, %v4413_v45  ;;  %vm2461_vm9 = vcmp.eq.f32.partialorder %v4413_v45, 0.0 }
0x1246   :  { %2916 = dma.vmem_to_hbm [thread:$0]  %s2911_s30, 256, %s4842_s26, [#allocation4], %s3646_s2, %s3646_s2, %s3639_s8   ;;  %3546 = vrsqrt.f32 %v4641_v42  ;;  %vm2515_vm10 = vcmp.eq.f32.partialorder %v4641_v42, inf  ;;  %vm2480_vm11 = vcmp.eq.f32.partialorder %v4415_v46, inf  ;;  %v2518_v7 = vand.u32 2147483648, %v4641_v42 }
0x1247   :  { %v4650_v55 = vpop.xlane.xlu0 %2746  ;;  %3548 = vrsqrt.f32 %v4469_v48  ;;  %vm2631_vm12 = vcmp.eq.f32.partialorder %v4469_v48, inf  ;;  %vm2633_vm13 = vcmp.eq.f32.partialorder %v4469_v48, 0.0  ;;  %vm2517_vm0 = vcmp.eq.f32.partialorder %v4641_v42, 0.0 }
0x1248   :  { %3550 = vrsqrt.f32 %v4537_v29  ;;  %v2634_v16 = vand.u32 2147483648, %v4469_v48  ;;  %vm2783_vm5 = vcmp.eq.f32.partialorder %v4537_v29, inf  ;;  %vm2683_vm8 = vcmp.eq.f32.partialorder %v4643_v5, inf }
0x1249   :  { %v2686_v52 = vand.u32 2147483648, %v4643_v5  ;;  %vm2881_vm15 = vcmask 7168   ;;  %vm2685_vm3 = vcmp.eq.f32.partialorder %v4643_v5, 0.0  ;;  %vm2785_vm4 = vcmp.eq.f32.partialorder %v4537_v29, 0.0 }
0x124a   :  { %vm2886_vm6 = vcmask 15360  }
0x124b   :  { %v4653_v40 = vpop.xlane.xlu0 %2822 }
0x124c   :  { %3552 = vrsqrt.f32 %v4653_v40  ;;  %vm2835_vm1 = vcmp.eq.f32.partialorder %v4653_v40, inf  ;;  %v2838_v26 = vand.u32 2147483648, %v4653_v40  ;;  %vm2837_vm14 = vcmp.eq.f32.partialorder %v4653_v40, 0.0 }
0x124d   :  { %3554 = vrsqrt.f32 %v4643_v5 }
0x124e   :  { %3556 = vrsqrt.f32 %v4415_v46 }
0x124f   :  { %3558 = vrcp.f32 %v2551_v27 }
0x1252   :  { %v3545_v9 = vpop.eup %3544 }
0x1253   :  { %v2458_v32 = vmul.f32 %v3545_v9, %v4413_v45  ;;  %v3547_v31 = vpop.eup %3546 }
0x1254   :  { %v3549_v6 = vpop.eup %3548  ;;  %v2514_v50 = vmul.f32 %v3547_v31, %v4641_v42 }
0x1255   :  { %v2460_v10 = vsel %vm2459_vm2, %v4413_v45, %v2458_v32  ;;  %v3551_v15 = vpop.eup %3550  ;;  %v2630_v23 = vmul.f32 %v3549_v6, %v4469_v48 }
0x1256   :  { %v2463_v8 = vsel %vm2461_vm9, %v2462_v37, %v2460_v10  ;;  %v2516_v59 = vsel %vm2515_vm10, %v4641_v42, %v2514_v50  ;;  %v2782_v22 = vmul.f32 %v3551_v15, %v4537_v29  ;;  %vm2482_vm9 = vcmp.eq.f32.partialorder %v4415_v46, 0.0 }
0x1257   :  { %v2541_v12 = vmax.f32 %v2463_v8, 1e-08  ;;  %v2632_v38 = vsel %vm2631_vm12, %v4469_v48, %v2630_v23  ;;  %v2519_v61 = vsel %vm2517_vm0, %v2518_v7, %v2516_v59 }
0x1258   :  { %v2784_v25 = vsel %vm2783_vm5, %v4537_v29, %v2782_v22  ;;  %v2545_v28 = vmax.f32 %v2519_v61, 1e-08  ;;  %v2635_v47 = vsel %vm2633_vm13, %v2634_v16, %v2632_v38  ;;  %vm2654_vm13 = vcmp.eq.f32.partialorder %v4473_v13, 0.0 }
0x1259   :  { %v3553_v17 = vpop.eup %3552 }
0x125a   :  { %v3555_v53 = vpop.eup %3554  ;;  %v2834_v45 = vmul.f32 %v3553_v17, %v4653_v40  ;;  %v2549_v48 = vmul.f32 %v2545_v28, %v2541_v12 }
0x125b   :  { %v4665_v14 = vpop.xlane.xlu1 %2505  ;;  %v3557_v18 = vpop.eup %3556  ;;  %v2682_v1 = vmul.f32 %v3555_v53, %v4643_v5  ;;  %v2709_v53 = vmax.f32 %v2635_v47, 1e-08 }
0x125c   :  { %v2479_v2 = vmul.f32 %v3557_v18, %v4415_v46  ;;  %v2836_v0 = vsel %vm2835_vm1, %v4653_v40, %v2834_v45  ;;  %v3559_v27 = vpop.eup %3558  ;;  %vm2522_vm0 = vcmp.eq.f32.partialorder %v4665_v14, inf  ;;  %vm2466_vm1 = vcmp.eq.f32.partialorder %v4407_v4, inf }
0x125d   :  { %v2684_v49 = vsel %vm2683_vm8, %v4643_v5, %v2682_v1  ;;  %v2839_v20 = vsel %vm2837_vm14, %v2838_v26, %v2836_v0  ;;  %v2655_v0 = vand.u32 2147483648, %v4473_v13  ;;  %vm2524_vm5 = vcmp.eq.f32.partialorder %v4665_v14, 0.0 }
0x125e   :  { %v2481_v44 = vsel %vm2480_vm11, %v4415_v46, %v2479_v2  ;;  %v2687_v56 = vsel %vm2685_vm3, %v2686_v52, %v2684_v49  ;;  %v2865_v40 = vmax.f32 %v2839_v20, 1e-08  ;;  %vm2652_vm11 = vcmp.eq.f32.partialorder %v4473_v13, inf }
0x125f   :  { %v4685_v33 = vpop.xlane.xlu1 %2673  ;;  %v2713_v6 = vmax.f32 %v2687_v56, 1e-08  ;;  %vm2468_vm14 = vcmp.eq.f32.partialorder %v4407_v4, 0.0  ;;  %vm2638_vm3 = vcmp.eq.f32.partialorder %v4476_v21, inf }
0x1260   :  { %vm2690_vm8 = vcmp.eq.f32.partialorder %v4685_v33, inf  ;;  %v2693_v47 = vand.u32 2147483648, %v4685_v33 }
0x1273   :  { %v4662_v3 = vpop.xlane.xlu0 %2511 }
0x1274   :  { %3560 = vrsqrt.f32 %v4662_v3  ;;  %vm2536_vm7 = vcmp.eq.f32.partialorder %v4662_v3, inf  ;;  %v2539_v9 = vand.u32 2147483648, %v4662_v3  ;;  %vm2538_vm2 = vcmp.eq.f32.partialorder %v4662_v3, 0.0 }
0x1275   :  { %3562 = vrsqrt.f32 %v4473_v13 }
0x1276   :  { %3564 = vrcp.f32 %v2719_v35  ;;  %v2786_v35 = vand.u32 2147483648, %v4537_v29 }
0x1277   :  { %3566 = vrsqrt.f32 %v4407_v4  ;;  %v4673_v19 = vpop.xlane.xlu0 %2679 }
0x1278   :  { %3568 = vrsqrt.f32 %v4673_v19  ;;  %v2787_v57 = vsel %vm2785_vm4, %v2786_v35, %v2784_v25  ;;  %vm2704_vm10 = vcmp.eq.f32.partialorder %v4673_v19, inf  ;;  %v2707_v7 = vand.u32 2147483648, %v4673_v19 }
0x1279   :  { %3570 = vrsqrt.f32 %v4665_v14  ;;  %v2861_v37 = vmax.f32 %v2787_v57, 1e-08  ;;  %vm2706_vm12 = vcmp.eq.f32.partialorder %v4673_v19, 0.0  ;;  %v2469_v35 = vand.u32 2147483648, %v4407_v4 }
0x127a   :  { %3572 = vrsqrt.f32 %v4685_v33  ;;  %vm2692_vm4 = vcmp.eq.f32.partialorder %v4685_v33, 0.0 }
0x127b   :  { %v4691_v51 = vpop.xlane.xlu0 %2755  ;;  %3574 = vrsqrt.f32 %v4476_v21  ;;  %v2869_v45 = vmul.f32 %v2865_v40, %v2861_v37 }
0x127c   :  { %3576 = vrcp.f32 %v2549_v48 }
0x127d   :  { %3578 = vrcp.f32 %v2869_v45 }
0x127f   :  { %v2425_v34 = vpop.xlane.xlu0 %2424 }
0x1280   :  { %v2559_v41 = vmul.f32 %v3559_v27, %v2425_v34 }
0x1281   :  { %v3561_v62 = vpop.eup %3560 }
0x1282   :  { %v3563_v54 = vpop.eup %3562  ;;  %v2535_v43 = vmul.f32 %v3561_v62, %v4662_v3  ;;  %v2884_v42 = vsel %vm2881_vm15, %v4586_v30, %v2559_v41  ;;  %v2483_v30 = vand.u32 2147483648, %v4415_v46  ;;  %v2717_v46 = vmul.f32 %v2713_v6, %v2709_v53 }
0x1283   :  { %v3565_v5 = vpop.eup %3564  ;;  %v2601_v32 = vpop.xlane.xlu0 %2600  ;;  %v2651_v8 = vmul.f32 %v3563_v54, %v4473_v13 }
0x1284   :  { %v3567_v31 = vpop.eup %3566  ;;  %v2537_v29 = vsel %vm2536_vm7, %v4662_v3, %v2535_v43  ;;  %v2727_v10 = vmul.f32 %v3565_v5, %v2601_v32  ;;  %v2484_v59 = vsel %vm2482_vm9, %v2483_v30, %v2481_v44  ;;  %3580 = vrcp.f32 %v2717_v46 }
0x1285   :  { %v3569_v15 = vpop.eup %3568  ;;  %v2540_v50 = vsel %vm2538_vm2, %v2539_v9, %v2537_v29  ;;  %v2544_v2 = vmax.f32 %v2484_v59, 1e-08  ;;  %v2653_v38 = vsel %vm2652_vm11, %v4473_v13, %v2651_v8  ;;  %v2465_v61 = vmul.f32 %v3567_v31, %v4407_v4  ;;  %v4768_v59 = vpop.xlane.xlu1 %2749 }
0x1286   :  { %v3571_v17 = vpop.eup %3570  ;;  %v2703_v18 = vmul.f32 %v3569_v15, %v4673_v19  ;;  %v4726_v23 = vsel %vm2886_vm6, %v2884_v42, %v2727_v10  ;;  %v2548_v3 = vmax.f32 %v2540_v50, 1e-08  ;;  %v2656_v26 = vsel %vm2654_vm13, %v2655_v0, %v2653_v38 }
0x1287   :  { %v2521_v22 = vmul.f32 %v3571_v17, %v4665_v14  ;;  %v3573_v1 = vpop.eup %3572  ;;  %v2467_v34 = vsel %vm2466_vm1, %v4407_v4, %v2465_v61  ;;  %v2712_v20 = vmax.f32 %v2656_v26, 1e-08  ;;  %vm2640_vm7 = vcmp.eq.f32.partialorder %v4476_v21, 0.0 }
0x1288   :  { %v2705_v12 = vsel %vm2704_vm10, %v4673_v19, %v2703_v18  ;;  %v3575_v16 = vpop.eup %3574  ;;  %v2552_v49 = vmul.f32 %v2548_v3, %v2544_v2  ;;  %v2689_v28 = vmul.f32 %v3573_v1, %v4685_v33  ;;  %v2525_v19 = vand.u32 2147483648, %v4665_v14 }
0x1289   :  { %v2708_v25 = vsel %vm2706_vm12, %v2707_v7, %v2705_v12  ;;  %v2523_v27 = vsel %vm2522_vm0, %v4665_v14, %v2521_v22  ;;  %v2637_v13 = vmul.f32 %v3575_v16, %v4476_v21  ;;  %v2470_v44 = vsel %vm2468_vm14, %v2469_v35, %v2467_v34  ;;  %v3577_v42 = vpop.eup %3576 }
0x128a   :  { %v2716_v52 = vmax.f32 %v2708_v25, 1e-08  ;;  %v2526_v41 = vsel %vm2524_vm5, %v2525_v19, %v2523_v27  ;;  %3582 = vrcp.f32 %v2552_v49  ;;  %v2691_v62 = vsel %vm2690_vm8, %v4685_v33, %v2689_v28  ;;  %v3579_v31 = vpop.eup %3578 }
0x128b   :  { %v2639_v54 = vsel %vm2638_vm3, %v4476_v21, %v2637_v13  ;;  %v2546_v57 = vmax.f32 %v2526_v41, 1e-08  ;;  %v2641_v14 = vand.u32 2147483648, %v4476_v21  ;;  %v2694_v43 = vsel %vm2692_vm4, %v2693_v47, %v2691_v62 }
0x128c   :  { %v2720_v56 = vmul.f32 %v2716_v52, %v2712_v20  ;;  %v2542_v5 = vmax.f32 %v2470_v44, 1e-08  ;;  %v2714_v32 = vmax.f32 %v2694_v43, 1e-08  ;;  %vm2891_vm2 = vcmask 23552  }
0x128d   :  { %v2642_v40 = vsel %vm2640_vm7, %v2641_v14, %v2639_v54  ;;  %v2877_v30 = vmul.f32 %v3579_v31, %v4650_v55  ;;  %vm2896_vm9 = vcmask 31744   ;;  %vm2797_vm10 = vcmp.eq.f32.partialorder %v4539_v39, inf }
0x128e   :  { %3584 = vrcp.f32 %v2720_v56  ;;  %v2550_v48 = vmul.f32 %v2546_v57, %v2542_v5  ;;  %v2710_v10 = vmax.f32 %v2642_v40, 1e-08  ;;  %v2800_v34 = vand.u32 2147483648, %v4539_v39 }
0x128f   :  { %v2807_v56 = vand.u32 2147483648, %v4542_v36  ;;  %vm2806_vm13 = vcmp.eq.f32.partialorder %v4542_v36, 0.0  ;;  %vm2790_vm0 = vcmp.eq.f32.partialorder %v4529_v58, inf  ;;  %vm2792_vm8 = vcmp.eq.f32.partialorder %v4529_v58, 0.0 }
0x1290   :  { %3586 = vrcp.f32 %v2550_v48  ;;  %v2718_v21 = vmul.f32 %v2714_v32, %v2710_v10  ;;  %v2793_v32 = vand.u32 2147483648, %v4529_v58 }
0x1291   :  { %v3581_v29 = vpop.eup %3580 }
0x1292   :  { %3588 = vrcp.f32 %v2718_v21 }
0x1293   :  { %3590 = vrsqrt.f32 %v4539_v39 }
0x1294   :  { %3592 = vrsqrt.f32 %v4542_v36 }
0x1295   :  { %v2419_v4 = vpop.xlane.xlu0 %2418  ;;  %3594 = vrsqrt.f32 %v4529_v58 }
0x1296   :  { %v2557_v9 = vmul.f32 %v3577_v42, %v2419_v4 }
0x1297   :  { %v3583_v50 = vpop.eup %3582 }
0x1298   :  { %v2882_v6 = vsel %vm2881_vm15, %v4619_v11, %v2557_v9 }
0x1299   :  { %v2595_v33 = vpop.xlane.xlu0 %2594 }
0x129a   :  { %v2725_v15 = vmul.f32 %v3581_v29, %v2595_v33 }
0x129b   :  { %v3585_v55 = vpop.eup %3584 }
0x129c   :  { %v2887_v37 = vsel %vm2886_vm6, %v2882_v6, %v2725_v15 }
0x129d   :  { %v2892_v17 = vsel %vm2891_vm2, %v2887_v37, %v2877_v30  ;;  %v2428_v53 = vpop.xlane.xlu0 %2427  ;;  %v3587_v7 = vpop.eup %3586 }
0x129e   :  { %v2897_v8 = vsel %vm2896_vm9, %v2892_v17, 0.0  ;;  %v2560_v18 = vmul.f32 %v3583_v50, %v2428_v53 }
0x129f   :  { %2901 = vst [vmem:[%s4844_s28] sm:$0xff] %v2897_v8  ;;  %v3589_v16 = vpop.eup %3588 }
0x12a0   :  { %v2885_v11 = vsel %vm2881_vm15, %v4574_v24, %v2560_v18  ;;  %v3591_v61 = vpop.eup %3590 }
0x12a1   :  { %v2796_v26 = vmul.f32 %v3591_v61, %v4539_v39  ;;  %v3593_v27 = vpop.eup %3592 }
0x12a2   :  { %v3595_v28 = vpop.eup %3594 }
0x12a3   :  { %v2604_v45 = vpop.xlane.xlu0 %2603  ;;  %v2798_v19 = vsel %vm2797_vm10, %v4539_v39, %v2796_v26  ;;  %v2789_v41 = vmul.f32 %v3595_v28, %v4529_v58 }
0x12a4   :  { %v2728_v3 = vmul.f32 %v3585_v55, %v2604_v45 }
0x12a5   :  { %v2791_v5 = vsel %vm2790_vm0, %v4529_v58, %v2789_v41 }
0x12a6   :  { %v4772_v12 = vsel %vm2886_vm6, %v2885_v11, %v2728_v3  ;;  %v2794_v29 = vsel %vm2792_vm8, %v2793_v32, %v2791_v5 }
0x12a7   :  { %v2829_v46 = vpop.xlane.xlu0 %2828  ;;  %v2422_v22 = vpop.xlane.xlu1 %2421  ;;  %v2862_v21 = vmax.f32 %v2794_v29, 1e-08 }
0x12a8   :  { %3596 = vrsqrt.f32 %v2829_v46  ;;  %v2558_v1 = vmul.f32 %v3587_v7, %v2422_v22  ;;  %vm2849_vm11 = vcmp.eq.f32.partialorder %v2829_v46, inf  ;;  %v2852_v20 = vand.u32 2147483648, %v2829_v46 }
0x12a9   :  { %vm2851_vm12 = vcmp.eq.f32.partialorder %v2829_v46, 0.0 }
0x12aa   :  { %v2883_v24 = vsel %vm2881_vm15, %v4603_v60, %v2558_v1  ;;  %v2803_v60 = vmul.f32 %v3593_v27, %v4542_v36  ;;  %vm2799_vm15 = vcmp.eq.f32.partialorder %v4539_v39, 0.0 }
0x12ab   :  { %v2832_v2 = vpop.xlane.xlu0 %2831  ;;  %v2598_v38 = vpop.xlane.xlu1 %2597  ;;  %v2801_v13 = vsel %vm2799_vm15, %v2800_v34, %v2798_v19 }
0x12ac   :  { %3598 = vrsqrt.f32 %v2832_v2  ;;  %v2726_v0 = vmul.f32 %v3589_v16, %v2598_v38  ;;  %v2863_v57 = vmax.f32 %v2801_v13, 1e-08  ;;  %vm2856_vm1 = vcmp.eq.f32.partialorder %v2832_v2, inf }
0x12ad   :  { %v2859_v42 = vand.u32 2147483648, %v2832_v2  ;;  %vm2858_vm5 = vcmp.eq.f32.partialorder %v2832_v2, 0.0 }
0x12ae   :  { %v4778_v25 = vsel %vm2886_vm6, %v2883_v24, %v2726_v0  ;;  %vm2804_vm6 = vcmp.eq.f32.partialorder %v4542_v36, inf }
0x12af   :  { %v2826_v49 = vpop.xlane.xlu1 %2825  ;;  %v2805_v62 = vsel %vm2804_vm6, %v4542_v36, %v2803_v60 }
0x12b0   :  { %3600 = vrsqrt.f32 %v2826_v49  ;;  %v2808_v43 = vsel %vm2806_vm13, %v2807_v56, %v2805_v62  ;;  %vm2842_vm14 = vcmp.eq.f32.partialorder %v2826_v49, inf  ;;  %v2845_v10 = vand.u32 2147483648, %v2826_v49 }
0x12b1   :  { %v2864_v31 = vmax.f32 %v2808_v43, 1e-08  ;;  %vm2844_vm3 = vcmp.eq.f32.partialorder %v2826_v49, 0.0 }
0x12b5   :  { %v3597_v52 = vpop.eup %3596 }
0x12b6   :  { %v2848_v35 = vmul.f32 %v3597_v52, %v2829_v46 }
0x12b8   :  { %v2850_v44 = vsel %vm2849_vm11, %v2829_v46, %v2848_v35 }
0x12b9   :  { %v3599_v47 = vpop.eup %3598  ;;  %v2853_v54 = vsel %vm2851_vm12, %v2852_v20, %v2850_v44 }
0x12ba   :  { %v2867_v39 = vmax.f32 %v2853_v54, 1e-08  ;;  %v2855_v14 = vmul.f32 %v3599_v47, %v2832_v2 }
0x12bc   :  { %v2871_v4 = vmul.f32 %v2867_v39, %v2863_v57  ;;  %v2857_v40 = vsel %vm2856_vm1, %v2832_v2, %v2855_v14 }
0x12bd   :  { %v3601_v9 = vpop.eup %3600  ;;  %v2860_v48 = vsel %vm2858_vm5, %v2859_v42, %v2857_v40 }
0x12be   :  { %3602 = vrcp.f32 %v2871_v4  ;;  %v2868_v36 = vmax.f32 %v2860_v48, 1e-08  ;;  %v2841_v6 = vmul.f32 %v3601_v9, %v2826_v49 }
0x12c0   :  { %v2872_v33 = vmul.f32 %v2868_v36, %v2864_v31  ;;  %v2843_v15 = vsel %vm2842_vm14, %v2826_v49, %v2841_v6 }
0x12c1   :  { %v2846_v30 = vsel %vm2844_vm3, %v2845_v10, %v2843_v15 }
0x12c2   :  { %3604 = vrcp.f32 %v2872_v33  ;;  %v2866_v37 = vmax.f32 %v2846_v30, 1e-08 }
0x12c4   :  { %v2870_v50 = vmul.f32 %v2866_v37, %v2862_v21 }
0x12c6   :  { %3606 = vrcp.f32 %v2870_v50 }
0x12cb   :  { %v3603_v17 = vpop.eup %3602 }
0x12cc   :  { %v2879_v58 = vmul.f32 %v3603_v17, %v4616_v63 }
0x12ce   :  { %v2894_v53 = vsel %vm2891_vm2, %v4726_v23, %v2879_v58 }
0x12cf   :  { %v3605_v8 = vpop.eup %3604  ;;  %v2899_v18 = vsel %vm2896_vm9, %v2894_v53, 0.0 }
0x12d0   :  { %2903 = vst [vmem:[%s4844_s28 + $0x10] sm:$0xff] %v2899_v18  ;;  %v2880_v11 = vmul.f32 %v3605_v8, %v4691_v51 }
0x12d2   :  { %v2895_v55 = vsel %vm2891_vm2, %v4772_v12, %v2880_v11 }
0x12d3   :  { %v3607_v45 = vpop.eup %3606  ;;  %v2900_v3 = vsel %vm2896_vm9, %v2895_v55, 0.0 }
0x12d4   :  { %2904 = vst [vmem:[%s4844_s28 + $0x18] sm:$0xff] %v2900_v3  ;;  %v2878_v63 = vmul.f32 %v3607_v45, %v4768_v59 }
0x12d6   :  { %v2893_v23 = vsel %vm2891_vm2, %v4778_v25, %v2878_v63 }
0x12d7   :  { %v2898_v46 = vsel %vm2896_vm9, %v2893_v23, 0.0 }
0x12d8   :  { %2902 = vst [vmem:[%s4844_s28 + $0x8] sm:$0xff] %v2898_v46 }
0x12d9   :  { %3628 = dma.done.wait [#allocation4], 256  }
0x12da   :  { %3629 = vsyncadd [#allocation4], 4294967040 }
0x12db   :  { %2928 = vsyncpa [#allocation4], 1 }

</bundles_post_ra>
